<compile_context>
chip_gen: v5e
topology: v5e:2x2
jax: 0.10.0
libtpu: 0.0.40
codegen_flags: <defaults>
</compile_context>

<pallas_src>
import functools

import jax
import jax.numpy as jnp
from jax.experimental import pallas as pl
from jax.experimental.pallas import tpu as pltpu

EMBED_SIZE = 384
HIDDEN_SIZE = 4 * EMBED_SIZE   # 1536
HIDDEN_CHUNK = 512             # 1536 = 3 * 512 (multiple of 128 lanes)


def _round_up(x, m):
    return ((x + m - 1) // m) * m


# ----------------------------------------------------------------------------
# Fused MLP kernel: o = relu(x @ W1 + b1) @ W2 + b2   (one M-tile per grid step)
# Hidden dim processed in 512-wide chunks; MXU matmuls in bf16, f32 accumulate.
# ----------------------------------------------------------------------------
def _ff_kernel(x_ref, w1_ref, b1_ref, w2_ref, b2_ref, o_ref):
    x = x_ref[...].astype(jnp.bfloat16)                       # (TM, D)
    acc = jnp.zeros(o_ref.shape, jnp.float32)                 # (TM, D) f32
    for c in range(HIDDEN_SIZE // HIDDEN_CHUNK):               # static unroll x3
        lo = c * HIDDEN_CHUNK
        hi = lo + HIDDEN_CHUNK
        h = jnp.dot(x, w1_ref[:, lo:hi],
                    preferred_element_type=jnp.float32)        # (TM, 512) f32
        h = jnp.maximum(h + b1_ref[:, lo:hi], 0.0)             # bias + ReLU f32
        acc = acc + jnp.dot(h.astype(jnp.bfloat16), w2_ref[lo:hi, :],
                            preferred_element_type=jnp.float32)
    o_ref[...] = acc + b2_ref[...]


def ff_layer(x, w1, b1, w2, b2, *, tile_m=1024):
    """Fused feed-forward: relu(x @ w1 + b1) @ w2 + b2.

    x: (..., D).  w1: (D, 4D), w2: (4D, D) — transpose of PyTorch nn.Linear
    weights (y = x @ W + b).  w1/w2 should be stored as bf16 (see init_params);
    the astype below is then a no-op.  Dropout is identity (eval mode).
    """
    orig_shape = x.shape
    d = orig_shape[-1]
    dh = w1.shape[1]
    assert d == EMBED_SIZE and dh == HIDDEN_SIZE

    x2 = x.reshape(-1, d).astype(jnp.float32)
    m = x2.shape[0]

    # Balanced tiling: pick the grid first, then the (multiple-of-8) tile rows.
    grid_m = pl.cdiv(m, tile_m)
    if grid_m == 1 and m >= 512:
        grid_m = 2  # give both v7x TensorCores work on mid-size batches
    tm = _round_up(pl.cdiv(m, grid_m), 8)
    m_pad = grid_m * tm
    if m_pad != m:
        x2 = jnp.pad(x2, ((0, m_pad - m), (0, 0)))

    # Already-bf16 weights pass through unchanged (no per-call convert).
    w1b = w1.astype(jnp.bfloat16)
    w2b = w2.astype(jnp.bfloat16)
    b1r = b1.reshape(1, dh).astype(jnp.float32)
    b2r = b2.reshape(1, d).astype(jnp.float32)

    resident = dict(pipeline_mode=pl.Buffered(1))  # constant-index blocks

    cost = pl.CostEstimate(
        flops=4 * m_pad * d * dh,                     # two GEMMs
        transcendentals=0,
        bytes_accessed=(m_pad * d * 4                 # x in (f32)
                        + m_pad * d * 4               # out (f32)
                        + (d * dh + dh * d) * 2       # bf16 weights
                        + (dh + d) * 4),              # biases
    )

    out = pl.pallas_call(
        _ff_kernel,
        out_shape=jax.ShapeDtypeStruct((m_pad, d), jnp.float32),
        grid=(grid_m,),
        in_specs=[
            pl.BlockSpec((tm, d), lambda i: (i, 0)),                 # x (streamed)
            pl.BlockSpec((d, dh), lambda i: (0, 0), **resident),     # W1 (resident)
            pl.BlockSpec((1, dh), lambda i: (0, 0), **resident),     # b1 (resident)
            pl.BlockSpec((dh, d), lambda i: (0, 0), **resident),     # W2 (resident)
            pl.BlockSpec((1, d), lambda i: (0, 0), **resident),      # b2 (resident)
        ],
        out_specs=pl.BlockSpec((tm, d), lambda i: (i, 0)),
        compiler_params=pltpu.CompilerParams(
            dimension_semantics=("parallel",),
            # ~16 MiB real footprint at TM=1024; 48 MiB leaves headroom on
            # v7x (64 MiB physical per TC) and is well within v5e/v6e VMEM.
            vmem_limit_bytes=48 * 1024 * 1024,
        ),
        cost_estimate=cost,
    )(x2, w1b, b1r, w2b, b2r)

    return out[:m].reshape(orig_shape)


# ----------------------------------------------------------------------------
# Parameter init (deterministic, synthetic; bf16 weights cached once) and a
# pure-JAX reference.
# ----------------------------------------------------------------------------
def init_params(key):
    k1, k2 = jax.random.split(key)
    scale = 0.02
    return {
        # Stored as bf16 once — no per-forward HBM convert pass.
        "w1": (scale * jax.random.normal(
            k1, (EMBED_SIZE, HIDDEN_SIZE), dtype=jnp.float32)).astype(jnp.bfloat16),
        "b1": jnp.zeros((HIDDEN_SIZE,), jnp.float32),
        "w2": (scale * jax.random.normal(
            k2, (HIDDEN_SIZE, EMBED_SIZE), dtype=jnp.float32)).astype(jnp.bfloat16),
        "b2": jnp.zeros((EMBED_SIZE,), jnp.float32),
    }


def ff_layer_ref(x, w1, b1, w2, b2):
    h = jnp.maximum(x @ w1.astype(jnp.float32) + b1, 0.0)
    return h @ w2.astype(jnp.float32) + b2


if __name__ == "__main__":
    key = jax.random.PRNGKey(0)
    pkey, xkey = jax.random.split(key)
    params = init_params(pkey)

    B, T = 2, 8  # small shapes; feature dim fixed at embed_size=384
    x = jax.random.normal(xkey, (B, T, EMBED_SIZE), dtype=jnp.float32)

    fwd = jax.jit(functools.partial(ff_layer))
    y = fwd(x, params["w1"], params["b1"], params["w2"], params["b2"])
    y = jax.block_until_ready(y)

    assert y.shape == (B, T, EMBED_SIZE), y.shape
    assert y.dtype == jnp.float32
    assert bool(jnp.all(jnp.isfinite(y)))

    # Sanity check against a pure-JAX f32 reference (bf16 matmul tolerance).
    y_ref = ff_layer_ref(x, params["w1"], params["b1"],
                         params["w2"], params["b2"])
    err = jnp.max(jnp.abs(y - y_ref))
    assert bool(err < 5e-2), f"max abs error {err}"

    print("KERNEL_OK")
</pallas_src>

<mosaic_0001>
module attributes {stable_mosaic.version = 11 : i64} {
  func.func @_ff_kernel(%arg0: i32, %arg1: memref<16x384xf32, #tpu.memory_space<vmem>>, %arg2: memref<384x1536xbf16, #tpu.memory_space<vmem>>, %arg3: memref<1x1536xf32, #tpu.memory_space<vmem>>, %arg4: memref<1536x384xbf16, #tpu.memory_space<vmem>>, %arg5: memref<1x384xf32, #tpu.memory_space<vmem>>, %arg6: memref<16x384xf32, #tpu.memory_space<vmem>>) attributes {dimension_semantics = [#tpu.dimension_semantics<parallel>], iteration_bounds = array<i64: 1>, scalar_prefetch = 0 : i64, scratch_operands = 0 : i64, tpu.core_type = #tpu.core_type<tc>, window_params = [{transform_indices = @transform_0, window_bounds = array<i64: 16, 384>}, {pipeline_mode = #tpu.pipeline_mode<synchronous>, transform_indices = @transform_1, window_bounds = array<i64: 384, 1536>}, {pipeline_mode = #tpu.pipeline_mode<synchronous>, transform_indices = @transform_2, window_bounds = array<i64: 1, 1536>}, {pipeline_mode = #tpu.pipeline_mode<synchronous>, transform_indices = @transform_3, window_bounds = array<i64: 1536, 384>}, {pipeline_mode = #tpu.pipeline_mode<synchronous>, transform_indices = @transform_4, window_bounds = array<i64: 1, 384>}, {transform_indices = @transform_5, window_bounds = array<i64: 16, 384>}]} {
    %c0 = arith.constant 0 : index
    %c0_0 = arith.constant 0 : index
    %0 = vector.load %arg1[%c0, %c0_0] : memref<16x384xf32, #tpu.memory_space<vmem>>, vector<16x384xf32>
    %1 = arith.truncf %0 : vector<16x384xf32> to vector<16x384xbf16>
    %cst = arith.constant 0.000000e+00 : f32
    %2 = vector.broadcast %cst : f32 to vector<16x384xf32>
    %c0_1 = arith.constant 0 : index
    %c0_2 = arith.constant 0 : index
    %3 = vector.load %arg2[%c0_1, %c0_2] : memref<384x1536xbf16, #tpu.memory_space<vmem>>, vector<384x512xbf16>
    %cst_3 = arith.constant dense<0.000000e+00> : vector<16x512xf32>
    %4 = tpu.matmul %1, %3, %cst_3 {dimension_numbers = #tpu.dot_dimension_numbers<[1], [0], [0], [1], [0, 0, 1, 1], [], []>} : vector<16x384xbf16>, vector<384x512xbf16>, vector<16x512xf32> -> vector<16x512xf32>
    %c0_4 = arith.constant 0 : index
    %c0_5 = arith.constant 0 : index
    %5 = vector.load %arg3[%c0_4, %c0_5] : memref<1x1536xf32, #tpu.memory_space<vmem>>, vector<1x512xf32>
    %6 = vector.broadcast %5 : vector<1x512xf32> to vector<16x512xf32>
    %7 = arith.addf %4, %6 : vector<16x512xf32>
    %cst_6 = arith.constant 0.000000e+00 : f32
    %8 = vector.broadcast %cst_6 : f32 to vector<16x512xf32>
    %9 = arith.maximumf %7, %8 : vector<16x512xf32>
    %10 = arith.truncf %9 : vector<16x512xf32> to vector<16x512xbf16>
    %c0_7 = arith.constant 0 : index
    %c0_8 = arith.constant 0 : index
    %11 = vector.load %arg4[%c0_7, %c0_8] : memref<1536x384xbf16, #tpu.memory_space<vmem>>, vector<512x384xbf16>
    %cst_9 = arith.constant dense<0.000000e+00> : vector<16x384xf32>
    %12 = tpu.matmul %10, %11, %cst_9 {dimension_numbers = #tpu.dot_dimension_numbers<[1], [0], [0], [1], [0, 0, 1, 1], [], []>} : vector<16x512xbf16>, vector<512x384xbf16>, vector<16x384xf32> -> vector<16x384xf32>
    %13 = arith.addf %2, %12 : vector<16x384xf32>
    %c0_10 = arith.constant 0 : index
    %c512 = arith.constant 512 : index
    %14 = vector.load %arg2[%c0_10, %c512] : memref<384x1536xbf16, #tpu.memory_space<vmem>>, vector<384x512xbf16>
    %cst_11 = arith.constant dense<0.000000e+00> : vector<16x512xf32>
    %15 = tpu.matmul %1, %14, %cst_11 {dimension_numbers = #tpu.dot_dimension_numbers<[1], [0], [0], [1], [0, 0, 1, 1], [], []>} : vector<16x384xbf16>, vector<384x512xbf16>, vector<16x512xf32> -> vector<16x512xf32>
    %c0_12 = arith.constant 0 : index
    %c512_13 = arith.constant 512 : index
    %16 = vector.load %arg3[%c0_12, %c512_13] : memref<1x1536xf32, #tpu.memory_space<vmem>>, vector<1x512xf32>
    %17 = vector.broadcast %16 : vector<1x512xf32> to vector<16x512xf32>
    %18 = arith.addf %15, %17 : vector<16x512xf32>
    %cst_14 = arith.constant 0.000000e+00 : f32
    %19 = vector.broadcast %cst_14 : f32 to vector<16x512xf32>
    %20 = arith.maximumf %18, %19 : vector<16x512xf32>
    %21 = arith.truncf %20 : vector<16x512xf32> to vector<16x512xbf16>
    %c512_15 = arith.constant 512 : index
    %c0_16 = arith.constant 0 : index
    %22 = vector.load %arg4[%c512_15, %c0_16] : memref<1536x384xbf16, #tpu.memory_space<vmem>>, vector<512x384xbf16>
    %cst_17 = arith.constant dense<0.000000e+00> : vector<16x384xf32>
    %23 = tpu.matmul %21, %22, %cst_17 {dimension_numbers = #tpu.dot_dimension_numbers<[1], [0], [0], [1], [0, 0, 1, 1], [], []>} : vector<16x512xbf16>, vector<512x384xbf16>, vector<16x384xf32> -> vector<16x384xf32>
    %24 = arith.addf %13, %23 : vector<16x384xf32>
    %c0_18 = arith.constant 0 : index
    %c1024 = arith.constant 1024 : index
    %25 = vector.load %arg2[%c0_18, %c1024] : memref<384x1536xbf16, #tpu.memory_space<vmem>>, vector<384x512xbf16>
    %cst_19 = arith.constant dense<0.000000e+00> : vector<16x512xf32>
    %26 = tpu.matmul %1, %25, %cst_19 {dimension_numbers = #tpu.dot_dimension_numbers<[1], [0], [0], [1], [0, 0, 1, 1], [], []>} : vector<16x384xbf16>, vector<384x512xbf16>, vector<16x512xf32> -> vector<16x512xf32>
    %c0_20 = arith.constant 0 : index
    %c1024_21 = arith.constant 1024 : index
    %27 = vector.load %arg3[%c0_20, %c1024_21] : memref<1x1536xf32, #tpu.memory_space<vmem>>, vector<1x512xf32>
    %28 = vector.broadcast %27 : vector<1x512xf32> to vector<16x512xf32>
    %29 = arith.addf %26, %28 : vector<16x512xf32>
    %cst_22 = arith.constant 0.000000e+00 : f32
    %30 = vector.broadcast %cst_22 : f32 to vector<16x512xf32>
    %31 = arith.maximumf %29, %30 : vector<16x512xf32>
    %32 = arith.truncf %31 : vector<16x512xf32> to vector<16x512xbf16>
    %c1024_23 = arith.constant 1024 : index
    %c0_24 = arith.constant 0 : index
    %33 = vector.load %arg4[%c1024_23, %c0_24] : memref<1536x384xbf16, #tpu.memory_space<vmem>>, vector<512x384xbf16>
    %cst_25 = arith.constant dense<0.000000e+00> : vector<16x384xf32>
    %34 = tpu.matmul %32, %33, %cst_25 {dimension_numbers = #tpu.dot_dimension_numbers<[1], [0], [0], [1], [0, 0, 1, 1], [], []>} : vector<16x512xbf16>, vector<512x384xbf16>, vector<16x384xf32> -> vector<16x384xf32>
    %35 = arith.addf %24, %34 : vector<16x384xf32>
    %c0_26 = arith.constant 0 : index
    %c0_27 = arith.constant 0 : index
    %36 = vector.load %arg5[%c0_26, %c0_27] : memref<1x384xf32, #tpu.memory_space<vmem>>, vector<1x384xf32>
    %37 = vector.broadcast %36 : vector<1x384xf32> to vector<16x384xf32>
    %38 = arith.addf %35, %37 : vector<16x384xf32>
    %c0_28 = arith.constant 0 : index
    %c0_29 = arith.constant 0 : index
    %39 = vector.load %arg6[%c0_28, %c0_29] : memref<16x384xf32, #tpu.memory_space<vmem>>, vector<16x384xf32>
    tpu.vector_store %arg6[%c0_28, %c0_29], %38 {strides = array<i32>} : memref<16x384xf32, #tpu.memory_space<vmem>>, vector<16x384xf32>,
    return
  }
  func.func @transform_0(%arg0: i32) -> (i32, i32) {
    %c0_i32 = arith.constant 0 : i32
    %c0_i32_0 = arith.constant 0 : i32
    return %arg0, %c0_i32 : i32, i32
  }
  func.func @transform_1(%arg0: i32) -> (i32, i32) {
    %c0_i32 = arith.constant 0 : i32
    %c0_i32_0 = arith.constant 0 : i32
    %c0_i32_1 = arith.constant 0 : i32
    return %c0_i32, %c0_i32_0 : i32, i32
  }
  func.func @transform_2(%arg0: i32) -> (i32, i32) {
    %c0_i32 = arith.constant 0 : i32
    %c0_i32_0 = arith.constant 0 : i32
    %c0_i32_1 = arith.constant 0 : i32
    return %c0_i32, %c0_i32_0 : i32, i32
  }
  func.func @transform_3(%arg0: i32) -> (i32, i32) {
    %c0_i32 = arith.constant 0 : i32
    %c0_i32_0 = arith.constant 0 : i32
    %c0_i32_1 = arith.constant 0 : i32
    return %c0_i32, %c0_i32_0 : i32, i32
  }
  func.func @transform_4(%arg0: i32) -> (i32, i32) {
    %c0_i32 = arith.constant 0 : i32
    %c0_i32_0 = arith.constant 0 : i32
    %c0_i32_1 = arith.constant 0 : i32
    return %c0_i32, %c0_i32_0 : i32, i32
  }
  func.func @transform_5(%arg0: i32) -> (i32, i32) {
    %c0_i32 = arith.constant 0 : i32
    %c0_i32_0 = arith.constant 0 : i32
    return %arg0, %c0_i32 : i32, i32
  }
}

</mosaic_0001>

<bundles_post_ra>
// kernel: ff_layer.1
= control target key start
LH: loop header
LB: loop body
LE: loop exit
PB: predicated region body
PF: predicated region fallthrough
CT: control target
= control target key end

     0   :  { %10 = vsyncpa [#allocation3], 0  ;;  %s8156_s0 = inlined_call_operand.hbm [shape: f32[16,384], index: 0, kind: input, shape index: {}]   ;;  %s8157_s1 = inlined_call_operand.hbm [shape: bf16[384,1536], index: 1, kind: input, shape index: {}]   ;;  %s8158_s2 = inlined_call_operand.vmem [shape: f32[1,1536], index: 2, kind: input, shape index: {}]   ;;  %s8159_s3 = inlined_call_operand.hbm [shape: bf16[1536,384], index: 3, kind: input, shape index: {}]   ;;  %s8160_s4 = inlined_call_operand.vmem [shape: f32[1,384], index: 4, kind: input, shape index: {}]   ;;  %s8161_s5 = inlined_call_operand.hbm [shape: f32[16,384], index: 5, kind: output, shape index: {}]  }
   0x1   :  { %11 = vsyncpa [#allocation6], 0  ;;  %s30_s20 = sshll.u32 %s8157_s1, 4  ;;  %s31_s20 = int_to_ptr.hbm [resolvable:$true] %s30_s20 }
   0x2   :  { %12 = vsyncpa [#allocation4], 0  ;;  %s7837_s21 = smov [#allocation5]   ;;  %s17_s25 = sshll.u32 %s8156_s0, 4  ;;  %s18_s25 = int_to_ptr.hbm [resolvable:$true] %s17_s25 }
   0x3   :  { %s32_s22 = sshll.u32 %s7837_s21, 4  ;;  %s7838_s26 = smov 768   ;;  %s33_s22 = int_to_ptr.vmem [resolvable:$true] %s32_s22 }
   0x4   :  { %s7839_s27 = smov 48   ;;  %s7840_s28 = smov [#allocation2]  }
   0x5   :  { %38 = dma.hbm_to_vmem [thread:$0]  %s31_s20, 36864, %s33_s22, [#allocation6], %s7838_s26, %s7838_s26, %s7839_s27  }
   0x6   :  { %s19_s29 = sshll.u32 %s7840_s28, 4  ;;  %s7841_s30 = smov 384   ;;  %s20_s29 = int_to_ptr.vmem [resolvable:$true] %s19_s29 }
   0x7   :  { %s7842_s6 = smov 24   ;;  %s45_s8 = sshll.u32 %s8159_s3, 4  ;;  %s46_s8 = int_to_ptr.hbm [resolvable:$true] %s45_s8 }
   0x8   :  { %25 = dma.hbm_to_vmem [thread:$0]  %s18_s25, 768, %s20_s29, [#allocation3], %s7841_s30, %s7841_s30, %s7842_s6  }
   0x9   :  { %s7843_s9 = smov [#allocation7]   ;;  %s7844_s10 = smov 192  }
   0xa   :  { %s47_s0 = sshll.u32 %s7843_s9, 4  ;;  %s7845_s11 = smov 12   ;;  %s48_s0 = int_to_ptr.vmem [resolvable:$true] %s47_s0 }
   0xb   :  { %53 = dma.hbm_to_vmem [thread:$0]  %s46_s8, 36864, %s48_s0, [#allocation6], %s7844_s10, %s7844_s10, %s7845_s11  }
   0xc   :  { %7831 = dma.done.wait [#allocation3], 768  }
   0xd   :  { %7832 = vsyncadd [#allocation3], 4294966528 }
   0xe   :  { %7833 = dma.done.wait [#allocation6], 73728  }
   0xf   :  { %7834 = vsyncadd [#allocation6], 4294893568  ;;  %v4959_v0 = vld [vmem:[#allocation5 + $0x2a0] sm:$0xf]  ;;  %v7179_v1 = vld [vmem:[#allocation5 + $0x2cc] sm:$0xf0] }
  0x10   :  { %v5087_v2 = vld [vmem:[#allocation5 + $0x5a0] sm:$0xf]  ;;  %v4960_v3 = vor.u32 %v7179_v1, %v4959_v0  ;;  %v7211_v4 = vld [vmem:[#allocation5 + $0x5cc] sm:$0xf0]  ;;  %v7177_v9 = vld [vmem:[#allocation5 + $0x2a4] sm:$0xf] }
  0x11   :  { %v5215_v5 = vld [vmem:[#allocation5 + $0x8a0] sm:$0xf]  ;;  %v7243_v6 = vld [vmem:[#allocation5 + $0x8cc] sm:$0xf0]  ;;  %v5088_v7 = vor.u32 %v7211_v4, %v5087_v2  ;;  %v4961_v10 = vld [vmem:[#allocation5 + $0x2d0] sm:$0xf0] }
  0x12   :  { %v5216_v8 = vor.u32 %v7243_v6, %v5215_v5  ;;  %v4943_v11 = vld [vmem:[#allocation5 + $0x240] sm:$0xf]  ;;  %663 = vmatpush.bf16.msra.mxu0 %v4960_v3  ;;  %v4964_v12 = vor.u32 %v7177_v9, %v4961_v10  ;;  %v7175_v13 = vld [vmem:[#allocation5 + $0x26c] sm:$0xf0]  ;;  %v7173_v20 = vld [vmem:[#allocation5 + $0x244] sm:$0xf] }
  0x13   :  { %v5071_v14 = vld [vmem:[#allocation5 + $0x540] sm:$0xf]  ;;  %v7207_v15 = vld [vmem:[#allocation5 + $0x56c] sm:$0xf0]  ;;  %677 = vmatpush.bf16.msra.mxu1 %v5088_v7  ;;  %v4944_v16 = vor.u32 %v7175_v13, %v4943_v11  ;;  %v4945_v22 = vld [vmem:[#allocation5 + $0x270] sm:$0xf0] }
  0x14   :  { %691 = vmatpush.bf16.msra.mxu2 %v5216_v8  ;;  %v5072_v17 = vor.u32 %v7207_v15, %v5071_v14  ;;  %v5199_v18 = vld [vmem:[#allocation5 + $0x840] sm:$0xf]  ;;  %v7239_v19 = vld [vmem:[#allocation5 + $0x86c] sm:$0xf0]  ;;  %705 = vmatpush.bf16.msra.mxu3 %v4964_v12  ;;  %v4948_v25 = vor.u32 %v7173_v20, %v4945_v22  ;;  %v7169_v31 = vld [vmem:[#allocation5 + $0x1e4] sm:$0xf] }
  0x15   :  { %v5200_v21 = vor.u32 %v7239_v19, %v5199_v18  ;;  %v4927_v23 = vld [vmem:[#allocation5 + $0x1e0] sm:$0xf]  ;;  %v7171_v24 = vld [vmem:[#allocation5 + $0x20c] sm:$0xf0]  ;;  %v4929_v32 = vld [vmem:[#allocation5 + $0x210] sm:$0xf0] }
  0x16   :  { %v5055_v26 = vld [vmem:[#allocation5 + $0x4e0] sm:$0xf]  ;;  %v7203_v27 = vld [vmem:[#allocation5 + $0x50c] sm:$0xf0]  ;;  %664 = vmatpush.bf16.msra.mxu0 %v4944_v16  ;;  %v4928_v29 = vor.u32 %v7171_v24, %v4927_v23  ;;  %v4932_v38 = vor.u32 %v7169_v31, %v4929_v32  ;;  %v7165_v42 = vld [vmem:[#allocation5 + $0x184] sm:$0xf] }
  0x17   :  { %v5183_v28 = vld [vmem:[#allocation5 + $0x7e0] sm:$0xf]  ;;  %v7235_v30 = vld [vmem:[#allocation5 + $0x80c] sm:$0xf0]  ;;  %678 = vmatpush.bf16.msra.mxu1 %v5072_v17  ;;  %v5056_v33 = vor.u32 %v7203_v27, %v5055_v26  ;;  %v4913_v43 = vld [vmem:[#allocation5 + $0x1b0] sm:$0xf0] }
  0x18   :  { %692 = vmatpush.bf16.msra.mxu2 %v5200_v21  ;;  %v5184_v34 = vor.u32 %v7235_v30, %v5183_v28  ;;  %v4911_v35 = vld [vmem:[#allocation5 + $0x180] sm:$0xf]  ;;  %v7167_v36 = vld [vmem:[#allocation5 + $0x1ac] sm:$0xf0]  ;;  %706 = vmatpush.bf16.msra.mxu3 %v4948_v25  ;;  %v4916_v50 = vor.u32 %v7165_v42, %v4913_v43  ;;  %v7161_v54 = vld [vmem:[#allocation5 + $0x124] sm:$0xf] }
  0x19   :  { %v5039_v37 = vld [vmem:[#allocation5 + $0x480] sm:$0xf]  ;;  %v7199_v39 = vld [vmem:[#allocation5 + $0x4ac] sm:$0xf0]  ;;  %v4912_v44 = vor.u32 %v7167_v36, %v4911_v35  ;;  %v4897_v55 = vld [vmem:[#allocation5 + $0x150] sm:$0xf0] }
  0x1a   :  { %v5167_v40 = vld [vmem:[#allocation5 + $0x780] sm:$0xf]  ;;  %v7231_v41 = vld [vmem:[#allocation5 + $0x7ac] sm:$0xf0]  ;;  %665 = vmatpush.bf16.msra.mxu0 %v4928_v29  ;;  %v5040_v45 = vor.u32 %v7199_v39, %v5039_v37  ;;  %v4900_v62 = vor.u32 %v7161_v54, %v4897_v55  ;;  %v7157_v2 = vld [vmem:[#allocation5 + $0xc4] sm:$0xf] }
  0x1b   :  { %679 = vmatpush.bf16.msra.mxu1 %v5056_v33  ;;  %v5168_v46 = vor.u32 %v7231_v41, %v5167_v40  ;;  %v4895_v47 = vld [vmem:[#allocation5 + $0x120] sm:$0xf]  ;;  %v7163_v48 = vld [vmem:[#allocation5 + $0x14c] sm:$0xf0]  ;;  %v4881_v3 = vld [vmem:[#allocation5 + $0xf0] sm:$0xf0] }
  0x1c   :  { %693 = vmatpush.bf16.msra.mxu2 %v5184_v34  ;;  %v5023_v49 = vld [vmem:[#allocation5 + $0x420] sm:$0xf]  ;;  %707 = vmatpush.bf16.msra.mxu3 %v4932_v38  ;;  %v7195_v51 = vld [vmem:[#allocation5 + $0x44c] sm:$0xf0]  ;;  %v4896_v56 = vor.u32 %v7163_v48, %v4895_v47  ;;  %v4884_v10 = vor.u32 %v7157_v2, %v4881_v3  ;;  %v7153_v14 = vld [vmem:[#allocation5 + $0x64] sm:$0xf] }
  0x1d   :  { %v5151_v52 = vld [vmem:[#allocation5 + $0x720] sm:$0xf]  ;;  %v7227_v53 = vld [vmem:[#allocation5 + $0x74c] sm:$0xf0]  ;;  %v5024_v57 = vor.u32 %v7195_v51, %v5023_v49  ;;  %v4865_v15 = vld [vmem:[#allocation5 + $0x90] sm:$0xf0] }
  0x1e   :  { %666 = vmatpush.bf16.msra.mxu0 %v4912_v44  ;;  %v5152_v58 = vor.u32 %v7227_v53, %v5151_v52  ;;  %v4879_v59 = vld [vmem:[#allocation5 + $0xc0] sm:$0xf]  ;;  %v7159_v60 = vld [vmem:[#allocation5 + $0xec] sm:$0xf0]  ;;  %v4868_v24 = vor.u32 %v7153_v14, %v4865_v15  ;;  %v7149_v26 = vld [vmem:[#allocation5 + $0x4] sm:$0xf] }
  0x1f   :  { %680 = vmatpush.bf16.msra.mxu1 %v5040_v45  ;;  %v5007_v61 = vld [vmem:[#allocation5 + $0x3c0] sm:$0xf]  ;;  %v7191_v63 = vld [vmem:[#allocation5 + $0x3ec] sm:$0xf0]  ;;  %v4880_v4 = vor.u32 %v7159_v60, %v4879_v59  ;;  %v4849_v27 = vld [vmem:[#allocation5 + $0x30] sm:$0xf0] }
  0x20   :  { %694 = vmatpush.bf16.msra.mxu2 %v5168_v46  ;;  %708 = vmatpush.bf16.msra.mxu3 %v4916_v50  ;;  %v5135_v0 = vld [vmem:[#allocation5 + $0x6c0] sm:$0xf]  ;;  %v7223_v1 = vld [vmem:[#allocation5 + $0x6ec] sm:$0xf0]  ;;  %v5008_v5 = vor.u32 %v7191_v63, %v5007_v61  ;;  %v7209_v28 = vld [vmem:[#allocation5 + $0x5a4] sm:$0xf]  ;;  %v4852_v39 = vor.u32 %v7149_v26, %v4849_v27 }
  0x21   :  { %v5136_v6 = vor.u32 %v7223_v1, %v5135_v0  ;;  %v4863_v7 = vld [vmem:[#allocation5 + $0x60] sm:$0xf]  ;;  %v7155_v8 = vld [vmem:[#allocation5 + $0x8c] sm:$0xf0]  ;;  %v5089_v29 = vld [vmem:[#allocation5 + $0x5d0] sm:$0xf0] }
  0x22   :  { %667 = vmatpush.bf16.msra.mxu0 %v4896_v56  ;;  %v4991_v9 = vld [vmem:[#allocation5 + $0x360] sm:$0xf]  ;;  %v7187_v11 = vld [vmem:[#allocation5 + $0x38c] sm:$0xf0]  ;;  %v4864_v16 = vor.u32 %v7155_v8, %v4863_v7  ;;  %v7241_v30 = vld [vmem:[#allocation5 + $0x8a4] sm:$0xf]  ;;  %v5092_v40 = vor.u32 %v7209_v28, %v5089_v29 }
  0x23   :  { %681 = vmatpush.bf16.msra.mxu1 %v5024_v57  ;;  %v5119_v12 = vld [vmem:[#allocation5 + $0x660] sm:$0xf]  ;;  %v7219_v13 = vld [vmem:[#allocation5 + $0x68c] sm:$0xf0]  ;;  %v4992_v19 = vor.u32 %v7187_v11, %v4991_v9  ;;  %v5217_v32 = vld [vmem:[#allocation5 + $0x8d0] sm:$0xf0] }
  0x24   :  { %695 = vmatpush.bf16.msra.mxu2 %v5152_v58  ;;  %709 = vmatpush.bf16.msra.mxu3 %v4900_v62  ;;  %v4847_v17 = vld [vmem:[#allocation5] sm:$0xf]  ;;  %v7151_v18 = vld [vmem:[#allocation5 + $0x2c] sm:$0xf0]  ;;  %v5120_v20 = vor.u32 %v7219_v13, %v5119_v12  ;;  %v4967_v33 = vld [vmem:[#allocation5 + $0x2a8] sm:$0xf]  ;;  %v5220_v42 = vor.u32 %v7241_v30, %v5217_v32 }
  0x25   :  { %v4975_v21 = vld [vmem:[#allocation5 + $0x300] sm:$0xf]  ;;  %v7183_v22 = vld [vmem:[#allocation5 + $0x32c] sm:$0xf0]  ;;  %v4848_v31 = vor.u32 %v7151_v18, %v4847_v17  ;;  %v7180_v34 = vld [vmem:[#allocation5 + $0x2d4] sm:$0xf0] }
  0x26   :  { %668 = vmatpush.bf16.msra.mxu0 %v4880_v4  ;;  %v5103_v23 = vld [vmem:[#allocation5 + $0x600] sm:$0xf]  ;;  %v7215_v25 = vld [vmem:[#allocation5 + $0x62c] sm:$0xf0]  ;;  %v4976_v35 = vor.u32 %v7183_v22, %v4975_v21  ;;  %v5095_v37 = vld [vmem:[#allocation5 + $0x5a8] sm:$0xf]  ;;  %v4968_v43 = vor.u32 %v7180_v34, %v4967_v33 }
  0x27   :  { %682 = vmatpush.bf16.msra.mxu1 %v5008_v5  ;;  %v5104_v36 = vor.u32 %v7215_v25, %v5103_v23  ;;  %v7212_v38 = vld [vmem:[#allocation5 + $0x5d4] sm:$0xf0]  ;;  %v7205_v41 = vld [vmem:[#allocation5 + $0x544] sm:$0xf]  ;;  %v5073_v44 = vld [vmem:[#allocation5 + $0x570] sm:$0xf0] }
  0x28   :  { %696 = vmatpush.bf16.msra.mxu2 %v5136_v6  ;;  %710 = vmatpush.bf16.msra.mxu3 %v4884_v10  ;;  %v7237_v45 = vld [vmem:[#allocation5 + $0x844] sm:$0xf]  ;;  %v5201_v46 = vld [vmem:[#allocation5 + $0x870] sm:$0xf0]  ;;  %v5096_v47 = vor.u32 %v7212_v38, %v5095_v37  ;;  %v4951_v48 = vld [vmem:[#allocation5 + $0x248] sm:$0xf]  ;;  %v5076_v54 = vor.u32 %v7205_v41, %v5073_v44 }
  0x29   :  { %v7176_v49 = vld [vmem:[#allocation5 + $0x274] sm:$0xf0]  ;;  %v5079_v50 = vld [vmem:[#allocation5 + $0x548] sm:$0xf]  ;;  %v68_v52 = vld [vmem:[#allocation2] sm:$0xff]  ;;  %v5204_v58 = vor.u32 %v7237_v45, %v5201_v46  ;;  %s4831_s21 = sshll.u32 %s8161_s5, 4  ;;  %s4832_s21 = int_to_ptr.hbm [resolvable:$true] %s4831_s21 }
  0x2a   :  { %669 = vmatpush.bf16.msra.mxu0 %v4864_v16  ;;  %v7208_v51 = vld [vmem:[#allocation5 + $0x574] sm:$0xf0]  ;;  %v71_v53 = vld [vmem:[#allocation2 + $0x18] sm:$0xff]  ;;  %v7201_v55 = vld [vmem:[#allocation5 + $0x4e4] sm:$0xf]  ;;  %v4952_v59 = vor.u32 %v7176_v49, %v4951_v48 }
  0x2b   :  { %683 = vmatpush.bf16.msra.mxu1 %v4992_v19  ;;  %v5057_v56 = vld [vmem:[#allocation5 + $0x510] sm:$0xf0]  ;;  %v7889_v57 = vpack.c.bf16 %v71_v53, %v68_v52  ;;  %v7233_v60 = vld [vmem:[#allocation5 + $0x7e4] sm:$0xf]  ;;  %v4935_v62 = vld [vmem:[#allocation5 + $0x1e8] sm:$0xf]  ;;  %v5080_v63 = vor.u32 %v7208_v51, %v5079_v50 }
  0x2c   :  { %697 = vmatpush.bf16.msra.mxu2 %v5120_v20  ;;  %711 = vmatpush.bf16.msra.mxu3 %v4868_v24  ;;  %v5185_v61 = vld [vmem:[#allocation5 + $0x810] sm:$0xf0]  ;;  %v7172_v0 = vld [vmem:[#allocation5 + $0x214] sm:$0xf0]  ;;  %v5063_v3 = vld [vmem:[#allocation5 + $0x4e8] sm:$0xf]  ;;  %v5060_v6 = vor.u32 %v7201_v55, %v5057_v56 }
  0x2d   :  { %v69_v1 = vld [vmem:[#allocation2 + $0x8] sm:$0xff]  ;;  %v72_v2 = vld [vmem:[#allocation2 + $0x20] sm:$0xff]  ;;  %v7197_v7 = vld [vmem:[#allocation5 + $0x484] sm:$0xf]  ;;  %v5188_v9 = vor.u32 %v7233_v60, %v5185_v61  ;;  %v4936_v10 = vor.u32 %v7172_v0, %v4935_v62 }
  0x2e   :  { %670 = vmatpush.bf16.msra.mxu0 %v4848_v31  ;;  %v7204_v4 = vld [vmem:[#allocation5 + $0x514] sm:$0xf0]  ;;  %v7892_v5 = vpack.c.bf16 %v72_v2, %v69_v1  ;;  %v5041_v8 = vld [vmem:[#allocation5 + $0x4b0] sm:$0xf0]  ;;  %v7229_v11 = vld [vmem:[#allocation5 + $0x784] sm:$0xf] }
  0x2f   :  { %684 = vmatpush.bf16.msra.mxu1 %v4976_v35  ;;  %v5169_v12 = vld [vmem:[#allocation5 + $0x7b0] sm:$0xf0]  ;;  %v70_v13 = vld [vmem:[#allocation2 + $0x10] sm:$0xff]  ;;  %v5064_v14 = vor.u32 %v7204_v4, %v5063_v3  ;;  %v4919_v15 = vld [vmem:[#allocation5 + $0x188] sm:$0xf]  ;;  %v5044_v21 = vor.u32 %v7197_v7, %v5041_v8 }
  0x30   :  { %698 = vmatpush.bf16.msra.mxu2 %v5104_v36  ;;  %712 = vmatpush.bf16.msra.mxu3 %v4852_v39  ;;  %v7168_v16 = vld [vmem:[#allocation5 + $0x1b4] sm:$0xf0]  ;;  %v5047_v18 = vld [vmem:[#allocation5 + $0x488] sm:$0xf]  ;;  %v5172_v22 = vor.u32 %v7229_v11, %v5169_v12  ;;  %v7193_v24 = vld [vmem:[#allocation5 + $0x424] sm:$0xf] }
  0x31   :  { %671 = vmatmul.bf16.vlgmr.msra.gmra.mxu0 %v7889_v57  ;;  %v73_v17 = vld [vmem:[#allocation2 + $0x28] sm:$0xff]  ;;  %v4920_v23 = vor.u32 %v7168_v16, %v4919_v15  ;;  %v5025_v25 = vld [vmem:[#allocation5 + $0x450] sm:$0xf0]  ;;  %v7225_v26 = vld [vmem:[#allocation5 + $0x724] sm:$0xf] }
  0x32   :  { %719 = vmatpush.bf16.msrb.mxu0 %v5092_v40  ;;  %685 = vmatmul.bf16.vlgmr.msra.gmra.mxu1 %v7892_v5  ;;  %v7200_v19 = vld [vmem:[#allocation5 + $0x4b4] sm:$0xf0]  ;;  %v7896_v20 = vpack.c.bf16 %v73_v17, %v70_v13  ;;  %v5153_v28 = vld [vmem:[#allocation5 + $0x750] sm:$0xf0]  ;;  %v4903_v29 = vld [vmem:[#allocation5 + $0x128] sm:$0xf]  ;;  %v5028_v33 = vor.u32 %v7193_v24, %v5025_v25 }
  0x33   :  { %733 = vmatpush.bf16.msrb.mxu1 %v5220_v42  ;;  %713 = vmatmul.bf16.vlgmr.msra.gmra.mxu3 %v7889_v57  ;;  %v5048_v27 = vor.u32 %v7200_v19, %v5047_v18  ;;  %v7164_v30 = vld [vmem:[#allocation5 + $0x154] sm:$0xf0]  ;;  %v5031_v31 = vld [vmem:[#allocation5 + $0x428] sm:$0xf]  ;;  %v5156_v34 = vor.u32 %v7225_v26, %v5153_v28  ;;  %v7189_v36 = vld [vmem:[#allocation5 + $0x3c4] sm:$0xf] }
  0x34   :  { %747 = vmatpush.bf16.msrb.mxu2 %v4968_v43  ;;  %761 = vmatpush.bf16.msrb.mxu3 %v5096_v47  ;;  %v7196_v32 = vld [vmem:[#allocation5 + $0x454] sm:$0xf0]  ;;  %v4904_v35 = vor.u32 %v7164_v30, %v4903_v29  ;;  %v5009_v37 = vld [vmem:[#allocation5 + $0x3f0] sm:$0xf0]  ;;  %v7221_v38 = vld [vmem:[#allocation5 + $0x6c4] sm:$0xf] }
  0x35   :  { %699 = vmatmul.bf16.vlgmr.msra.gmra.mxu2 %v7896_v20  ;;  %v5032_v39 = vor.u32 %v7196_v32, %v5031_v31  ;;  %v5137_v40 = vld [vmem:[#allocation5 + $0x6f0] sm:$0xf0]  ;;  %v4887_v41 = vld [vmem:[#allocation5 + $0xc8] sm:$0xf]  ;;  %v7160_v42 = vld [vmem:[#allocation5 + $0xf4] sm:$0xf0]  ;;  %v5012_v45 = vor.u32 %v7189_v36, %v5009_v37 }
  0x36   :  { %720 = vmatpush.bf16.msrb.mxu0 %v5076_v54  ;;  %v5015_v43 = vld [vmem:[#allocation5 + $0x3c8] sm:$0xf]  ;;  %v7192_v44 = vld [vmem:[#allocation5 + $0x3f4] sm:$0xf0]  ;;  %v5140_v46 = vor.u32 %v7221_v38, %v5137_v40  ;;  %v4888_v47 = vor.u32 %v7160_v42, %v4887_v41  ;;  %v7185_v48 = vld [vmem:[#allocation5 + $0x364] sm:$0xf] }
  0x37   :  { %734 = vmatpush.bf16.msrb.mxu1 %v5204_v58  ;;  %v4993_v49 = vld [vmem:[#allocation5 + $0x390] sm:$0xf0]  ;;  %v7217_v50 = vld [vmem:[#allocation5 + $0x664] sm:$0xf]  ;;  %v5016_v51 = vor.u32 %v7192_v44, %v5015_v43  ;;  %v4871_v53 = vld [vmem:[#allocation5 + $0x68] sm:$0xf] }
  0x38   :  { %748 = vmatpush.bf16.msrb.mxu2 %v4952_v59  ;;  %762 = vmatpush.bf16.msrb.mxu3 %v5080_v63  ;;  %v5121_v52 = vld [vmem:[#allocation5 + $0x690] sm:$0xf0]  ;;  %v7156_v54 = vld [vmem:[#allocation5 + $0x94] sm:$0xf0]  ;;  %v4999_v55 = vld [vmem:[#allocation5 + $0x368] sm:$0xf]  ;;  %v4996_v58 = vor.u32 %v7185_v48, %v4993_v49 }
  0x39   :  { %v7188_v56 = vld [vmem:[#allocation5 + $0x394] sm:$0xf0]  ;;  %v7181_v59 = vld [vmem:[#allocation5 + $0x304] sm:$0xf]  ;;  %v4977_v60 = vld [vmem:[#allocation5 + $0x330] sm:$0xf0]  ;;  %v5124_v61 = vor.u32 %v7217_v50, %v5121_v52  ;;  %v4872_v62 = vor.u32 %v7156_v54, %v4871_v53 }
  0x3a   :  { %721 = vmatpush.bf16.msrb.mxu0 %v5060_v6  ;;  %v7213_v63 = vld [vmem:[#allocation5 + $0x604] sm:$0xf]  ;;  %v5105_v0 = vld [vmem:[#allocation5 + $0x630] sm:$0xf0]  ;;  %v4855_v1 = vld [vmem:[#allocation5 + $0x8] sm:$0xf]  ;;  %v5000_v2 = vor.u32 %v7188_v56, %v4999_v55 }
  0x3b   :  { %735 = vmatpush.bf16.msrb.mxu1 %v5188_v9  ;;  %v7152_v3 = vld [vmem:[#allocation5 + $0x34] sm:$0xf0]  ;;  %v4983_v4 = vld [vmem:[#allocation5 + $0x308] sm:$0xf]  ;;  %v7178_v9 = vld [vmem:[#allocation5 + $0x2ac] sm:$0xf] }
  0x3c   :  { %749 = vmatpush.bf16.msrb.mxu2 %v4936_v10  ;;  %763 = vmatpush.bf16.msrb.mxu3 %v5064_v14  ;;  %v7184_v6 = vld [vmem:[#allocation5 + $0x334] sm:$0xf0]  ;;  %v5223_v7 = vld [vmem:[#allocation5 + $0x8a8] sm:$0xf]  ;;  %v4980_v10 = vor.u32 %v7181_v59, %v4977_v60  ;;  %v4969_v11 = vld [vmem:[#allocation5 + $0x2d8] sm:$0xf0]  ;;  %v5108_v14 = vor.u32 %v7213_v63, %v5105_v0  ;;  %v4856_v15 = vor.u32 %v7152_v3, %v4855_v1 }
  0x3d   :  { %v7244_v8 = vld [vmem:[#allocation5 + $0x8d4] sm:$0xf0]  ;;  %v7210_v12 = vld [vmem:[#allocation5 + $0x5ac] sm:$0xf]  ;;  %v5097_v13 = vld [vmem:[#allocation5 + $0x5d8] sm:$0xf0]  ;;  %v4984_v18 = vor.u32 %v7184_v6, %v4983_v4 }
  0x3e   :  { %722 = vmatpush.bf16.msrb.mxu0 %v5044_v21  ;;  %v7242_v16 = vld [vmem:[#allocation5 + $0x8ac] sm:$0xf]  ;;  %v5225_v17 = vld [vmem:[#allocation5 + $0x8d8] sm:$0xf0]  ;;  %v5224_v19 = vor.u32 %v7244_v8, %v5223_v7  ;;  %v4972_v21 = vor.u32 %v7178_v9, %v4969_v11  ;;  %v7240_v24 = vld [vmem:[#allocation5 + $0x874] sm:$0xf0] }
  0x3f   :  { %736 = vmatpush.bf16.msrb.mxu1 %v5172_v22  ;;  %v5100_v22 = vor.u32 %v7210_v12, %v5097_v13  ;;  %v7174_v25 = vld [vmem:[#allocation5 + $0x24c] sm:$0xf]  ;;  %v5228_v26 = vor.u32 %v7242_v16, %v5225_v17  ;;  %v5081_v29 = vld [vmem:[#allocation5 + $0x578] sm:$0xf0]  ;;  %v7236_v36 = vld [vmem:[#allocation5 + $0x814] sm:$0xf0] }
  0x40   :  { %750 = vmatpush.bf16.msrb.mxu2 %v4920_v23  ;;  %764 = vmatpush.bf16.msrb.mxu3 %v5048_v27  ;;  %v5207_v23 = vld [vmem:[#allocation5 + $0x848] sm:$0xf]  ;;  %v4953_v27 = vld [vmem:[#allocation5 + $0x278] sm:$0xf0]  ;;  %v7206_v28 = vld [vmem:[#allocation5 + $0x54c] sm:$0xf] }
  0x41   :  { %v7238_v30 = vld [vmem:[#allocation5 + $0x84c] sm:$0xf]  ;;  %v5209_v31 = vld [vmem:[#allocation5 + $0x878] sm:$0xf0]  ;;  %v5208_v32 = vor.u32 %v7240_v24, %v5207_v23  ;;  %v7232_v48 = vld [vmem:[#allocation5 + $0x7b4] sm:$0xf0] }
  0x42   :  { %723 = vmatpush.bf16.msrb.mxu0 %v5028_v33  ;;  %v4956_v33 = vor.u32 %v7174_v25, %v4953_v27  ;;  %v7170_v37 = vld [vmem:[#allocation5 + $0x1ec] sm:$0xf]  ;;  %v5212_v38 = vor.u32 %v7238_v30, %v5209_v31  ;;  %v5065_v41 = vld [vmem:[#allocation5 + $0x518] sm:$0xf0]  ;;  %v5159_v60 = vld [vmem:[#allocation5 + $0x728] sm:$0xf] }
  0x43   :  { %737 = vmatpush.bf16.msrb.mxu1 %v5156_v34  ;;  %v5084_v34 = vor.u32 %v7206_v28, %v5081_v29  ;;  %v7202_v40 = vld [vmem:[#allocation5 + $0x4ec] sm:$0xf]  ;;  %v5193_v43 = vld [vmem:[#allocation5 + $0x818] sm:$0xf0]  ;;  %v5143_v9 = vld [vmem:[#allocation5 + $0x6c8] sm:$0xf] }
  0x44   :  { %751 = vmatpush.bf16.msrb.mxu2 %v4904_v35  ;;  %765 = vmatpush.bf16.msrb.mxu3 %v5032_v39  ;;  %v5191_v35 = vld [vmem:[#allocation5 + $0x7e8] sm:$0xf]  ;;  %v4937_v39 = vld [vmem:[#allocation5 + $0x218] sm:$0xf0]  ;;  %v7234_v42 = vld [vmem:[#allocation5 + $0x7ec] sm:$0xf] }
  0x45   :  { %v5192_v44 = vor.u32 %v7236_v36, %v5191_v35  ;;  %v7166_v49 = vld [vmem:[#allocation5 + $0x18c] sm:$0xf]  ;;  %v5196_v50 = vor.u32 %v7234_v42, %v5193_v43  ;;  %v5049_v53 = vld [vmem:[#allocation5 + $0x4b8] sm:$0xf0]  ;;  %v7220_v23 = vld [vmem:[#allocation5 + $0x694] sm:$0xf0] }
  0x46   :  { %724 = vmatpush.bf16.msrb.mxu0 %v5012_v45  ;;  %v4940_v45 = vor.u32 %v7170_v37, %v4937_v39  ;;  %v7198_v52 = vld [vmem:[#allocation5 + $0x48c] sm:$0xf]  ;;  %v5177_v55 = vld [vmem:[#allocation5 + $0x7b8] sm:$0xf0]  ;;  %v5343_v43 = vld [vmem:[#allocation5 + $0x2b0] sm:$0xf] }
  0x47   :  { %738 = vmatpush.bf16.msrb.mxu1 %v5140_v46  ;;  %v5068_v46 = vor.u32 %v7202_v40, %v5065_v41  ;;  %v7230_v54 = vld [vmem:[#allocation5 + $0x78c] sm:$0xf]  ;;  %v5052_v59 = vor.u32 %v7198_v52, %v5049_v53  ;;  %v4905_v0 = vld [vmem:[#allocation5 + $0x158] sm:$0xf0]  ;;  %v7369_v52 = vld [vmem:[#allocation5 + $0x2b4] sm:$0xf] }
  0x48   :  { %752 = vmatpush.bf16.msrb.mxu2 %v4888_v47  ;;  %766 = vmatpush.bf16.msrb.mxu3 %v5016_v51  ;;  %v5175_v47 = vld [vmem:[#allocation5 + $0x788] sm:$0xf]  ;;  %v4921_v51 = vld [vmem:[#allocation5 + $0x1b8] sm:$0xf0]  ;;  %v5180_v63 = vor.u32 %v7230_v54, %v5177_v55  ;;  %v7194_v1 = vld [vmem:[#allocation5 + $0x42c] sm:$0xf] }
  0x49   :  { %v5176_v56 = vor.u32 %v7232_v48, %v5175_v47  ;;  %v7226_v3 = vld [vmem:[#allocation5 + $0x72c] sm:$0xf]  ;;  %v5161_v4 = vld [vmem:[#allocation5 + $0x758] sm:$0xf0]  ;;  %v7403_v47 = vld [vmem:[#allocation5 + $0x5dc] sm:$0xf0] }
  0x4a   :  { %725 = vmatpush.bf16.msrb.mxu0 %v4996_v58  ;;  %v4924_v58 = vor.u32 %v7166_v49, %v4921_v51  ;;  %v7158_v11 = vld [vmem:[#allocation5 + $0xcc] sm:$0xf]  ;;  %v5164_v12 = vor.u32 %v7226_v3, %v5161_v4  ;;  %v4889_v13 = vld [vmem:[#allocation5 + $0xf8] sm:$0xf0]  ;;  %v5599_v48 = vld [vmem:[#allocation5 + $0x8b0] sm:$0xf] }
  0x4b   :  { %739 = vmatpush.bf16.msrb.mxu1 %v5124_v61  ;;  %v7228_v61 = vld [vmem:[#allocation5 + $0x754] sm:$0xf0]  ;;  %v7222_v16 = vld [vmem:[#allocation5 + $0x6cc] sm:$0xf]  ;;  %v5145_v17 = vld [vmem:[#allocation5 + $0x6f8] sm:$0xf0] }
  0x4c   :  { %753 = vmatpush.bf16.msrb.mxu2 %v4872_v62  ;;  %767 = vmatpush.bf16.msrb.mxu3 %v5000_v2  ;;  %v7162_v62 = vld [vmem:[#allocation5 + $0x12c] sm:$0xf]  ;;  %v5033_v2 = vld [vmem:[#allocation5 + $0x458] sm:$0xf0]  ;;  %v5160_v6 = vor.u32 %v7228_v61, %v5159_v60  ;;  %v5148_v25 = vor.u32 %v7222_v16, %v5145_v17  ;;  %v7435_v49 = vld [vmem:[#allocation5 + $0x8dc] sm:$0xf0] }
  0x4d   :  { %v4908_v7 = vor.u32 %v7162_v62, %v4905_v0  ;;  %v5036_v8 = vor.u32 %v7194_v1, %v5033_v2  ;;  %v7154_v24 = vld [vmem:[#allocation5 + $0x6c] sm:$0xf]  ;;  %v5001_v28 = vld [vmem:[#allocation5 + $0x398] sm:$0xf0]  ;;  %v5345_v53 = vld [vmem:[#allocation5 + $0x2e0] sm:$0xf0] }
  0x4e   :  { %726 = vmatpush.bf16.msrb.mxu0 %v4980_v10  ;;  %v7224_v10 = vld [vmem:[#allocation5 + $0x6f4] sm:$0xf0]  ;;  %v7186_v27 = vld [vmem:[#allocation5 + $0x36c] sm:$0xf]  ;;  %v5129_v30 = vld [vmem:[#allocation5 + $0x698] sm:$0xf0]  ;;  %v5348_v62 = vor.u32 %v7369_v52, %v5345_v53 }
  0x4f   :  { %740 = vmatpush.bf16.msrb.mxu1 %v5108_v14  ;;  %v7190_v14 = vld [vmem:[#allocation5 + $0x3cc] sm:$0xf]  ;;  %v5004_v35 = vor.u32 %v7186_v27, %v5001_v28  ;;  %v4857_v37 = vld [vmem:[#allocation5 + $0x38] sm:$0xf0]  ;;  %v7367_v60 = vld [vmem:[#allocation5 + $0x27c] sm:$0xf0] }
  0x50   :  { %754 = vmatpush.bf16.msrb.mxu2 %v4856_v15  ;;  %768 = vmatpush.bf16.msrb.mxu3 %v4984_v18  ;;  %v5017_v15 = vld [vmem:[#allocation5 + $0x3f8] sm:$0xf0]  ;;  %v5144_v18 = vor.u32 %v7224_v10, %v5143_v9  ;;  %v7218_v29 = vld [vmem:[#allocation5 + $0x66c] sm:$0xf]  ;;  %v5455_v61 = vld [vmem:[#allocation5 + $0x550] sm:$0xf] }
  0x51   :  { %727 = vmatmul.bf16.vlgmr.msrb.gmra.mxu0 %v7892_v5  ;;  %v7150_v36 = vld [vmem:[#allocation5 + $0xc] sm:$0xf]  ;;  %v5132_v39 = vor.u32 %v7218_v29, %v5129_v30  ;;  %v4985_v40 = vld [vmem:[#allocation5 + $0x338] sm:$0xf0]  ;;  %v5583_v0 = vld [vmem:[#allocation5 + $0x850] sm:$0xf] }
  0x52   :  { %775 = vmatpush.bf16.msra.mxu0 %v5224_v19  ;;  %741 = vmatmul.bf16.vlgmr.msrb.gmra.mxu1 %v7896_v20  ;;  %v4892_v19 = vor.u32 %v7158_v11, %v4889_v13  ;;  %v7214_v41 = vld [vmem:[#allocation5 + $0x60c] sm:$0xf]  ;;  %v5113_v42 = vld [vmem:[#allocation5 + $0x638] sm:$0xf0]  ;;  %v7431_v1 = vld [vmem:[#allocation5 + $0x87c] sm:$0xf0] }
  0x53   :  { %789 = vmatpush.bf16.msra.mxu1 %v4972_v21  ;;  %755 = vmatmul.bf16.vlgmr.msrb.gmra.mxu2 %v7889_v57  ;;  %v5020_v21 = vor.u32 %v7190_v14, %v5017_v15  ;;  %v5116_v54 = vor.u32 %v7214_v41, %v5113_v42  ;;  %v7365_v2 = vld [vmem:[#allocation5 + $0x254] sm:$0xf]  ;;  %v5329_v3 = vld [vmem:[#allocation5 + $0x280] sm:$0xf0]  ;;  %v7363_v9 = vld [vmem:[#allocation5 + $0x21c] sm:$0xf0] }
  0x54   :  { %803 = vmatpush.bf16.msra.mxu2 %v5100_v22  ;;  %817 = vmatpush.bf16.msra.mxu3 %v5228_v26  ;;  %v5127_v22 = vld [vmem:[#allocation5 + $0x668] sm:$0xf]  ;;  %v4873_v26 = vld [vmem:[#allocation5 + $0x98] sm:$0xf0]  ;;  %v5439_v10 = vld [vmem:[#allocation5 + $0x4f0] sm:$0xf]  ;;  %v5332_v11 = vor.u32 %v7365_v2, %v5329_v3 }
  0x55   :  { %769 = vmatmul.bf16.vlgmr.msrb.gmra.mxu3 %v7892_v5  ;;  %v5128_v31 = vor.u32 %v7220_v23, %v5127_v22  ;;  %v5567_v13 = vld [vmem:[#allocation5 + $0x7f0] sm:$0xf]  ;;  %v7427_v14 = vld [vmem:[#allocation5 + $0x81c] sm:$0xf0]  ;;  %v7361_v15 = vld [vmem:[#allocation5 + $0x1f4] sm:$0xf] }
  0x56   :  { %776 = vmatpush.bf16.msra.mxu0 %v5208_v32  ;;  %v5111_v32 = vld [vmem:[#allocation5 + $0x608] sm:$0xf]  ;;  %v5313_v16 = vld [vmem:[#allocation5 + $0x220] sm:$0xf0]  ;;  %v7359_v22 = vld [vmem:[#allocation5 + $0x1bc] sm:$0xf0] }
  0x57   :  { %790 = vmatpush.bf16.msra.mxu1 %v4956_v33  ;;  %v7216_v33 = vld [vmem:[#allocation5 + $0x634] sm:$0xf0]  ;;  %v5423_v23 = vld [vmem:[#allocation5 + $0x490] sm:$0xf]  ;;  %v7423_v27 = vld [vmem:[#allocation5 + $0x7bc] sm:$0xf0] }
  0x58   :  { %804 = vmatpush.bf16.msra.mxu2 %v5084_v34  ;;  %818 = vmatpush.bf16.msra.mxu3 %v5212_v38  ;;  %v4876_v34 = vor.u32 %v7154_v24, %v4873_v26  ;;  %v7182_v38 = vld [vmem:[#allocation5 + $0x30c] sm:$0xf]  ;;  %v5316_v24 = vor.u32 %v7361_v15, %v5313_v16  ;;  %v5551_v26 = vld [vmem:[#allocation5 + $0x790] sm:$0xf]  ;;  %v7357_v28 = vld [vmem:[#allocation5 + $0x194] sm:$0xf] }
  0x59   :  { %v4988_v51 = vor.u32 %v7182_v38, %v4985_v40  ;;  %v5297_v29 = vld [vmem:[#allocation5 + $0x1c0] sm:$0xf0]  ;;  %v5535_v38 = vld [vmem:[#allocation5 + $0x730] sm:$0xf]  ;;  %v7353_v40 = vld [vmem:[#allocation5 + $0x134] sm:$0xf] }
  0x5a   :  { %777 = vmatpush.bf16.msra.mxu0 %v5192_v44  ;;  %v7371_v44 = vld [vmem:[#allocation5 + $0x2dc] sm:$0xf0]  ;;  %v5281_v41 = vld [vmem:[#allocation5 + $0x160] sm:$0xf0]  ;;  %v7349_v52 = vld [vmem:[#allocation5 + $0xd4] sm:$0xf] }
  0x5b   :  { %791 = vmatpush.bf16.msra.mxu1 %v4940_v45  ;;  %v5471_v45 = vld [vmem:[#allocation5 + $0x5b0] sm:$0xf]  ;;  %v5344_v55 = vor.u32 %v7371_v44, %v5343_v43  ;;  %v5265_v53 = vld [vmem:[#allocation5 + $0x100] sm:$0xf0]  ;;  %v7401_v16 = vld [vmem:[#allocation5 + $0x5b4] sm:$0xf] }
  0x5c   :  { %805 = vmatpush.bf16.msra.mxu2 %v5068_v46  ;;  %819 = vmatpush.bf16.msra.mxu3 %v5196_v50  ;;  %v5112_v46 = vor.u32 %v7216_v33, %v5111_v32  ;;  %v4860_v50 = vor.u32 %v7150_v36, %v4857_v37  ;;  %v5552_v32 = vor.u32 %v7423_v27, %v5551_v26  ;;  %v5279_v33 = vld [vmem:[#allocation5 + $0x130] sm:$0xf]  ;;  %v7387_v37 = vld [vmem:[#allocation5 + $0x45c] sm:$0xf0]  ;;  %v5249_v2 = vld [vmem:[#allocation5 + $0xa0] sm:$0xf0] }
  0x5d   :  { %v5300_v36 = vor.u32 %v7357_v28, %v5297_v29  ;;  %v5233_v15 = vld [vmem:[#allocation5 + $0x40] sm:$0xf0]  ;;  %v5479_v26 = vld [vmem:[#allocation5 + $0x5b8] sm:$0xf]  ;;  %v7404_v27 = vld [vmem:[#allocation5 + $0x5e4] sm:$0xf0] }
  0x5e   :  { %778 = vmatpush.bf16.msra.mxu0 %v5176_v56  ;;  %v5472_v56 = vor.u32 %v7403_v47, %v5471_v45  ;;  %v5263_v45 = vld [vmem:[#allocation5 + $0xd0] sm:$0xf] }
  0x5f   :  { %792 = vmatpush.bf16.msra.mxu1 %v4924_v58  ;;  %v5600_v58 = vor.u32 %v7435_v49, %v5599_v48  ;;  %v5391_v47 = vld [vmem:[#allocation5 + $0x3d0] sm:$0xf]  ;;  %v5284_v48 = vor.u32 %v7353_v40, %v5281_v41  ;;  %v7383_v49 = vld [vmem:[#allocation5 + $0x3fc] sm:$0xf0]  ;;  %v7400_v40 = vld [vmem:[#allocation5 + $0x584] sm:$0xf0] }
  0x60   :  { %806 = vmatpush.bf16.msra.mxu2 %v5052_v59  ;;  %820 = vmatpush.bf16.msra.mxu3 %v5180_v63  ;;  %v5327_v59 = vld [vmem:[#allocation5 + $0x250] sm:$0xf]  ;;  %v7399_v63 = vld [vmem:[#allocation5 + $0x57c] sm:$0xf0] }
  0x61   :  { %v5328_v4 = vor.u32 %v7367_v60, %v5327_v59  ;;  %v7347_v59 = vld [vmem:[#allocation5 + $0x9c] sm:$0xf0]  ;;  %v5375_v60 = vld [vmem:[#allocation5 + $0x370] sm:$0xf] }
  0x62   :  { %779 = vmatpush.bf16.msra.mxu0 %v5160_v6  ;;  %v5456_v6 = vor.u32 %v7399_v63, %v5455_v61  ;;  %v5268_v61 = vor.u32 %v7349_v52, %v5265_v53  ;;  %v5503_v63 = vld [vmem:[#allocation5 + $0x670] sm:$0xf]  ;;  %v7396_v52 = vld [vmem:[#allocation5 + $0x524] sm:$0xf0] }
  0x63   :  { %793 = vmatpush.bf16.msra.mxu1 %v4908_v7  ;;  %v5584_v7 = vor.u32 %v7431_v1, %v5583_v0  ;;  %v7411_v0 = vld [vmem:[#allocation5 + $0x69c] sm:$0xf0]  ;;  %v7345_v1 = vld [vmem:[#allocation5 + $0x74] sm:$0xf] }
  0x64   :  { %807 = vmatpush.bf16.msra.mxu2 %v5036_v8  ;;  %821 = vmatpush.bf16.msra.mxu3 %v5164_v12  ;;  %v5311_v8 = vld [vmem:[#allocation5 + $0x1f0] sm:$0xf]  ;;  %v7395_v12 = vld [vmem:[#allocation5 + $0x51c] sm:$0xf0] }
  0x65   :  { %v5312_v17 = vor.u32 %v7363_v9, %v5311_v8  ;;  %v5504_v8 = vor.u32 %v7411_v0, %v5503_v63  ;;  %v5359_v9 = vld [vmem:[#allocation5 + $0x310] sm:$0xf]  ;;  %v7360_v63 = vld [vmem:[#allocation5 + $0x1c4] sm:$0xf0]  ;;  %v5431_v0 = vld [vmem:[#allocation5 + $0x498] sm:$0xf] }
  0x66   :  { %780 = vmatpush.bf16.msra.mxu0 %v5144_v18  ;;  %v5440_v18 = vor.u32 %v7395_v12, %v5439_v10  ;;  %v7375_v10 = vld [vmem:[#allocation5 + $0x33c] sm:$0xf0]  ;;  %v5252_v12 = vor.u32 %v7345_v1, %v5249_v2  ;;  %v7392_v1 = vld [vmem:[#allocation5 + $0x4c4] sm:$0xf0] }
  0x67   :  { %794 = vmatpush.bf16.msra.mxu1 %v4892_v19  ;;  %v5568_v19 = vor.u32 %v7427_v14, %v5567_v13  ;;  %v7407_v13 = vld [vmem:[#allocation5 + $0x63c] sm:$0xf0]  ;;  %v7341_v14 = vld [vmem:[#allocation5 + $0x14] sm:$0xf] }
  0x68   :  { %808 = vmatpush.bf16.msra.mxu2 %v5020_v21  ;;  %822 = vmatpush.bf16.msra.mxu3 %v5148_v25  ;;  %v5295_v21 = vld [vmem:[#allocation5 + $0x190] sm:$0xf]  ;;  %v7391_v25 = vld [vmem:[#allocation5 + $0x4bc] sm:$0xf0]  ;;  %v5236_v28 = vor.u32 %v7341_v14, %v5233_v15  ;;  %v7388_v14 = vld [vmem:[#allocation5 + $0x464] sm:$0xf0] }
  0x69   :  { %v5296_v30 = vor.u32 %v7359_v22, %v5295_v21  ;;  %v5601_v21 = vld [vmem:[#allocation5 + $0x8e0] sm:$0xf0]  ;;  %v5351_v22 = vld [vmem:[#allocation5 + $0x2b8] sm:$0xf] }
  0x6a   :  { %781 = vmatpush.bf16.msra.mxu0 %v5128_v31  ;;  %v5424_v31 = vor.u32 %v7391_v25, %v5423_v23  ;;  %v7372_v23 = vld [vmem:[#allocation5 + $0x2e4] sm:$0xf0] }
  0x6b   :  { %795 = vmatpush.bf16.msra.mxu1 %v4876_v34  ;;  %v7355_v34 = vld [vmem:[#allocation5 + $0x15c] sm:$0xf0] }
  0x6c   :  { %809 = vmatpush.bf16.msra.mxu2 %v5004_v35  ;;  %823 = vmatpush.bf16.msra.mxu3 %v5132_v39  ;;  %v5407_v35 = vld [vmem:[#allocation5 + $0x430] sm:$0xf]  ;;  %v7419_v39 = vld [vmem:[#allocation5 + $0x75c] sm:$0xf0]  ;;  %v5280_v42 = vor.u32 %v7355_v34, %v5279_v33  ;;  %v5457_v33 = vld [vmem:[#allocation5 + $0x580] sm:$0xf0] }
  0x6d   :  { %v5408_v43 = vor.u32 %v7387_v37, %v5407_v35  ;;  %v5536_v44 = vor.u32 %v7419_v39, %v5535_v38  ;;  %v7429_v34 = vld [vmem:[#allocation5 + $0x854] sm:$0xf]  ;;  %v5480_v35 = vor.u32 %v7404_v27, %v5479_v26  ;;  %v5335_v37 = vld [vmem:[#allocation5 + $0x258] sm:$0xf]  ;;  %v7368_v38 = vld [vmem:[#allocation5 + $0x284] sm:$0xf0] }
  0x6e   :  { %782 = vmatpush.bf16.msra.mxu0 %v5112_v46  ;;  %v7351_v46 = vld [vmem:[#allocation5 + $0xfc] sm:$0xf0]  ;;  %v5463_v39 = vld [vmem:[#allocation5 + $0x558] sm:$0xf]  ;;  %v7384_v27 = vld [vmem:[#allocation5 + $0x404] sm:$0xf0] }
  0x6f   :  { %796 = vmatpush.bf16.msra.mxu1 %v4860_v50  ;;  %v5519_v50 = vld [vmem:[#allocation5 + $0x6d0] sm:$0xf]  ;;  %v5399_v26 = vld [vmem:[#allocation5 + $0x3d8] sm:$0xf] }
  0x70   :  { %810 = vmatpush.bf16.msra.mxu2 %v4988_v51  ;;  %824 = vmatpush.bf16.msra.mxu3 %v5116_v54  ;;  %v7415_v51 = vld [vmem:[#allocation5 + $0x6fc] sm:$0xf0]  ;;  %v5264_v54 = vor.u32 %v7351_v46, %v5263_v45  ;;  %v5441_v45 = vld [vmem:[#allocation5 + $0x520] sm:$0xf0]  ;;  %v7425_v46 = vld [vmem:[#allocation5 + $0x7f4] sm:$0xf] }
  0x71   :  { %783 = vmatmul.bf16.vlgmr.msra.gmra.mxu0 %v7896_v20 }
  0x72   :  { %1557 = vmatpush.bf16.msrb.mxu0 %v5344_v55  ;;  %797 = vmatmul.bf16.vlgmr.msra.gmra.mxu1 %v7889_v57  ;;  %v5392_v55 = vor.u32 %v7383_v49, %v5391_v47  ;;  %v5464_v47 = vor.u32 %v7400_v40, %v5463_v39  ;;  %v5319_v49 = vld [vmem:[#allocation5 + $0x1f8] sm:$0xf]  ;;  %v7380_v39 = vld [vmem:[#allocation5 + $0x3a4] sm:$0xf0] }
  0x73   :  { %1571 = vmatpush.bf16.msrb.mxu1 %v5472_v56  ;;  %811 = vmatmul.bf16.vlgmr.msra.gmra.mxu2 %v7892_v5  ;;  %v5520_v56 = vor.u32 %v7415_v51, %v5519_v50  ;;  %v7364_v50 = vld [vmem:[#allocation5 + $0x224] sm:$0xf0]  ;;  %v5447_v51 = vld [vmem:[#allocation5 + $0x4f8] sm:$0xf] }
  0x74   :  { %1585 = vmatpush.bf16.msrb.mxu2 %v5600_v58  ;;  %1599 = vmatpush.bf16.msrb.mxu3 %v5348_v62  ;;  %v5247_v58 = vld [vmem:[#allocation5 + $0x70] sm:$0xf]  ;;  %v7379_v62 = vld [vmem:[#allocation5 + $0x39c] sm:$0xf0] }
  0x75   :  { %825 = vmatmul.bf16.vlgmr.msra.gmra.mxu3 %v7896_v20  ;;  %v5248_v3 = vor.u32 %v7347_v59, %v5247_v58  ;;  %v5425_v58 = vld [vmem:[#allocation5 + $0x4c0] sm:$0xf0]  ;;  %v7421_v59 = vld [vmem:[#allocation5 + $0x794] sm:$0xf] }
  0x76   :  { %1558 = vmatpush.bf16.msrb.mxu0 %v5328_v4  ;;  %v5231_v4 = vld [vmem:[#allocation5 + $0x10] sm:$0xf] }
  0x77   :  { %1572 = vmatpush.bf16.msrb.mxu1 %v5456_v6  ;;  %v7343_v6 = vld [vmem:[#allocation5 + $0x3c] sm:$0xf0] }
  0x78   :  { %1586 = vmatpush.bf16.msrb.mxu2 %v5584_v7  ;;  %1600 = vmatpush.bf16.msrb.mxu3 %v5332_v11  ;;  %v5376_v7 = vor.u32 %v7379_v62, %v5375_v60  ;;  %v5487_v11 = vld [vmem:[#allocation5 + $0x610] sm:$0xf]  ;;  %v5448_v60 = vor.u32 %v7396_v52, %v5447_v51  ;;  %v5303_v62 = vld [vmem:[#allocation5 + $0x198] sm:$0xf]  ;;  %v7376_v51 = vld [vmem:[#allocation5 + $0x344] sm:$0xf0] }
  0x79   :  { %v5488_v25 = vor.u32 %v7407_v13, %v5487_v11  ;;  %v5287_v11 = vld [vmem:[#allocation5 + $0x138] sm:$0xf] }
  0x7a   :  { %1559 = vmatpush.bf16.msrb.mxu0 %v5312_v17  ;;  %v5473_v17 = vld [vmem:[#allocation5 + $0x5e0] sm:$0xf0]  ;;  %v5415_v13 = vld [vmem:[#allocation5 + $0x438] sm:$0xf] }
  0x7b   :  { %1573 = vmatpush.bf16.msrb.mxu1 %v5440_v18  ;;  %v7433_v18 = vld [vmem:[#allocation5 + $0x8b4] sm:$0xf]  ;;  %v5476_v29 = vor.u32 %v7401_v16, %v5473_v17  ;;  %v5607_v52 = vld [vmem:[#allocation5 + $0x8b8] sm:$0xf] }
  0x7c   :  { %1587 = vmatpush.bf16.msrb.mxu2 %v5568_v19  ;;  %1601 = vmatpush.bf16.msrb.mxu3 %v5316_v24  ;;  %v5232_v19 = vor.u32 %v7343_v6, %v5231_v4  ;;  %v5360_v24 = vor.u32 %v7375_v10, %v5359_v9  ;;  %v5304_v4 = vor.u32 %v7360_v63, %v5303_v62  ;;  %v7385_v6 = vld [vmem:[#allocation5 + $0x434] sm:$0xf]  ;;  %v5537_v10 = vld [vmem:[#allocation5 + $0x760] sm:$0xf0]  ;;  %v7434_v62 = vld [vmem:[#allocation5 + $0x8bc] sm:$0xf] }
  0x7d   :  { %v5432_v9 = vor.u32 %v7392_v1, %v5431_v0  ;;  %v5609_v63 = vld [vmem:[#allocation5 + $0x8e8] sm:$0xf0] }
  0x7e   :  { %1560 = vmatpush.bf16.msrb.mxu0 %v5296_v30  ;;  %v5604_v30 = vor.u32 %v7433_v18, %v5601_v21  ;;  %v7381_v18 = vld [vmem:[#allocation5 + $0x3d4] sm:$0xf] }
  0x7f   :  { %1574 = vmatpush.bf16.msrb.mxu1 %v5424_v31  ;;  %v5352_v31 = vor.u32 %v7372_v23, %v5351_v22  ;;  %v7413_v21 = vld [vmem:[#allocation5 + $0x6d4] sm:$0xf]  ;;  %v5416_v22 = vor.u32 %v7388_v14, %v5415_v13  ;;  %v5521_v23 = vld [vmem:[#allocation5 + $0x700] sm:$0xf0]  ;;  %v5593_v13 = vld [vmem:[#allocation5 + $0x888] sm:$0xf0] }
  0x80   :  { %1588 = vmatpush.bf16.msrb.mxu2 %v5552_v32  ;;  %1602 = vmatpush.bf16.msrb.mxu3 %v5300_v36  ;;  %v7397_v32 = vld [vmem:[#allocation5 + $0x554] sm:$0xf]  ;;  %v5585_v36 = vld [vmem:[#allocation5 + $0x880] sm:$0xf0] }
  0x81   :  { %v5460_v41 = vor.u32 %v7397_v32, %v5457_v33  ;;  %v5377_v32 = vld [vmem:[#allocation5 + $0x3a0] sm:$0xf0]  ;;  %v7409_v33 = vld [vmem:[#allocation5 + $0x674] sm:$0xf] }
  0x82   :  { %1561 = vmatpush.bf16.msrb.mxu0 %v5280_v42  ;;  %v5588_v42 = vor.u32 %v7429_v34, %v5585_v36  ;;  %v5400_v34 = vor.u32 %v7384_v27, %v5399_v26  ;;  %v5255_v36 = vld [vmem:[#allocation5 + $0x78] sm:$0xf]  ;;  %v7426_v26 = vld [vmem:[#allocation5 + $0x7fc] sm:$0xf]  ;;  %v5577_v27 = vld [vmem:[#allocation5 + $0x828] sm:$0xf0] }
  0x83   :  { %1575 = vmatpush.bf16.msrb.mxu1 %v5408_v43  ;;  %v5336_v43 = vor.u32 %v7368_v38, %v5335_v37  ;;  %v7348_v37 = vld [vmem:[#allocation5 + $0xa4] sm:$0xf0]  ;;  %v5383_v38 = vld [vmem:[#allocation5 + $0x378] sm:$0xf] }
  0x84   :  { %1589 = vmatpush.bf16.msrb.mxu2 %v5536_v44  ;;  %1603 = vmatpush.bf16.msrb.mxu3 %v5284_v48  ;;  %v7393_v44 = vld [vmem:[#allocation5 + $0x4f4] sm:$0xf]  ;;  %v5569_v48 = vld [vmem:[#allocation5 + $0x820] sm:$0xf0] }
  0x85   :  { %v5444_v53 = vor.u32 %v7393_v44, %v5441_v45  ;;  %v5256_v44 = vor.u32 %v7348_v37, %v5255_v36  ;;  %v7405_v45 = vld [vmem:[#allocation5 + $0x614] sm:$0xf]  ;;  %v5305_v36 = vld [vmem:[#allocation5 + $0x1c8] sm:$0xf0]  ;;  %v7390_v37 = vld [vmem:[#allocation5 + $0x49c] sm:$0xf] }
  0x86   :  { %1562 = vmatpush.bf16.msrb.mxu0 %v5264_v54  ;;  %v5572_v54 = vor.u32 %v7425_v46, %v5569_v48  ;;  %v5489_v46 = vld [vmem:[#allocation5 + $0x640] sm:$0xf0]  ;;  %v5384_v48 = vor.u32 %v7380_v39, %v5383_v38  ;;  %v5433_v38 = vld [vmem:[#allocation5 + $0x4c8] sm:$0xf0]  ;;  %v7422_v39 = vld [vmem:[#allocation5 + $0x79c] sm:$0xf] }
  0x87   :  { %1576 = vmatpush.bf16.msrb.mxu1 %v5392_v55  ;;  %v5320_v55 = vor.u32 %v7364_v50, %v5319_v49  ;;  %v7344_v49 = vld [vmem:[#allocation5 + $0x44] sm:$0xf0]  ;;  %v5367_v50 = vld [vmem:[#allocation5 + $0x318] sm:$0xf] }
  0x88   :  { %1590 = vmatpush.bf16.msrb.mxu2 %v5520_v56  ;;  %1604 = vmatpush.bf16.msrb.mxu3 %v5268_v61  ;;  %v7389_v56 = vld [vmem:[#allocation5 + $0x494] sm:$0xf]  ;;  %v5553_v61 = vld [vmem:[#allocation5 + $0x7c0] sm:$0xf0]  ;;  %v5368_v0 = vor.u32 %v7376_v51, %v5367_v50  ;;  %v5289_v50 = vld [vmem:[#allocation5 + $0x168] sm:$0xf0] }
  0x89   :  { %v5428_v2 = vor.u32 %v7389_v56, %v5425_v58  ;;  %v5353_v56 = vld [vmem:[#allocation5 + $0x2e8] sm:$0xf0]  ;;  %v7402_v58 = vld [vmem:[#allocation5 + $0x5bc] sm:$0xf] }
  0x8a   :  { %1563 = vmatpush.bf16.msrb.mxu0 %v5248_v3  ;;  %v5556_v3 = vor.u32 %v7421_v59, %v5553_v61  ;;  %v5481_v59 = vld [vmem:[#allocation5 + $0x5e8] sm:$0xf0]  ;;  %v7386_v51 = vld [vmem:[#allocation5 + $0x43c] sm:$0xf] }
  0x8b   :  { %1577 = vmatpush.bf16.msrb.mxu1 %v5376_v7  ;;  %v5409_v7 = vld [vmem:[#allocation5 + $0x460] sm:$0xf0] }
  0x8c   :  { %1591 = vmatpush.bf16.msrb.mxu2 %v5504_v8  ;;  %1605 = vmatpush.bf16.msrb.mxu3 %v5252_v12  ;;  %v7417_v8 = vld [vmem:[#allocation5 + $0x734] sm:$0xf]  ;;  %v7356_v12 = vld [vmem:[#allocation5 + $0x164] sm:$0xf0]  ;;  %v5412_v15 = vor.u32 %v7385_v6, %v5409_v7  ;;  %v7366_v7 = vld [vmem:[#allocation5 + $0x25c] sm:$0xf] }
  0x8d   :  { %v5540_v16 = vor.u32 %v7417_v8, %v5537_v10  ;;  %v5288_v17 = vor.u32 %v7356_v12, %v5287_v11  ;;  %v7432_v6 = vld [vmem:[#allocation5 + $0x884] sm:$0xf0]  ;;  %v5612_v8 = vor.u32 %v7434_v62, %v5609_v63  ;;  %v7398_v10 = vld [vmem:[#allocation5 + $0x55c] sm:$0xf]  ;;  %v5465_v11 = vld [vmem:[#allocation5 + $0x588] sm:$0xf0] }
  0x8e   :  { %1564 = vmatpush.bf16.msrb.mxu0 %v5232_v19  ;;  %v5393_v19 = vld [vmem:[#allocation5 + $0x400] sm:$0xf0]  ;;  %v7430_v12 = vld [vmem:[#allocation5 + $0x85c] sm:$0xf]  ;;  %v7416_v62 = vld [vmem:[#allocation5 + $0x704] sm:$0xf0] }
  0x8f   :  { %1578 = vmatpush.bf16.msrb.mxu1 %v5360_v24  ;;  %v5271_v24 = vld [vmem:[#allocation5 + $0xd8] sm:$0xf]  ;;  %v7350_v63 = vld [vmem:[#allocation5 + $0xdc] sm:$0xf] }
  0x90   :  { %1592 = vmatpush.bf16.msrb.mxu2 %v5488_v25  ;;  %1606 = vmatpush.bf16.msrb.mxu3 %v5236_v28  ;;  %v7352_v25 = vld [vmem:[#allocation5 + $0x104] sm:$0xf0]  ;;  %v5396_v28 = vor.u32 %v7381_v18, %v5393_v19  ;;  %v7362_v19 = vld [vmem:[#allocation5 + $0x1fc] sm:$0xf] }
  0x91   :  { %1565 = vmatmul.bf16.vlgmr.msrb.gmra.mxu0 %v7889_v57  ;;  %v7428_v18 = vld [vmem:[#allocation5 + $0x824] sm:$0xf0] }
  0x92   :  { %1613 = vmatpush.bf16.msra.mxu0 %v5476_v29  ;;  %1579 = vmatmul.bf16.vlgmr.msrb.gmra.mxu1 %v7892_v5  ;;  %v5524_v29 = vor.u32 %v7413_v21, %v5521_v23  ;;  %v7914_v21 = vld [vmem:[%s8158_s2] sm:$0xf]  ;;  %v5321_v23 = vld [vmem:[#allocation5 + $0x228] sm:$0xf0] }
  0x93   :  { %1627 = vmatpush.bf16.msra.mxu1 %v5604_v30  ;;  %1593 = vmatmul.bf16.vlgmr.msrb.gmra.mxu2 %v7896_v20  ;;  %v5272_v30 = vor.u32 %v7352_v25, %v5271_v24  ;;  %v7394_v24 = vld [vmem:[#allocation5 + $0x4fc] sm:$0xf]  ;;  %v5449_v25 = vld [vmem:[#allocation5 + $0x528] sm:$0xf0] }
  0x94   :  { %1641 = vmatpush.bf16.msra.mxu2 %v5352_v31  ;;  %1655 = vmatpush.bf16.msra.mxu3 %v5480_v35  ;;  %v7377_v31 = vld [vmem:[#allocation5 + $0x374] sm:$0xf]  ;;  %v5505_v35 = vld [vmem:[#allocation5 + $0x6a0] sm:$0xf0] }
  0x95   :  { %1607 = vmatmul.bf16.vlgmr.msrb.gmra.mxu3 %v7889_v57  ;;  %v5380_v40 = vor.u32 %v7377_v31, %v5377_v32  ;;  %v5452_v31 = vor.u32 %v7394_v24, %v5449_v25  ;;  %v5559_v32 = vld [vmem:[#allocation5 + $0x798] sm:$0xf]  ;;  %v7408_v25 = vld [vmem:[#allocation5 + $0x644] sm:$0xf0] }
  0x96   :  { %1614 = vmatpush.bf16.msra.mxu0 %v5460_v41  ;;  %v7373_v41 = vld [vmem:[#allocation5 + $0x314] sm:$0xf] }
  0x97   :  { %1628 = vmatpush.bf16.msra.mxu1 %v5588_v42  ;;  %v5361_v42 = vld [vmem:[#allocation5 + $0x340] sm:$0xf0] }
  0x98   :  { %1642 = vmatpush.bf16.msra.mxu2 %v5336_v43  ;;  %1656 = vmatpush.bf16.msra.mxu3 %v5464_v47  ;;  %v5508_v43 = vor.u32 %v7409_v33, %v5505_v35  ;;  %v5239_v47 = vld [vmem:[#allocation5 + $0x18] sm:$0xf]  ;;  %v7424_v33 = vld [vmem:[#allocation5 + $0x7c4] sm:$0xf0]  ;;  %v5580_v35 = vor.u32 %v7426_v26, %v5577_v27  ;;  %v7342_v26 = vld [vmem:[#allocation5 + $0x1c] sm:$0xf] }
  0x99   :  { %v5240_v61 = vor.u32 %v7344_v49, %v5239_v47  ;;  %v7420_v47 = vld [vmem:[#allocation5 + $0x764] sm:$0xf0]  ;;  %v5241_v27 = vld [vmem:[#allocation5 + $0x48] sm:$0xf0] }
  0x9a   :  { %1615 = vmatpush.bf16.msra.mxu0 %v5444_v53  ;;  %v7436_v53 = vld [vmem:[#allocation5 + $0x8e4] sm:$0xf0] }
  0x9b   :  { %1629 = vmatpush.bf16.msra.mxu1 %v5572_v54  ;;  %v7370_v54 = vld [vmem:[#allocation5 + $0x2bc] sm:$0xf]  ;;  %v5608_v1 = vor.u32 %v7436_v53, %v5607_v52  ;;  %v5417_v52 = vld [vmem:[#allocation5 + $0x468] sm:$0xf0] }
  0x9c   :  { %1643 = vmatpush.bf16.msra.mxu2 %v5320_v55  ;;  %1657 = vmatpush.bf16.msra.mxu3 %v5448_v60  ;;  %v5364_v55 = vor.u32 %v7373_v41, %v5361_v42  ;;  %v5492_v60 = vor.u32 %v7405_v45, %v5489_v46  ;;  %v5560_v42 = vor.u32 %v7424_v33, %v5559_v32  ;;  %v5543_v46 = vld [vmem:[#allocation5 + $0x738] sm:$0xf]  ;;  %v7418_v53 = vld [vmem:[#allocation5 + $0x73c] sm:$0xf]  ;;  %v5369_v32 = vld [vmem:[#allocation5 + $0x348] sm:$0xf0] }
  0x9d   :  { %v5436_v45 = vor.u32 %v7390_v37, %v5433_v38  ;;  %v7406_v33 = vld [vmem:[#allocation5 + $0x61c] sm:$0xf]  ;;  %v7459_v37 = vld [vmem:[#allocation7 + $0x3b0] sm:$0xf0] }
  0x9e   :  { %1616 = vmatpush.bf16.msra.mxu0 %v5428_v2  ;;  %v5356_v2 = vor.u32 %v7370_v54, %v5353_v56  ;;  %v5545_v54 = vld [vmem:[#allocation5 + $0x768] sm:$0xf0]  ;;  %v5544_v56 = vor.u32 %v7420_v47, %v5543_v46 }
  0x9f   :  { %1630 = vmatpush.bf16.msra.mxu1 %v5556_v3  ;;  %v5484_v3 = vor.u32 %v7402_v58, %v5481_v59 }
  0xa0   :  { %1644 = vmatpush.bf16.msra.mxu2 %v5304_v4  ;;  %1658 = vmatpush.bf16.msra.mxu3 %v5432_v9  ;;  %v5591_v4 = vld [vmem:[#allocation5 + $0x858] sm:$0xf]  ;;  %v5337_v9 = vld [vmem:[#allocation5 + $0x288] sm:$0xf0] }
  0xa1   :  { %v5592_v14 = vor.u32 %v7432_v6, %v5591_v4  ;;  %v7414_v4 = vld [vmem:[#allocation5 + $0x6dc] sm:$0xf]  ;;  %v5529_v6 = vld [vmem:[#allocation5 + $0x708] sm:$0xf0] }
  0xa2   :  { %1617 = vmatpush.bf16.msra.mxu0 %v5412_v15  ;;  %v5575_v15 = vld [vmem:[#allocation5 + $0x7f8] sm:$0xf] }
  0xa3   :  { %1631 = vmatpush.bf16.msra.mxu1 %v5540_v16  ;;  %v5340_v16 = vor.u32 %v7366_v7, %v5337_v9 }
  0xa4   :  { %1645 = vmatpush.bf16.msra.mxu2 %v5288_v17  ;;  %1659 = vmatpush.bf16.msra.mxu3 %v5416_v22  ;;  %v5468_v17 = vor.u32 %v7398_v10, %v5465_v11  ;;  %v5596_v22 = vor.u32 %v7430_v12, %v5593_v13  ;;  %v5511_v10 = vld [vmem:[#allocation5 + $0x678] sm:$0xf]  ;;  %v7412_v11 = vld [vmem:[#allocation5 + $0x6a4] sm:$0xf0]  ;;  %v7346_v12 = vld [vmem:[#allocation5 + $0x7c] sm:$0xf]  ;;  %v5532_v13 = vor.u32 %v7414_v4, %v5529_v6 }
  0xa6   :  { %1618 = vmatpush.bf16.msra.mxu0 %v5396_v28  ;;  %v5576_v28 = vor.u32 %v7428_v18, %v5575_v15  ;;  %v7378_v15 = vld [vmem:[#allocation5 + $0x37c] sm:$0xf]  ;;  %v5513_v18 = vld [vmem:[#allocation5 + $0x6a8] sm:$0xf0] }
  0xa7   :  { %1632 = vmatpush.bf16.msra.mxu1 %v5524_v29  ;;  %v175_v29 = vperm.slane %v7914_v21, 0 }
  0xa8   :  { %1646 = vmatpush.bf16.msra.mxu2 %v5272_v30  ;;  %1660 = vmatpush.bf16.msra.mxu3 %v5400_v34  ;;  %v5324_v30 = vor.u32 %v7362_v19, %v5321_v23  ;;  %v7358_v34 = vld [vmem:[#allocation5 + $0x19c] sm:$0xf]  ;;  %v5512_v19 = vor.u32 %v7412_v11, %v5511_v10  ;;  %v5627_v11 = vld [vmem:[#allocation7 + $0x318] sm:$0xf] }
  0xa9   :  { %v7444_v10 = vld [vmem:[#allocation7 + $0x338] sm:$0xf0] }
  0xaa   :  { %1619 = vmatpush.bf16.msra.mxu0 %v5380_v40  ;;  %v5561_v40 = vld [vmem:[#allocation5 + $0x7c8] sm:$0xf0] }
  0xab   :  { %1633 = vmatpush.bf16.msra.mxu1 %v5508_v43  ;;  %v5564_v49 = vor.u32 %v7422_v39, %v5561_v40  ;;  %v5244_v39 = vor.u32 %v7342_v26, %v5241_v27  ;;  %v5701_v26 = vld [vmem:[#allocation7 + $0x3b4] sm:$0xf0] }
  0xac   :  { %1647 = vmatpush.bf16.msra.mxu2 %v5256_v44  ;;  %1661 = vmatpush.bf16.msra.mxu3 %v5384_v48  ;;  %v5308_v44 = vor.u32 %v7358_v34, %v5305_v36  ;;  %v7354_v48 = vld [vmem:[#allocation5 + $0x13c] sm:$0xf]  ;;  %v5699_v36 = vld [vmem:[#allocation7 + $0x3a8] sm:$0xf]  ;;  %v5771_v27 = vld [vmem:[#allocation7 + $0x438] sm:$0xf] }
  0xad   :  { %v5292_v59 = vor.u32 %v7354_v48, %v5289_v50  ;;  %v176_v48 = vperm.slane %v7914_v21, 1 }
  0xae   :  { %1620 = vmatpush.bf16.msra.mxu0 %v5364_v55  ;;  %v672_v41 = vpop.f32.mrf.mxu0 }
  0xaf   :  { %1634 = vmatpush.bf16.msra.mxu1 %v5492_v60  ;;  %v673_v43 = vadd.f32 %v672_v41, %v175_v29  ;;  %v686_v55 = vpop.f32.mrf.mxu1  ;;  %v5420_v60 = vor.u32 %v7386_v51, %v5417_v52  ;;  %v5675_v52 = vld [vmem:[#allocation7 + $0x378] sm:$0xf] }
  0xb0   :  { %1648 = vmatpush.bf16.msra.mxu2 %v5240_v61  ;;  %1662 = vmatpush.bf16.msra.mxu3 %v5368_v0  ;;  %v5527_v61 = vld [vmem:[#allocation5 + $0x6d8] sm:$0xf]  ;;  %v5548_v0 = vor.u32 %v7418_v53, %v5545_v54  ;;  %v7453_v53 = vld [vmem:[#allocation7 + $0x380] sm:$0xf0] }
  0xb1   :  { %1621 = vmatmul.bf16.vlgmr.msra.gmra.mxu0 %v7892_v5  ;;  %v687_v58 = vadd.f32 %v686_v55, %v673_v43  ;;  %v5528_v7 = vor.u32 %v7416_v62, %v5527_v61  ;;  %v5676_v55 = vor.u32 %v7453_v53, %v5675_v52 }
  0xb2   :  { %1669 = vmatpush.bf16.msrb.mxu0 %v5608_v1  ;;  %1635 = vmatmul.bf16.vlgmr.msra.gmra.mxu1 %v7896_v20  ;;  %v5273_v1 = vld [vmem:[#allocation5 + $0x108] sm:$0xf0] }
  0xb3   :  { %1683 = vmatpush.bf16.msrb.mxu1 %v5356_v2  ;;  %1649 = vmatmul.bf16.vlgmr.msra.gmra.mxu2 %v7889_v57  ;;  %v7382_v2 = vld [vmem:[#allocation5 + $0x3dc] sm:$0xf] }
  0xb4   :  { %1697 = vmatpush.bf16.msrb.mxu2 %v5484_v3  ;;  %1711 = vmatpush.bf16.msrb.mxu3 %v5612_v8  ;;  %v5401_v3 = vld [vmem:[#allocation5 + $0x408] sm:$0xf0]  ;;  %v5276_v8 = vor.u32 %v7350_v63, %v5273_v1 }
  0xb5   :  { %1663 = vmatmul.bf16.vlgmr.msra.gmra.mxu3 %v7892_v5  ;;  %v5404_v9 = vor.u32 %v7382_v2, %v5401_v3  ;;  %v5651_v2 = vld [vmem:[#allocation7 + $0x348] sm:$0xf]  ;;  %v7447_v3 = vld [vmem:[#allocation7 + $0x350] sm:$0xf0] }
  0xb6   :  { %1670 = vmatpush.bf16.msrb.mxu0 %v5592_v14  ;;  %v5257_v14 = vld [vmem:[#allocation5 + $0xa8] sm:$0xf0]  ;;  %v7925_v43 = vpop.f32.mrf.mxu0  ;;  %v714_v46 = vpop.f32.mrf.mxu3  ;;  %v5652_v6 = vor.u32 %v7447_v3, %v5651_v2  ;;  %v5735_v2 = vld [vmem:[#allocation7 + $0x3f0] sm:$0xf]  ;;  %v7468_v3 = vld [vmem:[#allocation7 + $0x3f8] sm:$0xf0] }
  0xb7   :  { %1684 = vmatpush.bf16.msrb.mxu1 %v5340_v16  ;;  %v5385_v16 = vld [vmem:[#allocation5 + $0x3a8] sm:$0xf0]  ;;  %v5260_v23 = vor.u32 %v7346_v12, %v5257_v14  ;;  %v7927_v47 = vpop.f32.mrf.mxu1  ;;  %v715_v50 = vadd.f32 %v714_v46, %v176_v48  ;;  %v5795_v14 = vld [vmem:[#allocation7 + $0x468] sm:$0xf] }
  0xb8   :  { %1698 = vmatpush.bf16.msrb.mxu2 %v5468_v17  ;;  %1712 = vmatpush.bf16.msrb.mxu3 %v5596_v22  ;;  %v7410_v17 = vld [vmem:[#allocation5 + $0x67c] sm:$0xf]  ;;  %v5495_v22 = vld [vmem:[#allocation5 + $0x618] sm:$0xf]  ;;  %v5388_v24 = vor.u32 %v7378_v15, %v5385_v16  ;;  %v7483_v15 = vld [vmem:[#allocation7 + $0x470] sm:$0xf0] }
  0xb9   :  { %v5496_v38 = vor.u32 %v7408_v25, %v5495_v22  ;;  %v5615_v22 = vld [vmem:[#allocation7 + $0x300] sm:$0xf]  ;;  %v7458_v25 = vld [vmem:[#allocation7 + $0x3ac] sm:$0xf] }
  0xba   :  { %1671 = vmatpush.bf16.msrb.mxu0 %v5576_v28  ;;  %v700_v28 = vpop.f32.mrf.mxu2 }
  0xbb   :  { %1685 = vmatpush.bf16.msrb.mxu1 %v5324_v30  ;;  %v5516_v30 = vor.u32 %v7410_v17, %v5513_v18  ;;  %v7923_v34 = vadd.f32 %v700_v28, %v687_v58  ;;  %v5796_v17 = vor.u32 %v7483_v15, %v5795_v14  ;;  %v5783_v18 = vld [vmem:[#allocation7 + $0x450] sm:$0xf]  ;;  %v7477_v28 = vld [vmem:[#allocation7 + $0x440] sm:$0xf0]  ;;  %v7443_v15 = vld [vmem:[#allocation7 + $0x334] sm:$0xf] }
  0xbc   :  { %1699 = vmatpush.bf16.msrb.mxu2 %v5452_v31  ;;  %1713 = vmatpush.bf16.msrb.mxu3 %v5580_v35  ;;  %v7374_v31 = vld [vmem:[#allocation5 + $0x31c] sm:$0xf]  ;;  %v5497_v35 = vld [vmem:[#allocation5 + $0x648] sm:$0xf0]  ;;  %v7465_v14 = vld [vmem:[#allocation7 + $0x3e0] sm:$0xf0] }
  0xbd   :  { %v5372_v40 = vor.u32 %v7374_v31, %v5369_v32  ;;  %v5500_v41 = vor.u32 %v7406_v33, %v5497_v35  ;;  %v5704_v31 = vor.u32 %v7458_v25, %v5701_v26  ;;  %v5772_v32 = vor.u32 %v7477_v28, %v5771_v27  ;;  %v7455_v33 = vld [vmem:[#allocation7 + $0x394] sm:$0xf]  ;;  %v5689_v35 = vld [vmem:[#allocation7 + $0x39c] sm:$0xf0]  ;;  %v7462_v25 = vld [vmem:[#allocation7 + $0x3c8] sm:$0xf0] }
  0xbe   :  { %1672 = vmatpush.bf16.msrb.mxu0 %v5560_v42  ;;  %v5700_v42 = vor.u32 %v7459_v37, %v5699_v36  ;;  %v7938_v58 = vpop.f32.mrf.mxu3  ;;  %v5759_v36 = vld [vmem:[#allocation7 + $0x420] sm:$0xf]  ;;  %v7474_v37 = vld [vmem:[#allocation7 + $0x428] sm:$0xf0]  ;;  %v7440_v26 = vld [vmem:[#allocation7 + $0x31c] sm:$0xf] }
  0xbf   :  { %1686 = vmatpush.bf16.msrb.mxu1 %v5308_v44  ;;  %v5687_v44 = vld [vmem:[#allocation7 + $0x390] sm:$0xf]  ;;  %v5629_v28 = vld [vmem:[#allocation7 + $0x324] sm:$0xf0] }
  0xc0   :  { %1700 = vmatpush.bf16.msrb.mxu2 %v5436_v45  ;;  %1714 = vmatpush.bf16.msrb.mxu3 %v5564_v49  ;;  %v7456_v45 = vld [vmem:[#allocation7 + $0x398] sm:$0xf0] }
  0xc1   :  { %v5688_v49 = vor.u32 %v7456_v45, %v5687_v44 }
  0xc2   :  { %1673 = vmatpush.bf16.msrb.mxu0 %v5544_v56  ;;  %v7936_v51 = vpop.f32.mrf.mxu2 }
  0xc3   :  { %1687 = vmatpush.bf16.msrb.mxu1 %v5292_v59  ;;  %v5663_v59 = vld [vmem:[#allocation7 + $0x360] sm:$0xf] }
  0xc4   :  { %1701 = vmatpush.bf16.msrb.mxu2 %v5420_v60  ;;  %1715 = vmatpush.bf16.msrb.mxu3 %v5548_v0  ;;  %v7450_v60 = vld [vmem:[#allocation7 + $0x368] sm:$0xf0]  ;;  %v177_v0 = vperm.slane %v7914_v21, 2 }
  0xc5   :  { %v5664_v62 = vor.u32 %v7450_v60, %v5663_v59 }
  0xc6   :  { %1674 = vmatpush.bf16.msrb.mxu0 %v5528_v7 }
  0xc7   :  { %1688 = vmatpush.bf16.msrb.mxu1 %v5276_v8 }
  0xc8   :  { %1702 = vmatpush.bf16.msrb.mxu2 %v5404_v9  ;;  %1716 = vmatpush.bf16.msrb.mxu3 %v5532_v13  ;;  %v5639_v9 = vld [vmem:[#allocation7 + $0x330] sm:$0xf]  ;;  %v7441_v13 = vld [vmem:[#allocation7 + $0x320] sm:$0xf0] }
  0xc9   :  { %v5640_v12 = vor.u32 %v7444_v10, %v5639_v9  ;;  %v5628_v16 = vor.u32 %v7441_v13, %v5627_v11  ;;  %v5723_v13 = vld [vmem:[#allocation7 + $0x3d8] sm:$0xf] }
  0xca   :  { %1675 = vmatpush.bf16.msrb.mxu0 %v5512_v19  ;;  %v7480_v19 = vld [vmem:[#allocation7 + $0x458] sm:$0xf0] }
  0xcb   :  { %1689 = vmatpush.bf16.msrb.mxu1 %v5260_v23  ;;  %v7438_v23 = vld [vmem:[#allocation7 + $0x308] sm:$0xf0] }
  0xcc   :  { %1703 = vmatpush.bf16.msrb.mxu2 %v5388_v24  ;;  %1717 = vmatpush.bf16.msrb.mxu3 %v5516_v30  ;;  %v5784_v24 = vor.u32 %v7480_v19, %v5783_v18  ;;  %v5616_v30 = vor.u32 %v7438_v23, %v5615_v22  ;;  %v5891_v19 = vld [vmem:[#allocation7 + $0x528] sm:$0xf]  ;;  %v7507_v22 = vld [vmem:[#allocation7 + $0x530] sm:$0xf0] }
  0xcd   :  { %v5892_v23 = vor.u32 %v7507_v22, %v5891_v19  ;;  %v5843_v19 = vld [vmem:[#allocation7 + $0x4c8] sm:$0xf]  ;;  %v7495_v22 = vld [vmem:[#allocation7 + $0x4d0] sm:$0xf0] }
  0xce   :  { %1676 = vmatpush.bf16.msrb.mxu0 %v5496_v38  ;;  %v728_v54 = vpop.f32.mrf.mxu0 }
  0xcf   :  { %1690 = vmatpush.bf16.msrb.mxu1 %v5244_v39  ;;  %v729_v56 = vadd.f32 %v728_v54, %v715_v50  ;;  %v742_v61 = vpop.f32.mrf.mxu1  ;;  %v5692_v39 = vor.u32 %v7455_v33, %v5689_v35  ;;  %v178_v50 = vperm.slane %v7914_v21, 3  ;;  %v5747_v54 = vld [vmem:[#allocation7 + $0x408] sm:$0xf]  ;;  %v5879_v35 = vld [vmem:[#allocation7 + $0x510] sm:$0xf] }
  0xd0   :  { %1704 = vmatpush.bf16.msrb.mxu2 %v5372_v40  ;;  %1718 = vmatpush.bf16.msrb.mxu3 %v5500_v41  ;;  %v5760_v40 = vor.u32 %v7474_v37, %v5759_v36  ;;  %v7452_v41 = vld [vmem:[#allocation7 + $0x37c] sm:$0xf]  ;;  %v7437_v37 = vld [vmem:[#allocation7 + $0x304] sm:$0xf] }
  0xd1   :  { %1677 = vmatmul.bf16.vlgmr.msrb.gmra.mxu0 %v7896_v20  ;;  %v7940_v63 = vadd.f32 %v742_v61, %v729_v56  ;;  %v7449_v56 = vld [vmem:[#allocation7 + $0x364] sm:$0xf]  ;;  %v5665_v61 = vld [vmem:[#allocation7 + $0x36c] sm:$0xf0]  ;;  %v7504_v36 = vld [vmem:[#allocation7 + $0x518] sm:$0xf0] }
  0xd2   :  { %2377 = vmatpush.bf16.msra.mxu0 %v5700_v42  ;;  %1691 = vmatmul.bf16.vlgmr.msrb.gmra.mxu1 %v7889_v57  ;;  %v5677_v42 = vld [vmem:[#allocation7 + $0x384] sm:$0xf0] }
  0xd3   :  { %1705 = vmatmul.bf16.vlgmr.msrb.gmra.mxu2 %v7892_v5  ;;  %1719 = vmatmul.bf16.vlgmr.msrb.gmra.mxu3 %v7896_v20  ;;  %v5680_v45 = vor.u32 %v7452_v41, %v5677_v42  ;;  %v7479_v42 = vld [vmem:[#allocation7 + $0x454] sm:$0xf] }
  0xd4   :  { %2391 = vmatpush.bf16.msra.mxu1 %v5796_v17  ;;  %v5641_v17 = vld [vmem:[#allocation7 + $0x33c] sm:$0xf0]  ;;  %2405 = vmatpush.bf16.msra.mxu2 %v5892_v23  ;;  %v5963_v23 = vld [vmem:[#allocation7 + $0x5b8] sm:$0xf] }
  0xd5   :  { %v5644_v18 = vor.u32 %v7443_v15, %v5641_v17  ;;  %v7473_v15 = vld [vmem:[#allocation7 + $0x424] sm:$0xf] }
  0xd6   :  { %2378 = vmatpush.bf16.msra.mxu0 %v5688_v49  ;;  %v756_v1 = vpop.f32.mrf.mxu2  ;;  %v7945_v38 = vpop.f32.mrf.mxu0 }
  0xd7   :  { %v757_v4 = vadd.f32 %v756_v1, %v177_v0  ;;  %v7947_v44 = vpop.f32.mrf.mxu1  ;;  %v5668_v1 = vor.u32 %v7449_v56, %v5665_v61  ;;  %v7501_v56 = vld [vmem:[#allocation7 + $0x500] sm:$0xf0] }
  0xd8   :  { %v770_v7 = vpop.f32.mrf.mxu3  ;;  %2392 = vmatpush.bf16.msra.mxu1 %v5784_v24  ;;  %v5711_v24 = vld [vmem:[#allocation7 + $0x3c0] sm:$0xf] }
  0xd9   :  { %v771_v8 = vadd.f32 %v770_v7, %v757_v4  ;;  %v7446_v4 = vld [vmem:[#allocation7 + $0x34c] sm:$0xf]  ;;  %v5736_v7 = vor.u32 %v7468_v3, %v5735_v2  ;;  %v5712_v27 = vor.u32 %v7462_v25, %v5711_v24  ;;  %v5773_v2 = vld [vmem:[#allocation7 + $0x444] sm:$0xf0]  ;;  %v5844_v24 = vor.u32 %v7495_v22, %v5843_v19  ;;  %v7525_v25 = vld [vmem:[#allocation7 + $0x5c0] sm:$0xf0] }
  0xda   :  { %2379 = vmatpush.bf16.msra.mxu0 %v5676_v55  ;;  %v7471_v55 = vld [vmem:[#allocation7 + $0x410] sm:$0xf0] }
  0xdb   :  { %v5748_v60 = vor.u32 %v7471_v55, %v5747_v54  ;;  %v5867_v54 = vld [vmem:[#allocation7 + $0x4f8] sm:$0xf] }
  0xdc   :  { %2393 = vmatpush.bf16.msra.mxu1 %v5772_v32  ;;  %v5632_v32 = vor.u32 %v7440_v26, %v5629_v28  ;;  %v5868_v61 = vor.u32 %v7501_v56, %v5867_v54  ;;  %v5964_v28 = vor.u32 %v7525_v25, %v5963_v23  ;;  %v7516_v23 = vld [vmem:[#allocation7 + $0x578] sm:$0xf0]  ;;  %v5893_v25 = vld [vmem:[#allocation7 + $0x534] sm:$0xf0] }
  0xde   :  { %2380 = vmatpush.bf16.msra.mxu0 %v5664_v62  ;;  %v7949_v46 = vpop.f32.mrf.mxu2 }
  0xe0   :  { %2394 = vmatpush.bf16.msra.mxu1 %v5760_v40  ;;  %v7954_v53 = vpop.f32.mrf.mxu3  ;;  %v5617_v40 = vld [vmem:[#allocation7 + $0x30c] sm:$0xf0] }
  0xe1   :  { %v5620_v41 = vor.u32 %v7437_v37, %v5617_v40  ;;  %v5951_v37 = vld [vmem:[#allocation7 + $0x5a0] sm:$0xf]  ;;  %v7522_v40 = vld [vmem:[#allocation7 + $0x5a8] sm:$0xf0] }
  0xe2   :  { %2381 = vmatpush.bf16.msra.mxu0 %v5652_v6 }
  0xe4   :  { %2395 = vmatpush.bf16.msra.mxu1 %v5748_v60  ;;  %v7531_v60 = vld [vmem:[#allocation7 + $0x5f0] sm:$0xf0] }
  0xe6   :  { %2382 = vmatpush.bf16.msra.mxu0 %v5640_v12 }
  0xe8   :  { %2396 = vmatpush.bf16.msra.mxu1 %v5736_v7  ;;  %v7498_v7 = vld [vmem:[#allocation7 + $0x4e8] sm:$0xf0] }
  0xea   :  { %2383 = vmatpush.bf16.msra.mxu0 %v5628_v16  ;;  %v5724_v16 = vor.u32 %v7465_v14, %v5723_v13 }
  0xec   :  { %2397 = vmatpush.bf16.msra.mxu1 %v5724_v16  ;;  %v5761_v16 = vld [vmem:[#allocation7 + $0x42c] sm:$0xf0] }
  0xee   :  { %2384 = vmatpush.bf16.msra.mxu0 %v5616_v30  ;;  %v784_v49 = vpop.f32.mrf.mxu0  ;;  %v7482_v30 = vld [vmem:[#allocation7 + $0x46c] sm:$0xf] }
  0xef   :  { %v7952_v52 = vadd.f32 %v784_v49, %v771_v8  ;;  %v798_v59 = vpop.f32.mrf.mxu1  ;;  %v5653_v8 = vld [vmem:[#allocation7 + $0x354] sm:$0xf0] }
  0xf0   :  { %v799_v62 = vadd.f32 %v798_v59, %v178_v50  ;;  %v5656_v10 = vor.u32 %v7446_v4, %v5653_v8  ;;  %2398 = vmatpush.bf16.msra.mxu1 %v5712_v27  ;;  %v5987_v59 = vld [vmem:[#allocation7 + $0x5e8] sm:$0xf]  ;;  %v7967_v8 = vld [vmem:[%s8158_s2 + $0x4] sm:$0xf] }
  0xf1   :  { %v1069_v17 = vperm.slane %v7967_v8, 0 }
  0xf2   :  { %2433 = vmatpush.bf16.msrb.mxu0 %v5704_v31  ;;  %v5797_v31 = vld [vmem:[#allocation7 + $0x474] sm:$0xf0] }
  0xf3   :  { %v5800_v33 = vor.u32 %v7482_v30, %v5797_v31  ;;  %v7470_v30 = vld [vmem:[#allocation7 + $0x40c] sm:$0xf]  ;;  %v5749_v31 = vld [vmem:[#allocation7 + $0x414] sm:$0xf0] }
  0xf5   :  { %2447 = vmatpush.bf16.msrb.mxu1 %v5800_v33 }
  0xf6   :  { %2434 = vmatpush.bf16.msrb.mxu0 %v5692_v39  ;;  %v812_v6 = vpop.f32.mrf.mxu2  ;;  %v5880_v39 = vor.u32 %v7504_v36, %v5879_v35  ;;  %v7962_v3 = vpop.f32.mrf.mxu0  ;;  %v5831_v35 = vld [vmem:[#allocation7 + $0x4b0] sm:$0xf]  ;;  %v7492_v36 = vld [vmem:[#allocation7 + $0x4b8] sm:$0xf0] }
  0xf7   :  { %v813_v9 = vadd.f32 %v812_v6, %v799_v62  ;;  %v7960_v55 = vpop.f32.mrf.mxu1  ;;  %v5988_v62 = vor.u32 %v7531_v60, %v5987_v59  ;;  %v5855_v6 = vld [vmem:[#allocation7 + $0x4e0] sm:$0xf]  ;;  %v5819_v59 = vld [vmem:[#allocation7 + $0x498] sm:$0xf]  ;;  %v7489_v60 = vld [vmem:[#allocation7 + $0x4a0] sm:$0xf0] }
  0xf8   :  { %v826_v11 = vpop.f32.mrf.mxu3  ;;  %2406 = vmatpush.bf16.msra.mxu2 %v5880_v39  ;;  %v5832_v39 = vor.u32 %v7492_v36, %v5831_v35 }
  0xf9   :  { %v7958_v12 = vadd.f32 %v826_v11, %v813_v9  ;;  %2419 = vmatpush.bf16.msra.mxu3 %v5988_v62  ;;  %v5856_v9 = vor.u32 %v7498_v7, %v5855_v6  ;;  %v7528_v11 = vld [vmem:[#allocation7 + $0x5d8] sm:$0xf0]  ;;  %v5820_v62 = vor.u32 %v7489_v60, %v5819_v59  ;;  %v5695_v59 = vld [vmem:[#allocation7 + $0x398] sm:$0xf] }
  0xfa   :  { %2435 = vmatpush.bf16.msrb.mxu0 %v5680_v45  ;;  %v5785_v45 = vld [vmem:[#allocation7 + $0x45c] sm:$0xf0]  ;;  %v7464_v7 = vld [vmem:[#allocation7 + $0x3dc] sm:$0xf] }
  0xfb   :  { %v5788_v49 = vor.u32 %v7479_v42, %v5785_v45  ;;  %v7467_v42 = vld [vmem:[#allocation7 + $0x3f4] sm:$0xf]  ;;  %v5737_v45 = vld [vmem:[#allocation7 + $0x3fc] sm:$0xf0] }
  0xfc   :  { %2407 = vmatpush.bf16.msra.mxu2 %v5868_v61  ;;  %v5740_v54 = vor.u32 %v7467_v42, %v5737_v45  ;;  %v5939_v61 = vld [vmem:[#allocation7 + $0x588] sm:$0xf]  ;;  %v7503_v42 = vld [vmem:[#allocation7 + $0x514] sm:$0xf]  ;;  %v5881_v45 = vld [vmem:[#allocation7 + $0x51c] sm:$0xf0] }
  0xfd   :  { %2448 = vmatpush.bf16.msrb.mxu1 %v5788_v49 }
  0xfe   :  { %2436 = vmatpush.bf16.msrb.mxu0 %v5668_v1  ;;  %v7476_v1 = vld [vmem:[#allocation7 + $0x43c] sm:$0xf]  ;;  %v7969_v13 = vpop.f32.mrf.mxu2 }
  0xff   :  { %v5776_v4 = vor.u32 %v7476_v1, %v5773_v2  ;;  %v7519_v1 = vld [vmem:[#allocation7 + $0x590] sm:$0xf0] }
 0x100   :  { %2408 = vmatpush.bf16.msra.mxu2 %v5856_v9  ;;  %v5940_v6 = vor.u32 %v7519_v1, %v5939_v61  ;;  %v5725_v9 = vld [vmem:[#allocation7 + $0x3e4] sm:$0xf0]  ;;  %v7457_v61 = vld [vmem:[#allocation7 + $0x3a0] sm:$0xf0]  ;;  %v7510_v1 = vld [vmem:[#allocation7 + $0x548] sm:$0xf0] }
 0x101   :  { %2449 = vmatpush.bf16.msrb.mxu1 %v5776_v4 }
 0x102   :  { %2437 = vmatpush.bf16.msrb.mxu0 %v5656_v10  ;;  %v5975_v10 = vld [vmem:[#allocation7 + $0x5d0] sm:$0xf] }
 0x103   :  { %v5976_v14 = vor.u32 %v7528_v11, %v5975_v10  ;;  %v5728_v11 = vor.u32 %v7464_v7, %v5725_v9  ;;  %v7530_v7 = vld [vmem:[#allocation7 + $0x5ec] sm:$0xf] }
 0x104   :  { %2409 = vmatpush.bf16.msra.mxu2 %v5844_v24  ;;  %v7506_v24 = vld [vmem:[#allocation7 + $0x52c] sm:$0xf] }
 0x105   :  { %2420 = vmatpush.bf16.msra.mxu3 %v5976_v14 }
 0x106   :  { %2438 = vmatpush.bf16.msrb.mxu0 %v5644_v18  ;;  %v5764_v18 = vor.u32 %v7473_v15, %v5761_v16  ;;  %v5807_v15 = vld [vmem:[#allocation7 + $0x480] sm:$0xf]  ;;  %v7486_v16 = vld [vmem:[#allocation7 + $0x488] sm:$0xf0] }
 0x107   :  { %v5808_v22 = vor.u32 %v7486_v16, %v5807_v15  ;;  %v5683_v16 = vld [vmem:[#allocation7 + $0x380] sm:$0xf] }
 0x108   :  { %2450 = vmatpush.bf16.msrb.mxu1 %v5764_v18  ;;  %2410 = vmatpush.bf16.msra.mxu2 %v5832_v39  ;;  %v5927_v18 = vld [vmem:[#allocation7 + $0x570] sm:$0xf]  ;;  %v5915_v39 = vld [vmem:[#allocation7 + $0x558] sm:$0xf] }
 0x109   :  { %2421 = vmatpush.bf16.msra.mxu3 %v5964_v28  ;;  %v7461_v28 = vld [vmem:[#allocation7 + $0x3c4] sm:$0xf] }
 0x10a   :  { %2439 = vmatpush.bf16.msrb.mxu0 %v5632_v32  ;;  %v5752_v32 = vor.u32 %v7470_v30, %v5749_v31  ;;  %v5713_v30 = vld [vmem:[#allocation7 + $0x3cc] sm:$0xf0]  ;;  %v7972_v31 = vpop.f32.mrf.mxu3 }
 0x10b   :  { %v5716_v35 = vor.u32 %v7461_v28, %v5713_v30  ;;  %v5671_v30 = vld [vmem:[#allocation7 + $0x368] sm:$0xf] }
 0x10c   :  { %2451 = vmatpush.bf16.msrb.mxu1 %v5752_v32  ;;  %2411 = vmatpush.bf16.msra.mxu2 %v5820_v62  ;;  %v5707_v32 = vld [vmem:[#allocation7 + $0x3b0] sm:$0xf]  ;;  %v5903_v62 = vld [vmem:[#allocation7 + $0x540] sm:$0xf] }
 0x10e   :  { %2440 = vmatpush.bf16.msrb.mxu0 %v5620_v41  ;;  %v1566_v26 = vpop.f32.mrf.mxu0  ;;  %v5952_v41 = vor.u32 %v7522_v40, %v5951_v37  ;;  %v7513_v40 = vld [vmem:[#allocation7 + $0x560] sm:$0xf0] }
 0x10f   :  { %v1580_v27 = vpop.f32.mrf.mxu1  ;;  %v1567_v33 = vadd.f32 %v1566_v26, %v1069_v17  ;;  %v5928_v26 = vor.u32 %v7516_v23, %v5927_v18  ;;  %v7454_v18 = vld [vmem:[#allocation7 + $0x388] sm:$0xf0]  ;;  %v7527_v23 = vld [vmem:[#allocation7 + $0x5d4] sm:$0xf] }
 0x110   :  { %2422 = vmatpush.bf16.msra.mxu3 %v5952_v41  ;;  %2452 = vmatpush.bf16.msrb.mxu1 %v5740_v54  ;;  %v5916_v41 = vor.u32 %v7513_v40, %v5915_v39  ;;  %v5884_v54 = vor.u32 %v7503_v42, %v5881_v45  ;;  %v5965_v39 = vld [vmem:[#allocation7 + $0x5c4] sm:$0xf0] }
 0x111   :  { %v1581_v56 = vadd.f32 %v1580_v27, %v1567_v33  ;;  %v5896_v27 = vor.u32 %v7506_v24, %v5893_v25  ;;  %v7460_v33 = vld [vmem:[#allocation7 + $0x3b8] sm:$0xf0]  ;;  %2412 = vmatpush.bf16.msra.mxu2 %v5808_v22  ;;  %v5857_v22 = vld [vmem:[#allocation7 + $0x4ec] sm:$0xf0]  ;;  %v1070_v24 = vperm.slane %v7967_v8, 1 }
 0x114   :  { %2423 = vmatpush.bf16.msra.mxu3 %v5940_v6  ;;  %2453 = vmatpush.bf16.msrb.mxu1 %v5728_v11  ;;  %v5869_v6 = vld [vmem:[#allocation7 + $0x504] sm:$0xf0]  ;;  %v5696_v11 = vor.u32 %v7457_v61, %v5695_v59  ;;  %v7491_v59 = vld [vmem:[#allocation7 + $0x4b4] sm:$0xf]  ;;  %v5833_v61 = vld [vmem:[#allocation7 + $0x4bc] sm:$0xf0] }
 0x115   :  { %2461 = vmatpush.bf16.msrb.mxu2 %v5896_v27  ;;  %v5684_v27 = vor.u32 %v7454_v18, %v5683_v16  ;;  %v7518_v16 = vld [vmem:[#allocation7 + $0x58c] sm:$0xf] }
 0x116   :  { %v1594_v49 = vpop.f32.mrf.mxu2  ;;  %v1568_v2 = vpop.f32.mrf.mxu0 }
 0x117   :  { %v1582_v4 = vpop.f32.mrf.mxu1  ;;  %v1569_v10 = vadd.f32 %v1568_v2, %v1069_v17  ;;  %v1595_v14 = vadd.f32 %v1594_v49, %v1581_v56  ;;  %v5708_v56 = vor.u32 %v7460_v33, %v5707_v32  ;;  %v5904_v2 = vor.u32 %v7510_v1, %v5903_v62  ;;  %v7494_v32 = vld [vmem:[#allocation7 + $0x4cc] sm:$0xf]  ;;  %v5845_v33 = vld [vmem:[#allocation7 + $0x4d4] sm:$0xf0]  ;;  %v7521_v62 = vld [vmem:[#allocation7 + $0x5a4] sm:$0xf] }
 0x118   :  { %2424 = vmatpush.bf16.msra.mxu3 %v5928_v26  ;;  %2454 = vmatpush.bf16.msrb.mxu1 %v5716_v35  ;;  %v5977_v26 = vld [vmem:[#allocation7 + $0x5dc] sm:$0xf0]  ;;  %v7524_v35 = vld [vmem:[#allocation7 + $0x5bc] sm:$0xf] }
 0x119   :  { %v1583_v19 = vadd.f32 %v1582_v4, %v1569_v10  ;;  %v1725_v36 = vmax.f32 %v1595_v14, 0.0  ;;  %2462 = vmatpush.bf16.msrb.mxu2 %v5884_v54  ;;  %v7500_v4 = vld [vmem:[#allocation7 + $0x4fc] sm:$0xf]  ;;  %v5989_v10 = vld [vmem:[#allocation7 + $0x5f4] sm:$0xf0]  ;;  %v1608_v14 = vpop.f32.mrf.mxu3  ;;  %v5980_v28 = vor.u32 %v7527_v23, %v5977_v26  ;;  %v5968_v42 = vor.u32 %v7524_v35, %v5965_v39 }
 0x11a   :  { %v5872_v9 = vor.u32 %v7500_v4, %v5869_v6  ;;  %v5992_v15 = vor.u32 %v7530_v7, %v5989_v10  ;;  %v7448_v54 = vld [vmem:[#allocation7 + $0x358] sm:$0xf0]  ;;  %v5953_v4 = vld [vmem:[#allocation7 + $0x5ac] sm:$0xf0]  ;;  %v5647_v10 = vld [vmem:[#allocation7 + $0x338] sm:$0xf] }
 0x11b   :  { %v5956_v7 = vor.u32 %v7521_v62, %v5953_v4  ;;  %v7515_v35 = vld [vmem:[#allocation7 + $0x574] sm:$0xf]  ;;  %v7484_v39 = vld [vmem:[#allocation7 + $0x478] sm:$0xf0] }
 0x11c   :  { %2425 = vmatpush.bf16.msra.mxu3 %v5916_v41  ;;  %v7267_v62 = vld [vmem:[#allocation7 + $0xb0] sm:$0xf0] }
 0x11d   :  { %2463 = vmatpush.bf16.msrb.mxu2 %v5872_v9 }
 0x11e   :  { %v1596_v17 = vpop.f32.mrf.mxu2 }
 0x11f   :  { %v1597_v37 = vadd.f32 %v1596_v17, %v1583_v19  ;;  %v7497_v19 = vld [vmem:[#allocation7 + $0x4e4] sm:$0xf]  ;;  %v7451_v17 = vld [vmem:[#allocation7 + $0x370] sm:$0xf0] }
 0x120   :  { %2426 = vmatpush.bf16.msra.mxu3 %v5904_v2  ;;  %v5860_v25 = vor.u32 %v7497_v19, %v5857_v22  ;;  %v5672_v41 = vor.u32 %v7451_v17, %v5671_v30  ;;  %v5836_v2 = vor.u32 %v7491_v59, %v5833_v61  ;;  %v5941_v22 = vld [vmem:[#allocation7 + $0x594] sm:$0xf0]  ;;  %v5635_v30 = vld [vmem:[#allocation7 + $0x320] sm:$0xf]  ;;  %v5803_v17 = vld [vmem:[#allocation7 + $0x470] sm:$0xf] }
 0x121   :  { %v1729_v49 = vmax.f32 %v1597_v37, 0.0  ;;  %v5848_v37 = vor.u32 %v7494_v32, %v5845_v33  ;;  %v5944_v26 = vor.u32 %v7518_v16, %v5941_v22  ;;  %v7485_v32 = vld [vmem:[#allocation7 + $0x484] sm:$0xf]  ;;  %v5809_v33 = vld [vmem:[#allocation7 + $0x48c] sm:$0xf0]  ;;  %v5804_v61 = vor.u32 %v7484_v39, %v5803_v17 }
 0x122   :  { %2464 = vmatpush.bf16.msrb.mxu2 %v5860_v25  ;;  %v6083_v59 = vld [vmem:[#allocation7 + $0xa8] sm:$0xf]  ;;  %v5905_v22 = vld [vmem:[#allocation7 + $0x54c] sm:$0xf0]  ;;  %v7261_v17 = vld [vmem:[#allocation7 + $0x80] sm:$0xf0] }
 0x123   :  { %v7974_v60 = vpack.c.bf16 %v1729_v49, %v1725_v36  ;;  %v1609_v36 = vadd.f32 %v1608_v14, %v1070_v24  ;;  %v5659_v49 = vld [vmem:[#allocation7 + $0x350] sm:$0xf]  ;;  %v7488_v14 = vld [vmem:[#allocation7 + $0x49c] sm:$0xf]  ;;  %v6047_v39 = vld [vmem:[#allocation7 + $0x60] sm:$0xf] }
 0x124   :  { %2475 = vmatpush.bf16.msrb.mxu3 %v5992_v15  ;;  %v5660_v6 = vor.u32 %v7448_v54, %v5659_v49  ;;  %v5821_v15 = vld [vmem:[#allocation7 + $0x4a4] sm:$0xf0] }
 0x125   :  { %2385 = vmatmul.bf16.vlgmr.msra.gmra.mxu0 %v7974_v60  ;;  %v5824_v19 = vor.u32 %v7488_v14, %v5821_v15  ;;  %v6071_v14 = vld [vmem:[#allocation7 + $0x90] sm:$0xf] }
 0x126   :  { %2489 = vmatpush.bf16.msra.mxu0 %v5708_v56  ;;  %2465 = vmatpush.bf16.msrb.mxu2 %v5848_v37  ;;  %v1610_v56 = vpop.f32.mrf.mxu3 }
 0x127   :  { %v1611_v9 = vadd.f32 %v1610_v56, %v1070_v24  ;;  %v7442_v24 = vld [vmem:[#allocation7 + $0x328] sm:$0xf0]  ;;  %v7439_v56 = vld [vmem:[#allocation7 + $0x310] sm:$0xf0] }
 0x128   :  { %2476 = vmatpush.bf16.msrb.mxu3 %v5980_v28 }
 0x12a   :  { %2490 = vmatpush.bf16.msra.mxu0 %v5696_v11  ;;  %v7445_v11 = vld [vmem:[#allocation7 + $0x340] sm:$0xf0]  ;;  %2466 = vmatpush.bf16.msrb.mxu2 %v5836_v2  ;;  %v5917_v2 = vld [vmem:[#allocation7 + $0x564] sm:$0xf0] }
 0x12b   :  { %v5648_v25 = vor.u32 %v7445_v11, %v5647_v10  ;;  %v6084_v11 = vor.u32 %v7267_v62, %v6083_v59  ;;  %v6035_v62 = vld [vmem:[#allocation7 + $0x48] sm:$0xf] }
 0x12c   :  { %2477 = vmatpush.bf16.msrb.mxu3 %v5968_v42  ;;  %v5636_v42 = vor.u32 %v7442_v24, %v5635_v30  ;;  %v6059_v24 = vld [vmem:[#allocation7 + $0x78] sm:$0xf] }
 0x12e   :  { %v1622_v40 = vpop.f32.mrf.mxu0  ;;  %2491 = vmatpush.bf16.msra.mxu0 %v5684_v27  ;;  %2467 = vmatpush.bf16.msrb.mxu2 %v5824_v19  ;;  %v7509_v19 = vld [vmem:[#allocation7 + $0x544] sm:$0xf] }
 0x12f   :  { %v1636_v45 = vpop.f32.mrf.mxu1  ;;  %v1623_v1 = vadd.f32 %v1622_v40, %v1609_v36  ;;  %v5812_v40 = vor.u32 %v7485_v32, %v5809_v33  ;;  %v5767_v32 = vld [vmem:[#allocation7 + $0x428] sm:$0xf]  ;;  %v7475_v33 = vld [vmem:[#allocation7 + $0x430] sm:$0xf0] }
 0x130   :  { %2478 = vmatpush.bf16.msrb.mxu3 %v5956_v7  ;;  %v7481_v7 = vld [vmem:[#allocation7 + $0x460] sm:$0xf0] }
 0x131   :  { %v1637_v18 = vadd.f32 %v1636_v45, %v1623_v1  ;;  %v5623_v45 = vld [vmem:[#allocation7 + $0x308] sm:$0xf]  ;;  %v7512_v1 = vld [vmem:[#allocation7 + $0x55c] sm:$0xf] }
 0x132   :  { %2492 = vmatpush.bf16.msra.mxu0 %v5672_v41  ;;  %v5929_v41 = vld [vmem:[#allocation7 + $0x57c] sm:$0xf0]  ;;  %2468 = vmatpush.bf16.msrb.mxu2 %v5812_v40  ;;  %v5624_v10 = vor.u32 %v7439_v56, %v5623_v45  ;;  %v7258_v40 = vld [vmem:[#allocation7 + $0x68] sm:$0xf0] }
 0x133   :  { %v1726_v36 = vmax.f32 %v1637_v18, 0.0  ;;  %v5932_v49 = vor.u32 %v7515_v35, %v5929_v41  ;;  %v7264_v18 = vld [vmem:[#allocation7 + $0x98] sm:$0xf0]  ;;  %v6060_v35 = vor.u32 %v7261_v17, %v6059_v24  ;;  %v5755_v41 = vld [vmem:[#allocation7 + $0x410] sm:$0xf]  ;;  %v6048_v56 = vor.u32 %v7258_v40, %v6047_v39 }
 0x134   :  { %2479 = vmatpush.bf16.msrb.mxu3 %v5944_v26  ;;  %v7478_v26 = vld [vmem:[#allocation7 + $0x448] sm:$0xf0]  ;;  %v5899_v17 = vld [vmem:[#allocation7 + $0x530] sm:$0xf] }
 0x135   :  { %2441 = vmatmul.bf16.vlgmr.msrb.gmra.mxu0 %v7974_v60 }
 0x136   :  { %v1624_v23 = vpop.f32.mrf.mxu0  ;;  %2493 = vmatpush.bf16.msra.mxu0 %v5660_v6  ;;  %v5791_v6 = vld [vmem:[#allocation7 + $0x458] sm:$0xf]  ;;  %v1650_v15 = vpop.f32.mrf.mxu2 }
 0x137   :  { %v1625_v27 = vadd.f32 %v1624_v23, %v1611_v9  ;;  %v1638_v28 = vpop.f32.mrf.mxu1  ;;  %v5920_v9 = vor.u32 %v7512_v1, %v5917_v2  ;;  %v5792_v16 = vor.u32 %v7481_v7, %v5791_v6  ;;  %v7255_v1 = vld [vmem:[#allocation7 + $0x50] sm:$0xf0]  ;;  %v5743_v2 = vld [vmem:[#allocation7 + $0x3f8] sm:$0xf]  ;;  %v7469_v6 = vld [vmem:[#allocation7 + $0x400] sm:$0xf0] }
 0x138   :  { %2480 = vmatpush.bf16.msrb.mxu3 %v5932_v49  ;;  %v1664_v23 = vpop.f32.mrf.mxu3 }
 0x139   :  { %v1639_v37 = vadd.f32 %v1638_v28, %v1625_v27  ;;  %v5908_v27 = vor.u32 %v7509_v19, %v5905_v22  ;;  %v6072_v28 = vor.u32 %v7264_v18, %v6071_v14  ;;  %v7252_v18 = vld [vmem:[#allocation7 + $0x38] sm:$0xf0]  ;;  %v5731_v19 = vld [vmem:[#allocation7 + $0x3e0] sm:$0xf]  ;;  %v7466_v22 = vld [vmem:[#allocation7 + $0x3e8] sm:$0xf0] }
 0x13a   :  { %2494 = vmatpush.bf16.msra.mxu0 %v5648_v25  ;;  %v5779_v25 = vld [vmem:[#allocation7 + $0x440] sm:$0xf] }
 0x13b   :  { %v1730_v54 = vmax.f32 %v1639_v37, 0.0  ;;  %v5780_v30 = vor.u32 %v7478_v26, %v5779_v25  ;;  %v5768_v37 = vor.u32 %v7475_v33, %v5767_v32 }
 0x13c   :  { %2481 = vmatpush.bf16.msrb.mxu3 %v5920_v9  ;;  %v1072_v9 = vperm.slane %v7967_v8, 3 }
 0x13d   :  { %v7979_v4 = vpack.c.bf16 %v1730_v54, %v1726_v36  ;;  %v1071_v36 = vperm.slane %v7967_v8, 2 }
 0x13e   :  { %2495 = vmatpush.bf16.msra.mxu0 %v5636_v42  ;;  %v7472_v42 = vld [vmem:[#allocation7 + $0x418] sm:$0xf0]  ;;  %v1652_v45 = vpop.f32.mrf.mxu2 }
 0x13f   :  { %2399 = vmatmul.bf16.vlgmr.msra.gmra.mxu1 %v7979_v4  ;;  %v1651_v59 = vadd.f32 %v1650_v15, %v1071_v36  ;;  %v1653_v7 = vadd.f32 %v1652_v45, %v1071_v36  ;;  %v5744_v15 = vor.u32 %v7469_v6, %v5743_v2  ;;  %v5719_v36 = vld [vmem:[#allocation7 + $0x3c8] sm:$0xf]  ;;  %v7291_v45 = vld [vmem:[#allocation7 + $0x170] sm:$0xf0]  ;;  %v5999_v6 = vld [vmem:[#allocation7] sm:$0xf] }
 0x140   :  { %2503 = vmatpush.bf16.msra.mxu1 %v5804_v61  ;;  %2482 = vmatpush.bf16.msrb.mxu3 %v5908_v27  ;;  %v1666_v49 = vpop.f32.mrf.mxu3 }
 0x141   :  { %v1665_v14 = vadd.f32 %v1664_v23, %v1651_v59  ;;  %v1667_v25 = vadd.f32 %v1666_v49, %v1653_v7  ;;  %v6011_v23 = vld [vmem:[#allocation7 + $0x18] sm:$0xf]  ;;  %v7246_v7 = vld [vmem:[#allocation7 + $0x8] sm:$0xf0] }
 0x142   :  { %2496 = vmatpush.bf16.msra.mxu0 %v5624_v10  ;;  %v6036_v10 = vor.u32 %v7255_v1, %v6035_v62  ;;  %v7505_v62 = vld [vmem:[#allocation7 + $0x520] sm:$0xf0] }
 0x144   :  { %2504 = vmatpush.bf16.msra.mxu1 %v5792_v16  ;;  %v6023_v16 = vld [vmem:[#allocation7 + $0x30] sm:$0xf] }
 0x145   :  { %2497 = vmatmul.bf16.vlgmr.msra.gmra.mxu0 %v7974_v60  ;;  %v5756_v60 = vor.u32 %v7472_v42, %v5755_v41  ;;  %v6024_v24 = vor.u32 %v7252_v18, %v6023_v16  ;;  %v6179_v42 = vld [vmem:[#allocation7 + $0x168] sm:$0xf]  ;;  %v6085_v16 = vld [vmem:[#allocation7 + $0xb4] sm:$0xf0] }
 0x146   :  { %3057 = vmatpush.bf16.msrb.mxu0 %v6084_v11  ;;  %v675_v11 = vadd.f32 %v7925_v43, %v175_v29  ;;  %v5732_v29 = vor.u32 %v7466_v22, %v5731_v19  ;;  %v7508_v43 = vld [vmem:[#allocation7 + $0x538] sm:$0xf0]  ;;  %v6180_v2 = vor.u32 %v7291_v45, %v6179_v42  ;;  %v831_v22 = vmax.f32 %v7923_v34, 0.0 }
 0x148   :  { %2505 = vmatpush.bf16.msra.mxu1 %v5780_v30  ;;  %v689_v32 = vadd.f32 %v7927_v47, %v675_v11 }
 0x14a   :  { %3058 = vmatpush.bf16.msrb.mxu0 %v6072_v28  ;;  %v703_v59 = vadd.f32 %v7936_v51, %v689_v32  ;;  %v5995_v32 = vld [vmem:[#allocation7 + $0x5f0] sm:$0xf] }
 0x14c   :  { %2506 = vmatpush.bf16.msra.mxu1 %v5768_v37  ;;  %v7463_v37 = vld [vmem:[#allocation7 + $0x3d0] sm:$0xf0] }
 0x14e   :  { %v1678_v54 = vpop.f32.mrf.mxu0  ;;  %3059 = vmatpush.bf16.msrb.mxu0 %v6060_v35  ;;  %v7249_v35 = vld [vmem:[#allocation7 + $0x20] sm:$0xf0] }
 0x14f   :  { %v1692_v61 = vpop.f32.mrf.mxu1  ;;  %2455 = vmatmul.bf16.vlgmr.msrb.gmra.mxu1 %v7979_v4  ;;  %v1679_v26 = vadd.f32 %v1678_v54, %v1665_v14  ;;  %v5900_v54 = vor.u32 %v7508_v43, %v5899_v17  ;;  %v7288_v14 = vld [vmem:[#allocation7 + $0x158] sm:$0xf0]  ;;  %v7263_v43 = vld [vmem:[#allocation7 + $0x94] sm:$0xf] }
 0x150   :  { %2507 = vmatpush.bf16.msra.mxu1 %v5756_v60  ;;  %v1693_v28 = vadd.f32 %v1692_v61, %v1072_v9  ;;  %v5720_v61 = vor.u32 %v7463_v37, %v5719_v36  ;;  %v5887_v60 = vld [vmem:[#allocation7 + $0x518] sm:$0xf] }
 0x151   :  { %v1727_v39 = vmax.f32 %v1679_v26, 0.0  ;;  %v5888_v51 = vor.u32 %v7505_v62, %v5887_v60  ;;  %v7260_v60 = vld [vmem:[#allocation7 + $0x7c] sm:$0xf]  ;;  %v6061_v62 = vld [vmem:[#allocation7 + $0x84] sm:$0xf0] }
 0x152   :  { %3060 = vmatpush.bf16.msrb.mxu0 %v6048_v56  ;;  %v6012_v56 = vor.u32 %v7249_v35, %v6011_v23  ;;  %v6073_v23 = vld [vmem:[#allocation7 + $0x9c] sm:$0xf0] }
 0x153   :  { %v6076_v45 = vor.u32 %v7263_v43, %v6073_v23  ;;  %v5827_v43 = vld [vmem:[#allocation7 + $0x4a0] sm:$0xf]  ;;  %v7490_v23 = vld [vmem:[#allocation7 + $0x4a8] sm:$0xf0] }
 0x154   :  { %2508 = vmatpush.bf16.msra.mxu1 %v5744_v15  ;;  %v7266_v15 = vld [vmem:[#allocation7 + $0xac] sm:$0xf] }
 0x155   :  { %v6088_v17 = vor.u32 %v7266_v15, %v6085_v16  ;;  %v6131_v15 = vld [vmem:[#allocation7 + $0x108] sm:$0xf]  ;;  %v7279_v16 = vld [vmem:[#allocation7 + $0x110] sm:$0xf0] }
 0x156   :  { %v1706_v27 = vpop.f32.mrf.mxu2  ;;  %v1720_v8 = vpop.f32.mrf.mxu3  ;;  %3061 = vmatpush.bf16.msrb.mxu0 %v6036_v10  ;;  %v6167_v10 = vld [vmem:[#allocation7 + $0x150] sm:$0xf] }
 0x157   :  { %v1680_v30 = vpop.f32.mrf.mxu0  ;;  %v1694_v41 = vpop.f32.mrf.mxu1  ;;  %v1707_v49 = vadd.f32 %v1706_v27, %v1693_v28  ;;  %v5875_v27 = vld [vmem:[#allocation7 + $0x500] sm:$0xf]  ;;  %v7502_v28 = vld [vmem:[#allocation7 + $0x508] sm:$0xf0] }
 0x158   :  { %v1681_v33 = vadd.f32 %v1680_v30, %v1667_v25  ;;  %2509 = vmatpush.bf16.msra.mxu1 %v5732_v29  ;;  %v1695_v1 = vadd.f32 %v1694_v41, %v1072_v9  ;;  %v835_v25 = vmax.f32 %v703_v59, 0.0  ;;  %v6000_v9 = vor.u32 %v7246_v7, %v5999_v6  ;;  %v6155_v29 = vld [vmem:[#allocation7 + $0x138] sm:$0xf]  ;;  %v7496_v6 = vld [vmem:[#allocation7 + $0x4d8] sm:$0xf0] }
 0x159   :  { %v1721_v18 = vadd.f32 %v1720_v8, %v1707_v49  ;;  %v7285_v8 = vld [vmem:[#allocation7 + $0x140] sm:$0xf0]  ;;  %v5876_v34 = vor.u32 %v7502_v28, %v5875_v27  ;;  %v5983_v49 = vld [vmem:[#allocation7 + $0x5d8] sm:$0xf]  ;;  %v6132_v27 = vor.u32 %v7279_v16, %v6131_v15 }
 0x15a   :  { %v1731_v40 = vmax.f32 %v1681_v33, 0.0  ;;  %3062 = vmatpush.bf16.msrb.mxu0 %v6024_v24  ;;  %v6168_v24 = vor.u32 %v7288_v14, %v6167_v10  ;;  %v7532_v33 = vld [vmem:[#allocation7 + $0x5f8] sm:$0xf0]  ;;  %v6156_v42 = vor.u32 %v7285_v8, %v6155_v29  ;;  %v7998_v59 = vpack.c.bf16 %v835_v25, %v831_v22  ;;  %v7526_v14 = vld [vmem:[#allocation7 + $0x5c8] sm:$0xf0] }
 0x15b   :  { %v1728_v35 = vmax.f32 %v1721_v18, 0.0  ;;  %v5996_v37 = vor.u32 %v7532_v33, %v5995_v32  ;;  %v6064_v10 = vor.u32 %v7260_v60, %v6061_v62  ;;  %v7257_v18 = vld [vmem:[#allocation7 + $0x64] sm:$0xf]  ;;  %v717_v22 = vadd.f32 %v7938_v58, %v176_v48  ;;  %v7276_v32 = vld [vmem:[#allocation7 + $0xf8] sm:$0xf0] }
 0x15c   :  { %v7991_v47 = vpack.c.bf16 %v1731_v40, %v1727_v39  ;;  %2510 = vmatpush.bf16.msra.mxu1 %v5720_v61  ;;  %v5863_v39 = vld [vmem:[#allocation7 + $0x4e8] sm:$0xf]  ;;  %v7499_v40 = vld [vmem:[#allocation7 + $0x4f0] sm:$0xf0]  ;;  %v7282_v61 = vld [vmem:[#allocation7 + $0x128] sm:$0xf0] }
 0x15d   :  { %v7254_v33 = vld [vmem:[#allocation7 + $0x4c] sm:$0xf]  ;;  %v6037_v29 = vld [vmem:[#allocation7 + $0x54] sm:$0xf0]  ;;  %v731_v48 = vadd.f32 %v7945_v38, %v717_v22  ;;  %v7517_v62 = vld [vmem:[#allocation7 + $0x580] sm:$0xf0] }
 0x15e   :  { %v1708_v11 = vpop.f32.mrf.mxu2  ;;  %2413 = vmatmul.bf16.vlgmr.msra.gmra.mxu2 %v7991_v47  ;;  %3063 = vmatpush.bf16.msrb.mxu0 %v6012_v56  ;;  %v1722_v26 = vpop.f32.mrf.mxu3  ;;  %v6143_v56 = vld [vmem:[#allocation7 + $0x120] sm:$0xf]  ;;  %v5935_v60 = vld [vmem:[#allocation7 + $0x578] sm:$0xf] }
 0x15f   :  { %v1709_v19 = vadd.f32 %v1708_v11, %v1695_v1  ;;  %2517 = vmatpush.bf16.msra.mxu2 %v5900_v54  ;;  %2511 = vmatmul.bf16.vlgmr.msra.gmra.mxu1 %v7979_v4  ;;  %v7529_v54 = vld [vmem:[#allocation7 + $0x5e0] sm:$0xf0]  ;;  %v5864_v4 = vor.u32 %v7499_v40, %v5863_v39  ;;  %v6144_v7 = vor.u32 %v7282_v61, %v6143_v56  ;;  %v5971_v11 = vld [vmem:[#allocation7 + $0x5c0] sm:$0xf]  ;;  %v6107_v39 = vld [vmem:[#allocation7 + $0xd8] sm:$0xf] }
 0x160   :  { %3071 = vmatpush.bf16.msrb.mxu1 %v6180_v2  ;;  %v5984_v1 = vor.u32 %v7529_v54, %v5983_v49  ;;  %v5851_v2 = vld [vmem:[#allocation7 + $0x4d0] sm:$0xf]  ;;  %v5972_v25 = vor.u32 %v7526_v14, %v5971_v11  ;;  %v7273_v40 = vld [vmem:[#allocation7 + $0xe0] sm:$0xf0]  ;;  %v5828_v49 = vor.u32 %v7490_v23, %v5827_v43  ;;  %v5815_v54 = vld [vmem:[#allocation7 + $0x488] sm:$0xf]  ;;  %v745_v56 = vadd.f32 %v7947_v44, %v731_v48 }
 0x161   :  { %v1723_v30 = vadd.f32 %v1722_v26, %v1709_v19  ;;  %v6049_v19 = vld [vmem:[#allocation7 + $0x6c] sm:$0xf0]  ;;  %v5839_v26 = vld [vmem:[#allocation7 + $0x4b8] sm:$0xf]  ;;  %v7487_v61 = vld [vmem:[#allocation7 + $0x490] sm:$0xf0] }
 0x162   :  { %3064 = vmatpush.bf16.msrb.mxu0 %v6000_v9  ;;  %v7493_v9 = vld [vmem:[#allocation7 + $0x4c0] sm:$0xf0]  ;;  %v6052_v28 = vor.u32 %v7257_v18, %v6049_v19  ;;  %v7248_v11 = vld [vmem:[#allocation7 + $0x1c] sm:$0xf]  ;;  %v6013_v14 = vld [vmem:[#allocation7 + $0x24] sm:$0xf0]  ;;  %v5816_v15 = vor.u32 %v7487_v61, %v5815_v54 }
 0x163   :  { %v1732_v36 = vmax.f32 %v1723_v30, 0.0  ;;  %2518 = vmatpush.bf16.msra.mxu2 %v5888_v51  ;;  %v5852_v51 = vor.u32 %v7496_v6, %v5851_v2  ;;  %v5959_v30 = vld [vmem:[#allocation7 + $0x5a8] sm:$0xf]  ;;  %v5840_v8 = vor.u32 %v7493_v9, %v5839_v26  ;;  %v7315_v6 = vld [vmem:[#allocation7 + $0x230] sm:$0xf0]  ;;  %v832_v18 = vmax.f32 %v7940_v63, 0.0 }
 0x164   :  { %3072 = vmatpush.bf16.msrb.mxu1 %v6168_v24  ;;  %v7523_v24 = vld [vmem:[#allocation7 + $0x5b0] sm:$0xf0]  ;;  %v6275_v2 = vld [vmem:[#allocation7 + $0x228] sm:$0xf]  ;;  %v7290_v44 = vld [vmem:[#allocation7 + $0x16c] sm:$0xf]  ;;  %v6016_v9 = vor.u32 %v7248_v11, %v6013_v14 }
 0x165   :  { %v7996_v41 = vpack.c.bf16 %v1732_v36, %v1728_v35  ;;  %3065 = vmatmul.bf16.vlgmr.msrb.gmra.mxu0 %v7998_v59  ;;  %v5960_v58 = vor.u32 %v7523_v24, %v5959_v30  ;;  %v6040_v36 = vor.u32 %v7254_v33, %v6037_v29  ;;  %v6181_v16 = vld [vmem:[#allocation7 + $0x174] sm:$0xf0]  ;;  %v836_v19 = vmax.f32 %v745_v56, 0.0  ;;  %v7312_v30 = vld [vmem:[#allocation7 + $0x218] sm:$0xf0] }
 0x166   :  { %3113 = vmatpush.bf16.msra.mxu0 %v6088_v17  ;;  %v6119_v17 = vld [vmem:[#allocation7 + $0xf0] sm:$0xf]  ;;  %v6276_v22 = vor.u32 %v7315_v6, %v6275_v2  ;;  %v6184_v24 = vor.u32 %v7290_v44, %v6181_v16  ;;  %v7287_v33 = vld [vmem:[#allocation7 + $0x154] sm:$0xf]  ;;  %v6169_v29 = vld [vmem:[#allocation7 + $0x15c] sm:$0xf0] }
 0x167   :  { %2427 = vmatmul.bf16.vlgmr.msra.gmra.mxu3 %v7996_v41  ;;  %2519 = vmatpush.bf16.msra.mxu2 %v5876_v34  ;;  %v6120_v35 = vor.u32 %v7276_v32, %v6119_v17  ;;  %v5947_v34 = vld [vmem:[#allocation7 + $0x590] sm:$0xf]  ;;  %v7245_v17 = vld [vmem:[#allocation7 + $0x4] sm:$0xf]  ;;  %v7268_v63 = vld [vmem:[#allocation7 + $0xb8] sm:$0xf0] }
 0x168   :  { %2531 = vmatpush.bf16.msra.mxu3 %v5996_v37  ;;  %3073 = vmatpush.bf16.msrb.mxu1 %v6156_v42  ;;  %v7520_v37 = vld [vmem:[#allocation7 + $0x598] sm:$0xf0]  ;;  %v7251_v42 = vld [vmem:[#allocation7 + $0x34] sm:$0xf]  ;;  %v6001_v32 = vld [vmem:[#allocation7 + $0xc] sm:$0xf0] }
 0x169   :  { %v5948_v38 = vor.u32 %v7520_v37, %v5947_v34  ;;  %v6004_v23 = vor.u32 %v7245_v17, %v6001_v32  ;;  %v7309_v34 = vld [vmem:[#allocation7 + $0x200] sm:$0xf0]  ;;  %v8010_v37 = vpack.c.bf16 %v836_v19, %v832_v18  ;;  %v6157_v54 = vld [vmem:[#allocation7 + $0x144] sm:$0xf0]  ;;  %v6079_v56 = vld [vmem:[#allocation7 + $0x98] sm:$0xf] }
 0x16a   :  { %3114 = vmatpush.bf16.msra.mxu0 %v6076_v45  ;;  %v6025_v45 = vld [vmem:[#allocation7 + $0x3c] sm:$0xf0]  ;;  %v6359_v6 = vld [vmem:[#allocation7 + $0x2d0] sm:$0xf]  ;;  %v6227_v18 = vld [vmem:[#allocation7 + $0x1c8] sm:$0xf] }
 0x16b   :  { %2520 = vmatpush.bf16.msra.mxu2 %v5864_v4  ;;  %v6108_v4 = vor.u32 %v7273_v40, %v6107_v39  ;;  %v6172_v39 = vor.u32 %v7287_v33, %v6169_v29  ;;  %v6145_v11 = vld [vmem:[#allocation7 + $0x12c] sm:$0xf0]  ;;  %v6067_v14 = vld [vmem:[#allocation7 + $0x80] sm:$0xf]  ;;  %v7303_v19 = vld [vmem:[#allocation7 + $0x1d0] sm:$0xf0] }
 0x16c   :  { %2532 = vmatpush.bf16.msra.mxu3 %v5984_v1  ;;  %3074 = vmatpush.bf16.msrb.mxu1 %v6144_v7  ;;  %v6028_v1 = vor.u32 %v7251_v42, %v6025_v45  ;;  %v6095_v7 = vld [vmem:[#allocation7 + $0xc0] sm:$0xf]  ;;  %v6371_v42 = vld [vmem:[#allocation7 + $0x2e8] sm:$0xf]  ;;  %v7339_v45 = vld [vmem:[#allocation7 + $0x2f0] sm:$0xf0]  ;;  %v6228_v17 = vor.u32 %v7303_v19, %v6227_v18 }
 0x16d   :  { %v6215_v33 = vld [vmem:[#allocation7 + $0x1b0] sm:$0xf]  ;;  %v7300_v29 = vld [vmem:[#allocation7 + $0x1b8] sm:$0xf0] }
 0x16e   :  { %3115 = vmatpush.bf16.msra.mxu0 %v6064_v10  ;;  %2469 = vmatmul.bf16.vlgmr.msrb.gmra.mxu2 %v7991_v47  ;;  %v7270_v10 = vld [vmem:[#allocation7 + $0xc8] sm:$0xf0]  ;;  %v6187_v18 = vld [vmem:[#allocation7 + $0x170] sm:$0xf]  ;;  %v7292_v19 = vld [vmem:[#allocation7 + $0x178] sm:$0xf0] }
 0x16f   :  { %2521 = vmatpush.bf16.msra.mxu2 %v5852_v51  ;;  %v5936_v51 = vor.u32 %v7517_v62, %v5935_v60  ;;  %v6096_v26 = vor.u32 %v7270_v10, %v6095_v7  ;;  %v6372_v62 = vor.u32 %v7339_v45, %v6371_v42  ;;  %v7336_v7 = vld [vmem:[#allocation7 + $0x2d8] sm:$0xf0]  ;;  %v7281_v10 = vld [vmem:[#allocation7 + $0x124] sm:$0xf]  ;;  %v6323_v45 = vld [vmem:[#allocation7 + $0x288] sm:$0xf] }
 0x170   :  { %2533 = vmatpush.bf16.msra.mxu3 %v5972_v25  ;;  %3075 = vmatpush.bf16.msrb.mxu1 %v6132_v27  ;;  %v5923_v25 = vld [vmem:[#allocation7 + $0x560] sm:$0xf]  ;;  %v7514_v27 = vld [vmem:[#allocation7 + $0x568] sm:$0xf0]  ;;  %v6360_v16 = vor.u32 %v7336_v7, %v6359_v6 }
 0x171   :  { %v5924_v48 = vor.u32 %v7514_v27, %v5923_v25  ;;  %v6347_v25 = vld [vmem:[#allocation7 + $0x2b8] sm:$0xf] }
 0x172   :  { %3116 = vmatpush.bf16.msra.mxu0 %v6052_v28  ;;  %v6263_v28 = vld [vmem:[#allocation7 + $0x210] sm:$0xf]  ;;  %v6133_v27 = vld [vmem:[#allocation7 + $0x114] sm:$0xf0] }
 0x173   :  { %2522 = vmatpush.bf16.msra.mxu2 %v5840_v8  ;;  %v6091_v8 = vld [vmem:[#allocation7 + $0xb0] sm:$0xf]  ;;  %v6264_v43 = vor.u32 %v7312_v30, %v6263_v28  ;;  %v6055_v28 = vld [vmem:[#allocation7 + $0x68] sm:$0xf]  ;;  %v7259_v30 = vld [vmem:[#allocation7 + $0x70] sm:$0xf0] }
 0x174   :  { %2534 = vmatpush.bf16.msra.mxu3 %v5960_v58  ;;  %3076 = vmatpush.bf16.msrb.mxu1 %v6120_v35  ;;  %v5911_v58 = vld [vmem:[#allocation7 + $0x548] sm:$0xf]  ;;  %v7511_v35 = vld [vmem:[#allocation7 + $0x550] sm:$0xf0]  ;;  %v6092_v40 = vor.u32 %v7268_v63, %v6091_v8  ;;  %v6056_v63 = vor.u32 %v7259_v30, %v6055_v28  ;;  %v6188_v30 = vor.u32 %v7292_v19, %v6187_v18  ;;  %v7563_v18 = vld [vmem:[#allocation5 + $0x2ec] sm:$0xf0] }
 0x175   :  { %v5912_v61 = vor.u32 %v7511_v35, %v5911_v58  ;;  %v7330_v58 = vld [vmem:[#allocation7 + $0x2a8] sm:$0xf0]  ;;  %v7256_v35 = vld [vmem:[#allocation7 + $0x58] sm:$0xf0] }
 0x176   :  { %3117 = vmatpush.bf16.msra.mxu0 %v6040_v36  ;;  %v6251_v36 = vld [vmem:[#allocation7 + $0x1f8] sm:$0xf] }
 0x177   :  { %2483 = vmatmul.bf16.vlgmr.msrb.gmra.mxu3 %v7996_v41  ;;  %2523 = vmatpush.bf16.msra.mxu2 %v5828_v49  ;;  %v7284_v49 = vld [vmem:[#allocation7 + $0x13c] sm:$0xf]  ;;  %v6252_v60 = vor.u32 %v7309_v34, %v6251_v36  ;;  %v6203_v34 = vld [vmem:[#allocation7 + $0x198] sm:$0xf] }
 0x178   :  { %2535 = vmatpush.bf16.msra.mxu3 %v5948_v38  ;;  %3077 = vmatpush.bf16.msrb.mxu1 %v6108_v4  ;;  %v7265_v38 = vld [vmem:[#allocation7 + $0xa0] sm:$0xf0]  ;;  %v6239_v4 = vld [vmem:[#allocation7 + $0x1e0] sm:$0xf] }
 0x179   :  { %v6080_v2 = vor.u32 %v7265_v38, %v6079_v56  ;;  %v6109_v56 = vld [vmem:[#allocation7 + $0xe4] sm:$0xf0]  ;;  %v6031_v38 = vld [vmem:[#allocation7 + $0x38] sm:$0xf] }
 0x17a   :  { %3118 = vmatpush.bf16.msra.mxu0 %v6028_v1  ;;  %v7306_v1 = vld [vmem:[#allocation7 + $0x1e8] sm:$0xf0] }
 0x17b   :  { %2524 = vmatpush.bf16.msra.mxu2 %v5816_v15  ;;  %v7262_v15 = vld [vmem:[#allocation7 + $0x88] sm:$0xf0]  ;;  %v6240_v44 = vor.u32 %v7306_v1, %v6239_v4  ;;  %v6191_v4 = vld [vmem:[#allocation7 + $0x180] sm:$0xf] }
 0x17c   :  { %2536 = vmatpush.bf16.msra.mxu3 %v5936_v51  ;;  %3078 = vmatpush.bf16.msrb.mxu1 %v6096_v26  ;;  %v6148_v51 = vor.u32 %v7281_v10, %v6145_v11  ;;  %v7333_v26 = vld [vmem:[#allocation7 + $0x2c0] sm:$0xf0]  ;;  %v7294_v1 = vld [vmem:[#allocation7 + $0x188] sm:$0xf0]  ;;  %v7324_v10 = vld [vmem:[#allocation7 + $0x278] sm:$0xf0] }
 0x17d   :  { %v6348_v32 = vor.u32 %v7333_v26, %v6347_v25  ;;  %v7314_v11 = vld [vmem:[#allocation7 + $0x22c] sm:$0xf]  ;;  %v6192_v21 = vor.u32 %v7294_v1, %v6191_v4 }
 0x17e   :  { %3119 = vmatpush.bf16.msra.mxu0 %v6016_v9  ;;  %2525 = vmatmul.bf16.vlgmr.msra.gmra.mxu2 %v7991_v47  ;;  %v6160_v47 = vor.u32 %v7284_v49, %v6157_v54  ;;  %v7278_v9 = vld [vmem:[#allocation7 + $0x10c] sm:$0xf]  ;;  %v7327_v49 = vld [vmem:[#allocation7 + $0x290] sm:$0xf0]  ;;  %v7272_v54 = vld [vmem:[#allocation7 + $0xdc] sm:$0xf] }
 0x17f   :  { %3085 = vmatpush.bf16.msrb.mxu2 %v6276_v22  ;;  %3079 = vmatmul.bf16.vlgmr.msrb.gmra.mxu1 %v8010_v37  ;;  %v6068_v22 = vor.u32 %v7262_v15, %v6067_v14  ;;  %v6136_v8 = vor.u32 %v7278_v9, %v6133_v27  ;;  %v6112_v6 = vor.u32 %v7272_v54, %v6109_v56  ;;  %v6277_v14 = vld [vmem:[#allocation7 + $0x234] sm:$0xf0]  ;;  %v7269_v15 = vld [vmem:[#allocation7 + $0xc4] sm:$0xf] }
 0x180   :  { %3127 = vmatpush.bf16.msra.mxu1 %v6184_v24  ;;  %2537 = vmatpush.bf16.msra.mxu3 %v5924_v48  ;;  %v759_v24 = vadd.f32 %v7949_v46, %v177_v0  ;;  %v6335_v48 = vld [vmem:[#allocation7 + $0x2a0] sm:$0xf]  ;;  %v6216_v0 = vor.u32 %v7300_v29, %v6215_v33  ;;  %v6280_v25 = vor.u32 %v7314_v11, %v6277_v14  ;;  %v6299_v9 = vld [vmem:[#allocation7 + $0x258] sm:$0xf]  ;;  %v7321_v27 = vld [vmem:[#allocation7 + $0x260] sm:$0xf0] }
 0x181   :  { %v6336_v46 = vor.u32 %v7330_v58, %v6335_v48  ;;  %v7247_v33 = vld [vmem:[#allocation7 + $0x10] sm:$0xf0]  ;;  %v7289_v29 = vld [vmem:[#allocation7 + $0x160] sm:$0xf0]  ;;  %v6287_v58 = vld [vmem:[#allocation7 + $0x240] sm:$0xf] }
 0x182   :  { %3120 = vmatpush.bf16.msra.mxu0 %v6004_v23  ;;  %v6043_v23 = vld [vmem:[#allocation7 + $0x50] sm:$0xf]  ;;  %v773_v36 = vadd.f32 %v7954_v53, %v759_v24  ;;  %v7311_v24 = vld [vmem:[#allocation7 + $0x214] sm:$0xf]  ;;  %v7305_v54 = vld [vmem:[#allocation7 + $0x1e4] sm:$0xf] }
 0x183   :  { %3086 = vmatpush.bf16.msrb.mxu2 %v6264_v43  ;;  %v6121_v43 = vld [vmem:[#allocation7 + $0xfc] sm:$0xf0]  ;;  %v6044_v42 = vor.u32 %v7256_v35, %v6043_v23  ;;  %v6139_v11 = vld [vmem:[#allocation7 + $0x110] sm:$0xf]  ;;  %v7280_v14 = vld [vmem:[#allocation7 + $0x118] sm:$0xf0] }
 0x184   :  { %3128 = vmatpush.bf16.msra.mxu1 %v6172_v39  ;;  %2538 = vmatpush.bf16.msra.mxu3 %v5912_v61  ;;  %v7297_v39 = vld [vmem:[#allocation7 + $0x1a0] sm:$0xf0]  ;;  %v6140_v19 = vor.u32 %v7280_v14, %v6139_v11  ;;  %v7547_v14 = vld [vmem:[#allocation5 + $0x16c] sm:$0xf0] }
 0x185   :  { %3121 = vmatmul.bf16.vlgmr.msra.gmra.mxu0 %v7998_v59  ;;  %v7253_v61 = vld [vmem:[#allocation7 + $0x40] sm:$0xf0]  ;;  %v6204_v53 = vor.u32 %v7297_v39, %v6203_v34  ;;  %v6163_v34 = vld [vmem:[#allocation7 + $0x140] sm:$0xf]  ;;  %v7286_v39 = vld [vmem:[#allocation7 + $0x148] sm:$0xf0] }
 0x186   :  { %3169 = vmatpush.bf16.msrb.mxu0 %v6092_v40  ;;  %v6032_v7 = vor.u32 %v7253_v61, %v6031_v38  ;;  %v6164_v56 = vor.u32 %v7286_v39, %v6163_v34  ;;  %v6241_v38 = vld [vmem:[#allocation7 + $0x1ec] sm:$0xf0]  ;;  %v7335_v61 = vld [vmem:[#allocation7 + $0x2d4] sm:$0xf]  ;;  %v7316_v39 = vld [vmem:[#allocation7 + $0x238] sm:$0xf0] }
 0x187   :  { %3087 = vmatpush.bf16.msrb.mxu2 %v6252_v60  ;;  %2539 = vmatmul.bf16.vlgmr.msra.gmra.mxu3 %v7996_v41  ;;  %v7275_v41 = vld [vmem:[#allocation7 + $0xf4] sm:$0xf]  ;;  %v787_v60 = vadd.f32 %v7962_v3, %v773_v36  ;;  %v6097_v3 = vld [vmem:[#allocation7 + $0xcc] sm:$0xf0]  ;;  %v6253_v36 = vld [vmem:[#allocation7 + $0x204] sm:$0xf0]  ;;  %v6244_v1 = vor.u32 %v7305_v54, %v6241_v38 }
 0x188   :  { %3099 = vmatpush.bf16.msrb.mxu3 %v6372_v62  ;;  %3129 = vmatpush.bf16.msra.mxu1 %v6160_v47  ;;  %v6124_v40 = vor.u32 %v7275_v41, %v6121_v43  ;;  %v6324_v62 = vor.u32 %v7327_v49, %v6323_v45  ;;  %v6311_v47 = vld [vmem:[#allocation7 + $0x270] sm:$0xf]  ;;  %v6100_v26 = vor.u32 %v7269_v15, %v6097_v3  ;;  %v7318_v41 = vld [vmem:[#allocation7 + $0x248] sm:$0xf0]  ;;  %v7308_v43 = vld [vmem:[#allocation7 + $0x1fc] sm:$0xf] }
 0x189   :  { %v6256_v45 = vor.u32 %v7308_v43, %v6253_v36  ;;  %v6495_v15 = vld [vmem:[#allocation5 + $0x2c0] sm:$0xf]  ;;  %v7555_v43 = vld [vmem:[#allocation5 + $0x22c] sm:$0xf0] }
 0x18a   :  { %3170 = vmatpush.bf16.msrb.mxu0 %v6080_v2  ;;  %v801_v2 = vadd.f32 %v7960_v55, %v178_v50  ;;  %v837_v50 = vmax.f32 %v787_v60, 0.0  ;;  %v6361_v60 = vld [vmem:[#allocation7 + $0x2dc] sm:$0xf0]  ;;  %v7551_v38 = vld [vmem:[#allocation5 + $0x1cc] sm:$0xf0] }
 0x18b   :  { %3088 = vmatpush.bf16.msrb.mxu2 %v6240_v44  ;;  %v6019_v44 = vld [vmem:[#allocation7 + $0x20] sm:$0xf] }
 0x18c   :  { %3100 = vmatpush.bf16.msrb.mxu3 %v6360_v16  ;;  %3130 = vmatpush.bf16.msra.mxu1 %v6148_v51  ;;  %v7250_v16 = vld [vmem:[#allocation7 + $0x28] sm:$0xf0]  ;;  %v833_v51 = vmax.f32 %v7952_v52, 0.0  ;;  %v815_v55 = vadd.f32 %v7969_v13, %v801_v2  ;;  %v6175_v52 = vld [vmem:[#allocation7 + $0x158] sm:$0xf] }
 0x18d   :  { %v6020_v28 = vor.u32 %v7250_v16, %v6019_v44  ;;  %v6176_v35 = vor.u32 %v7289_v29, %v6175_v52  ;;  %v7299_v16 = vld [vmem:[#allocation7 + $0x1b4] sm:$0xf]  ;;  %v6115_v52 = vld [vmem:[#allocation7 + $0xe0] sm:$0xf]  ;;  %v7274_v29 = vld [vmem:[#allocation7 + $0xe8] sm:$0xf0] }
 0x18e   :  { %3171 = vmatpush.bf16.msrb.mxu0 %v6068_v22  ;;  %v6312_v22 = vor.u32 %v7324_v10, %v6311_v47  ;;  %v829_v13 = vadd.f32 %v7972_v31, %v815_v55  ;;  %v6288_v31 = vor.u32 %v7318_v41, %v6287_v58  ;;  %v7302_v47 = vld [vmem:[#allocation7 + $0x1cc] sm:$0xf]  ;;  %v6349_v10 = vld [vmem:[#allocation7 + $0x2c4] sm:$0xf0]  ;;  %v7277_v55 = vld [vmem:[#allocation7 + $0x100] sm:$0xf0] }
 0x18f   :  { %3089 = vmatpush.bf16.msrb.mxu2 %v6228_v17  ;;  %v6265_v17 = vld [vmem:[#allocation7 + $0x21c] sm:$0xf0]  ;;  %v7293_v58 = vld [vmem:[#allocation7 + $0x184] sm:$0xf]  ;;  %v6193_v41 = vld [vmem:[#allocation7 + $0x18c] sm:$0xf0] }
 0x190   :  { %3101 = vmatpush.bf16.msrb.mxu3 %v6348_v32  ;;  %3131 = vmatpush.bf16.msra.mxu1 %v6136_v8  ;;  %v6007_v32 = vld [vmem:[#allocation7 + $0x8] sm:$0xf]  ;;  %v6300_v8 = vor.u32 %v7321_v27, %v6299_v9  ;;  %v6268_v48 = vor.u32 %v7311_v24, %v6265_v17  ;;  %v7296_v9 = vld [vmem:[#allocation7 + $0x19c] sm:$0xf]  ;;  %v6479_v27 = vld [vmem:[#allocation5 + $0x260] sm:$0xf] }
 0x191   :  { %v6008_v23 = vor.u32 %v7247_v33, %v6007_v32  ;;  %v6205_v24 = vld [vmem:[#allocation7 + $0x1a4] sm:$0xf0]  ;;  %v7326_v17 = vld [vmem:[#allocation7 + $0x28c] sm:$0xf]  ;;  %v6325_v32 = vld [vmem:[#allocation7 + $0x294] sm:$0xf0] }
 0x192   :  { %3172 = vmatpush.bf16.msrb.mxu0 %v6056_v63  ;;  %v8026_v63 = vpack.c.bf16 %v837_v50, %v833_v51  ;;  %v6217_v51 = vld [vmem:[#allocation7 + $0x1bc] sm:$0xf0]  ;;  %v6127_v50 = vld [vmem:[#allocation7 + $0xf8] sm:$0xf] }
 0x193   :  { %3090 = vmatpush.bf16.msrb.mxu2 %v6216_v0  ;;  %v7338_v0 = vld [vmem:[#allocation7 + $0x2ec] sm:$0xf]  ;;  %v6313_v36 = vld [vmem:[#allocation7 + $0x27c] sm:$0xf0] }
 0x194   :  { %3102 = vmatpush.bf16.msrb.mxu3 %v6336_v46  ;;  %3132 = vmatpush.bf16.msra.mxu1 %v6124_v40  ;;  %v6373_v46 = vld [vmem:[#allocation7 + $0x2f4] sm:$0xf0]  ;;  %v834_v40 = vmax.f32 %v7958_v12, 0.0  ;;  %v6364_v12 = vor.u32 %v7335_v61, %v6361_v60 }
 0x195   :  { %v6376_v49 = vor.u32 %v7338_v0, %v6373_v46  ;;  %v6283_v0 = vld [vmem:[#allocation7 + $0x230] sm:$0xf] }
 0x196   :  { %3173 = vmatpush.bf16.msrb.mxu0 %v6044_v42  ;;  %v838_v42 = vmax.f32 %v829_v13, 0.0  ;;  %v6208_v13 = vor.u32 %v7296_v9, %v6205_v24  ;;  %v6284_v61 = vor.u32 %v7316_v39, %v6283_v0  ;;  %v7543_v9 = vld [vmem:[#allocation5 + $0x10c] sm:$0xf0]  ;;  %v7307_v24 = vld [vmem:[#allocation7 + $0x1f0] sm:$0xf0] }
 0x197   :  { %3091 = vmatpush.bf16.msrb.mxu2 %v6204_v53  ;;  %v6151_v53 = vld [vmem:[#allocation7 + $0x128] sm:$0xf]  ;;  %v7334_v0 = vld [vmem:[#allocation7 + $0x2c8] sm:$0xf0]  ;;  %v6559_v39 = vld [vmem:[#allocation5 + $0x440] sm:$0xf] }
 0x198   :  { %3103 = vmatpush.bf16.msrb.mxu3 %v6324_v62  ;;  %3133 = vmatpush.bf16.msra.mxu1 %v6112_v6  ;;  %v7283_v62 = vld [vmem:[#allocation7 + $0x130] sm:$0xf0]  ;;  %v8032_v4 = vpack.c.bf16 %v838_v42, %v834_v40  ;;  %v6229_v6 = vld [vmem:[#allocation7 + $0x1d4] sm:$0xf0]  ;;  %v6623_v42 = vld [vmem:[#allocation5 + $0x5c0] sm:$0xf] }
 0x199   :  { %v6152_v2 = vor.u32 %v7283_v62, %v6151_v53  ;;  %v6232_v3 = vor.u32 %v7302_v47, %v6229_v6  ;;  %v7271_v40 = vld [vmem:[#allocation7 + $0xd0] sm:$0xf0]  ;;  %v7320_v53 = vld [vmem:[#allocation7 + $0x25c] sm:$0xf]  ;;  %v6301_v62 = vld [vmem:[#allocation7 + $0x264] sm:$0xf0] }
 0x19a   :  { %3174 = vmatpush.bf16.msrb.mxu0 %v6032_v7  ;;  %v7332_v7 = vld [vmem:[#allocation7 + $0x2bc] sm:$0xf]  ;;  %v7313_v47 = vld [vmem:[#allocation7 + $0x220] sm:$0xf0]  ;;  %v6607_v6 = vld [vmem:[#allocation5 + $0x560] sm:$0xf]  ;;  %v6304_v11 = vor.u32 %v7320_v53, %v6301_v62 }
 0x19b   :  { %3092 = vmatpush.bf16.msrb.mxu2 %v6192_v21  ;;  %v6352_v44 = vor.u32 %v7332_v7, %v6349_v10  ;;  %v6337_v21 = vld [vmem:[#allocation7 + $0x2ac] sm:$0xf0]  ;;  %v6431_v10 = vld [vmem:[#allocation5 + $0x140] sm:$0xf]  ;;  %v7301_v62 = vld [vmem:[#allocation7 + $0x1c0] sm:$0xf0] }
 0x19c   :  { %3104 = vmatpush.bf16.msrb.mxu3 %v6312_v22  ;;  %3134 = vmatpush.bf16.msra.mxu1 %v6100_v26  ;;  %v6496_v22 = vor.u32 %v7563_v18, %v6495_v15  ;;  %v7591_v7 = vld [vmem:[#allocation5 + $0x58c] sm:$0xf0]  ;;  %v6432_v18 = vor.u32 %v7547_v14, %v6431_v10  ;;  %v6211_v14 = vld [vmem:[#allocation7 + $0x1a0] sm:$0xf] }
 0x19e   :  { %3175 = vmatpush.bf16.msrb.mxu0 %v6020_v28  ;;  %3093 = vmatmul.bf16.vlgmr.msrb.gmra.mxu2 %v8026_v63  ;;  %v7559_v28 = vld [vmem:[#allocation5 + $0x28c] sm:$0xf0] }
 0x19f   :  { %3141 = vmatpush.bf16.msra.mxu2 %v6280_v25  ;;  %3135 = vmatmul.bf16.vlgmr.msra.gmra.mxu1 %v8010_v37  ;;  %v6220_v25 = vor.u32 %v7299_v16, %v6217_v51  ;;  %v6480_v33 = vor.u32 %v7559_v28, %v6479_v27  ;;  %v6259_v16 = vld [vmem:[#allocation7 + $0x200] sm:$0xf]  ;;  %v6379_v51 = vld [vmem:[#allocation7 + $0x2f0] sm:$0xf] }
 0x1a0   :  { %3183 = vmatpush.bf16.msrb.mxu1 %v6188_v30  ;;  %3105 = vmatpush.bf16.msrb.mxu3 %v6300_v8  ;;  %v6128_v30 = vor.u32 %v7277_v55, %v6127_v50  ;;  %v6463_v8 = vld [vmem:[#allocation5 + $0x200] sm:$0xf]  ;;  %v7587_v50 = vld [vmem:[#allocation5 + $0x52c] sm:$0xf0] }
 0x1a1   :  { %v6464_v46 = vor.u32 %v7555_v43, %v6463_v8  ;;  %v6415_v55 = vld [vmem:[#allocation5 + $0xe0] sm:$0xf]  ;;  %v7583_v8 = vld [vmem:[#allocation5 + $0x4cc] sm:$0xf0] }
 0x1a2   :  { %3176 = vmatpush.bf16.msrb.mxu0 %v6008_v23  ;;  %v6116_v23 = vor.u32 %v7274_v29, %v6115_v52  ;;  %v8036_v34 = vpop.f32.mrf.mxu0  ;;  %v6575_v29 = vld [vmem:[#allocation5 + $0x4a0] sm:$0xf]  ;;  %v6235_v43 = vld [vmem:[#allocation7 + $0x1d0] sm:$0xf] }
 0x1a3   :  { %3142 = vmatpush.bf16.msra.mxu2 %v6268_v48  ;;  %v6328_v48 = vor.u32 %v7326_v17, %v6325_v32  ;;  %v6416_v17 = vor.u32 %v7543_v9, %v6415_v55  ;;  %v6367_v32 = vld [vmem:[#allocation7 + $0x2d8] sm:$0xf]  ;;  %v7295_v9 = vld [vmem:[#allocation7 + $0x190] sm:$0xf0] }
 0x1a4   :  { %3184 = vmatpush.bf16.msrb.mxu1 %v6176_v35  ;;  %3106 = vmatpush.bf16.msrb.mxu3 %v6288_v31  ;;  %v7323_v35 = vld [vmem:[#allocation7 + $0x274] sm:$0xf]  ;;  %v6103_v31 = vld [vmem:[#allocation7 + $0xc8] sm:$0xf] }
 0x1a5   :  { %3177 = vmatmul.bf16.vlgmr.msrb.gmra.mxu0 %v7998_v59  ;;  %v7329_v59 = vld [vmem:[#allocation7 + $0x2a4] sm:$0xf]  ;;  %v6316_v54 = vor.u32 %v7323_v35, %v6313_v36  ;;  %v6104_v60 = vor.u32 %v7271_v40, %v6103_v31  ;;  %v6355_v36 = vld [vmem:[#allocation7 + $0x2c0] sm:$0xf]  ;;  %v7579_v40 = vld [vmem:[#allocation5 + $0x46c] sm:$0xf0] }
 0x1a6   :  { %3811 = vmatpush.bf16.msra.mxu0 %v6496_v22  ;;  %v6340_v26 = vor.u32 %v7329_v59, %v6337_v21  ;;  %v7340_v59 = vld [vmem:[#allocation7 + $0x2f8] sm:$0xf0]  ;;  %v6608_v21 = vor.u32 %v7591_v7, %v6607_v6  ;;  %v6591_v22 = vld [vmem:[#allocation5 + $0x500] sm:$0xf]  ;;  %v7575_v6 = vld [vmem:[#allocation5 + $0x40c] sm:$0xf0] }
 0x1a7   :  { %3143 = vmatpush.bf16.msra.mxu2 %v6256_v45  ;;  %3107 = vmatmul.bf16.vlgmr.msrb.gmra.mxu3 %v8032_v4  ;;  %v7595_v45 = vld [vmem:[#allocation5 + $0x5ec] sm:$0xf0]  ;;  %v6380_v28 = vor.u32 %v7340_v59, %v6379_v51  ;;  %v6592_v52 = vor.u32 %v7587_v50, %v6591_v22  ;;  %v7589_v7 = vld [vmem:[#allocation5 + $0x564] sm:$0xf]  ;;  %v6199_v50 = vld [vmem:[#allocation7 + $0x188] sm:$0xf] }
 0x1a8   :  { %3155 = vmatpush.bf16.msra.mxu3 %v6376_v49  ;;  %3185 = vmatpush.bf16.msrb.mxu1 %v6164_v56  ;;  %v6196_v49 = vor.u32 %v7293_v58, %v6193_v41  ;;  %v6447_v56 = vld [vmem:[#allocation5 + $0x1a0] sm:$0xf]  ;;  %v7571_v22 = vld [vmem:[#allocation5 + $0x3ac] sm:$0xf0] }
 0x1aa   :  { %3812 = vmatpush.bf16.msra.mxu0 %v6480_v33  ;;  %v7337_v33 = vld [vmem:[#allocation7 + $0x2e0] sm:$0xf0] }
 0x1ab   :  { %3144 = vmatpush.bf16.msra.mxu2 %v6244_v1  ;;  %v6448_v1 = vor.u32 %v7551_v38, %v6447_v56  ;;  %v6368_v41 = vor.u32 %v7337_v33, %v6367_v32  ;;  %v6356_v56 = vor.u32 %v7334_v0, %v6355_v36  ;;  %v6223_v38 = vld [vmem:[#allocation7 + $0x1b8] sm:$0xf]  ;;  %v6307_v36 = vld [vmem:[#allocation7 + $0x260] sm:$0xf]  ;;  %v7322_v0 = vld [vmem:[#allocation7 + $0x268] sm:$0xf0] }
 0x1ac   :  { %3156 = vmatpush.bf16.msra.mxu3 %v6364_v12  ;;  %3186 = vmatpush.bf16.msrb.mxu1 %v6152_v2  ;;  %v6271_v12 = vld [vmem:[#allocation7 + $0x218] sm:$0xf]  ;;  %v6624_v2 = vor.u32 %v7595_v45, %v6623_v42  ;;  %v6383_v42 = vld [vmem:[#allocation5 + $0x20] sm:$0xf]  ;;  %v7535_v45 = vld [vmem:[#allocation5 + $0x4c] sm:$0xf0]  ;;  %v6224_v10 = vor.u32 %v7301_v62, %v6223_v38 }
 0x1ad   :  { %v6272_v15 = vor.u32 %v7313_v47, %v6271_v12  ;;  %v7331_v12 = vld [vmem:[#allocation7 + $0x2b0] sm:$0xf0]  ;;  %v7577_v38 = vld [vmem:[#allocation5 + $0x444] sm:$0xf] }
 0x1ae   :  { %3813 = vmatpush.bf16.msra.mxu0 %v6464_v46  ;;  %v6576_v46 = vor.u32 %v7583_v8, %v6575_v29  ;;  %v7567_v29 = vld [vmem:[#allocation5 + $0x34c] sm:$0xf0]  ;;  %v6561_v62 = vld [vmem:[#allocation5 + $0x470] sm:$0xf0] }
 0x1af   :  { %3145 = vmatpush.bf16.msra.mxu2 %v6232_v3  ;;  %v7317_v3 = vld [vmem:[#allocation7 + $0x244] sm:$0xf] }
 0x1b0   :  { %3157 = vmatpush.bf16.msra.mxu3 %v6352_v44  ;;  %3187 = vmatpush.bf16.msrb.mxu1 %v6140_v19  ;;  %v6289_v44 = vld [vmem:[#allocation7 + $0x24c] sm:$0xf0]  ;;  %v7310_v19 = vld [vmem:[#allocation7 + $0x208] sm:$0xf0] }
 0x1b1   :  { %v6260_v27 = vor.u32 %v7310_v19, %v6259_v16  ;;  %v6331_v16 = vld [vmem:[#allocation7 + $0x290] sm:$0xf] }
 0x1b2   :  { %3814 = vmatpush.bf16.msra.mxu0 %v6448_v1  ;;  %v6343_v1 = vld [vmem:[#allocation7 + $0x2a8] sm:$0xf] }
 0x1b3   :  { %3146 = vmatpush.bf16.msra.mxu2 %v6220_v25  ;;  %v8039_v25 = vpop.f32.mrf.mxu0 }
 0x1b4   :  { %3158 = vmatpush.bf16.msra.mxu3 %v6340_v26  ;;  %3188 = vmatpush.bf16.msrb.mxu1 %v6128_v30  ;;  %v6292_v26 = vor.u32 %v7317_v3, %v6289_v44  ;;  %v6247_v30 = vld [vmem:[#allocation7 + $0x1e8] sm:$0xf]  ;;  %v7298_v44 = vld [vmem:[#allocation7 + $0x1a8] sm:$0xf0] }
 0x1b5   :  { %v6212_v55 = vor.u32 %v7298_v44, %v6211_v14  ;;  %v7573_v14 = vld [vmem:[#allocation5 + $0x3e4] sm:$0xf] }
 0x1b6   :  { %3815 = vmatpush.bf16.msra.mxu0 %v6432_v18  ;;  %v7328_v18 = vld [vmem:[#allocation7 + $0x298] sm:$0xf0] }
 0x1b7   :  { %3147 = vmatpush.bf16.msra.mxu2 %v6208_v13  ;;  %v6399_v13 = vld [vmem:[#allocation5 + $0x80] sm:$0xf] }
 0x1b8   :  { %3159 = vmatpush.bf16.msra.mxu3 %v6328_v48  ;;  %3189 = vmatpush.bf16.msrb.mxu1 %v6116_v23  ;;  %v7539_v48 = vld [vmem:[#allocation5 + $0xac] sm:$0xf0]  ;;  %v7304_v23 = vld [vmem:[#allocation7 + $0x1d8] sm:$0xf0] }
 0x1b9   :  { %v6400_v58 = vor.u32 %v7539_v48, %v6399_v13  ;;  %v7625_v13 = vld [vmem:[#allocation5 + $0x8c4] sm:$0xf]  ;;  %v6753_v48 = vld [vmem:[#allocation5 + $0x8f0] sm:$0xf0] }
 0x1ba   :  { %3816 = vmatpush.bf16.msra.mxu0 %v6416_v17  ;;  %v6751_v17 = vld [vmem:[#allocation5 + $0x8c0] sm:$0xf] }
 0x1bb   :  { %3148 = vmatpush.bf16.msra.mxu2 %v6196_v49  ;;  %v6384_v49 = vor.u32 %v7535_v45, %v6383_v42  ;;  %v8046_v53 = vpop.f32.mrf.mxu0  ;;  %v6735_v42 = vld [vmem:[#allocation5 + $0x860] sm:$0xf]  ;;  %v7623_v45 = vld [vmem:[#allocation5 + $0x88c] sm:$0xf0] }
 0x1bc   :  { %3160 = vmatpush.bf16.msra.mxu3 %v6316_v54  ;;  %3190 = vmatpush.bf16.msrb.mxu1 %v6104_v60  ;;  %v2400_v35 = vpop.f32.mrf.mxu1  ;;  %v6236_v54 = vor.u32 %v7304_v23, %v6235_v43  ;;  %v6625_v60 = vld [vmem:[#allocation5 + $0x5f0] sm:$0xf0] }
 0x1bd   :  { %v8044_v31 = vadd.f32 %v2400_v35, %v8036_v34  ;;  %v6560_v34 = vor.u32 %v7579_v40, %v6559_v39  ;;  %v6577_v43 = vld [vmem:[#allocation5 + $0x4d0] sm:$0xf0] }
 0x1be   :  { %3149 = vmatmul.bf16.vlgmr.msra.gmra.mxu2 %v8026_v63  ;;  %3817 = vmatpush.bf16.msra.mxu0 %v6400_v58  ;;  %v7581_v58 = vld [vmem:[#allocation5 + $0x4a4] sm:$0xf] }
 0x1bf   :  { %3197 = vmatpush.bf16.msrb.mxu2 %v6284_v61  ;;  %3191 = vmatmul.bf16.vlgmr.msrb.gmra.mxu1 %v8010_v37  ;;  %v6248_v37 = vor.u32 %v7307_v24, %v6247_v30  ;;  %v7593_v61 = vld [vmem:[#allocation5 + $0x5c4] sm:$0xf]  ;;  %v6319_v30 = vld [vmem:[#allocation7 + $0x278] sm:$0xf]  ;;  %v6580_v39 = vor.u32 %v7581_v58, %v6577_v43 }
 0x1c0   :  { %3825 = vmatpush.bf16.msra.mxu1 %v6624_v2  ;;  %3161 = vmatpush.bf16.msra.mxu3 %v6304_v11  ;;  %v6628_v47 = vor.u32 %v7593_v61, %v6625_v60  ;;  %v6543_v2 = vld [vmem:[#allocation5 + $0x3e0] sm:$0xf]  ;;  %v6344_v11 = vor.u32 %v7331_v12, %v6343_v1  ;;  %v7325_v24 = vld [vmem:[#allocation7 + $0x280] sm:$0xf0]  ;;  %v6308_v61 = vor.u32 %v7322_v0, %v6307_v36  ;;  %v6295_v60 = vld [vmem:[#allocation7 + $0x248] sm:$0xf] }
 0x1c1   :  { %v6544_v19 = vor.u32 %v7575_v6, %v6543_v2  ;;  %v6736_v1 = vor.u32 %v7623_v45, %v6735_v42  ;;  %v7319_v12 = vld [vmem:[#allocation7 + $0x250] sm:$0xf0]  ;;  %v7561_v2 = vld [vmem:[#allocation5 + $0x2c4] sm:$0xf]  ;;  %v6671_v36 = vld [vmem:[#allocation5 + $0x6e0] sm:$0xf] }
 0x1c2   :  { %3818 = vmatpush.bf16.msra.mxu0 %v6384_v49  ;;  %v6756_v49 = vor.u32 %v7625_v13, %v6753_v48  ;;  %v6497_v6 = vld [vmem:[#allocation5 + $0x2f0] sm:$0xf0]  ;;  %v7609_v13 = vld [vmem:[#allocation5 + $0x744] sm:$0xf]  ;;  %v6759_v0 = vld [vmem:[#allocation5 + $0x8c8] sm:$0xf] }
 0x1c3   :  { %3198 = vmatpush.bf16.msrb.mxu2 %v6272_v15  ;;  %v6609_v15 = vld [vmem:[#allocation5 + $0x590] sm:$0xf0]  ;;  %v2444_v8 = vpop.f32.mrf.mxu0  ;;  %v7565_v58 = vld [vmem:[#allocation5 + $0x324] sm:$0xf]  ;;  %v7607_v45 = vld [vmem:[#allocation5 + $0x70c] sm:$0xf0] }
 0x1c4   :  { %3826 = vmatpush.bf16.msra.mxu1 %v6608_v21  ;;  %3162 = vmatpush.bf16.msra.mxu3 %v6292_v26  ;;  %v2402_v3 = vpop.f32.mrf.mxu1  ;;  %v6612_v51 = vor.u32 %v7589_v7, %v6609_v15  ;;  %v6527_v21 = vld [vmem:[#allocation5 + $0x380] sm:$0xf]  ;;  %v6332_v26 = vor.u32 %v7328_v18, %v6331_v16  ;;  %v6545_v15 = vld [vmem:[#allocation5 + $0x410] sm:$0xf0] }
 0x1c5   :  { %3819 = vmatmul.bf16.vlgmr.msra.gmra.mxu0 %v7889_v57  ;;  %v8050_v59 = vadd.f32 %v2402_v3, %v8039_v25  ;;  %v6528_v32 = vor.u32 %v7571_v22, %v6527_v21  ;;  %v6511_v25 = vld [vmem:[#allocation5 + $0x320] sm:$0xf]  ;;  %v6296_v3 = vor.u32 %v7319_v12, %v6295_v60  ;;  %v6548_v44 = vor.u32 %v7573_v14, %v6545_v15  ;;  %v7615_v22 = vld [vmem:[#allocation5 + $0x7cc] sm:$0xf0]  ;;  %v6689_v48 = vld [vmem:[#allocation5 + $0x770] sm:$0xf0] }
 0x1c6   :  { %3867 = vmatpush.bf16.msrb.mxu0 %v6628_v47  ;;  %v7619_v47 = vld [vmem:[#allocation5 + $0x82c] sm:$0xf0]  ;;  %v6703_v21 = vld [vmem:[#allocation5 + $0x7a0] sm:$0xf]  ;;  %v7605_v60 = vld [vmem:[#allocation5 + $0x6e4] sm:$0xf] }
 0x1c7   :  { %3199 = vmatpush.bf16.msrb.mxu2 %v6260_v27  ;;  %3163 = vmatmul.bf16.vlgmr.msra.gmra.mxu3 %v8032_v4  ;;  %v7585_v27 = vld [vmem:[#allocation5 + $0x504] sm:$0xf]  ;;  %v6657_v14 = vld [vmem:[#allocation5 + $0x6b0] sm:$0xf0]  ;;  %v6727_v15 = vld [vmem:[#allocation5 + $0x808] sm:$0xf] }
 0x1c8   :  { %3211 = vmatpush.bf16.msrb.mxu3 %v6380_v28  ;;  %3827 = vmatpush.bf16.msra.mxu1 %v6592_v52  ;;  %v6593_v28 = vld [vmem:[#allocation5 + $0x530] sm:$0xf0]  ;;  %v7627_v52 = vld [vmem:[#allocation5 + $0x8ec] sm:$0xf0] }
 0x1c9   :  { %v6596_v33 = vor.u32 %v7585_v27, %v6593_v28  ;;  %v6752_v35 = vor.u32 %v7627_v52, %v6751_v17  ;;  %v6705_v27 = vld [vmem:[#allocation5 + $0x7d0] sm:$0xf0]  ;;  %v7569_v28 = vld [vmem:[#allocation5 + $0x384] sm:$0xf]  ;;  %v6704_v17 = vor.u32 %v7615_v22, %v6703_v21  ;;  %v7611_v52 = vld [vmem:[#allocation5 + $0x76c] sm:$0xf0] }
 0x1ca   :  { %3868 = vmatpush.bf16.msrb.mxu0 %v6612_v51  ;;  %v6500_v51 = vor.u32 %v7561_v2, %v6497_v6  ;;  %v7603_v2 = vld [vmem:[#allocation5 + $0x6ac] sm:$0xf0]  ;;  %v7545_v6 = vld [vmem:[#allocation5 + $0x144] sm:$0xf] }
 0x1cb   :  { %3200 = vmatpush.bf16.msrb.mxu2 %v6248_v37  ;;  %v6200_v37 = vor.u32 %v7295_v9, %v6199_v50  ;;  %v2498_v16 = vpop.f32.mrf.mxu0  ;;  %v7613_v9 = vld [vmem:[#allocation5 + $0x7a4] sm:$0xf] }
 0x1cc   :  { %3212 = vmatpush.bf16.msrb.mxu3 %v6368_v41  ;;  %3828 = vmatpush.bf16.msra.mxu1 %v6576_v46  ;;  %v6320_v41 = vor.u32 %v7325_v24, %v6319_v30  ;;  %v2456_v23 = vpop.f32.mrf.mxu1  ;;  %v6512_v46 = vor.u32 %v7567_v29, %v6511_v25  ;;  %v6529_v30 = vld [vmem:[#allocation5 + $0x3b0] sm:$0xf0]  ;;  %v7553_v25 = vld [vmem:[#allocation5 + $0x204] sm:$0xf] }
 0x1cd   :  { %v8053_v40 = vadd.f32 %v2456_v23, %v8046_v53  ;;  %v6564_v53 = vor.u32 %v7577_v38, %v6561_v62  ;;  %v6532_v24 = vor.u32 %v7569_v28, %v6529_v30  ;;  %v6465_v29 = vld [vmem:[#allocation5 + $0x230] sm:$0xf0] }
 0x1ce   :  { %3869 = vmatpush.bf16.msrb.mxu0 %v6596_v33  ;;  %v6687_v33 = vld [vmem:[#allocation5 + $0x740] sm:$0xf]  ;;  %v6673_v62 = vld [vmem:[#allocation5 + $0x710] sm:$0xf0] }
 0x1cf   :  { %3201 = vmatpush.bf16.msrb.mxu2 %v6236_v54  ;;  %v7621_v54 = vld [vmem:[#allocation5 + $0x864] sm:$0xf]  ;;  %v6688_v23 = vor.u32 %v7611_v52, %v6687_v33  ;;  %v6641_v33 = vld [vmem:[#allocation5 + $0x650] sm:$0xf0] }
 0x1d0   :  { %3213 = vmatpush.bf16.msrb.mxu3 %v6356_v56  ;;  %3829 = vmatpush.bf16.msra.mxu1 %v6560_v34  ;;  %v6737_v56 = vld [vmem:[#allocation5 + $0x890] sm:$0xf0]  ;;  %v6719_v34 = vld [vmem:[#allocation5 + $0x800] sm:$0xf] }
 0x1d1   :  { %v6740_v7 = vor.u32 %v7621_v54, %v6737_v56  ;;  %v6449_v54 = vld [vmem:[#allocation5 + $0x1d0] sm:$0xf0] }
 0x1d2   :  { %3870 = vmatpush.bf16.msrb.mxu0 %v6580_v39 }
 0x1d3   :  { %3202 = vmatpush.bf16.msrb.mxu2 %v6224_v10  ;;  %v7617_v10 = vld [vmem:[#allocation5 + $0x804] sm:$0xf]  ;;  %v2500_v38 = vpop.f32.mrf.mxu0 }
 0x1d4   :  { %3214 = vmatpush.bf16.msrb.mxu3 %v6344_v11  ;;  %3830 = vmatpush.bf16.msra.mxu1 %v6544_v19  ;;  %v6721_v11 = vld [vmem:[#allocation5 + $0x830] sm:$0xf0]  ;;  %v2458_v18 = vpop.f32.mrf.mxu1  ;;  %v6720_v19 = vor.u32 %v7619_v47, %v6719_v34  ;;  %v6655_v34 = vld [vmem:[#allocation5 + $0x680] sm:$0xf]  ;;  %v6743_v47 = vld [vmem:[#allocation5 + $0x868] sm:$0xf] }
 0x1d5   :  { %v8057_v50 = vadd.f32 %v2458_v18, %v2444_v8  ;;  %v6708_v8 = vor.u32 %v7613_v9, %v6705_v27  ;;  %v6639_v18 = vld [vmem:[#allocation5 + $0x620] sm:$0xf] }
 0x1d6   :  { %3871 = vmatpush.bf16.msrb.mxu0 %v6564_v53  ;;  %v7624_v53 = vld [vmem:[#allocation5 + $0x894] sm:$0xf0] }
 0x1d7   :  { %3203 = vmatpush.bf16.msrb.mxu2 %v6212_v55  ;;  %v7557_v55 = vld [vmem:[#allocation5 + $0x264] sm:$0xf] }
 0x1d8   :  { %3215 = vmatpush.bf16.msrb.mxu3 %v6332_v26  ;;  %3831 = vmatpush.bf16.msra.mxu1 %v6528_v32  ;;  %v6724_v26 = vor.u32 %v7617_v10, %v6721_v11  ;;  %v6676_v10 = vor.u32 %v7605_v60, %v6673_v62  ;;  %v6744_v11 = vor.u32 %v7624_v53, %v6743_v47  ;;  %v6471_v60 = vld [vmem:[#allocation5 + $0x208] sm:$0xf]  ;;  %v7556_v62 = vld [vmem:[#allocation5 + $0x234] sm:$0xf0]  ;;  %v7558_v53 = vld [vmem:[#allocation5 + $0x26c] sm:$0xf] }
 0x1d9   :  { %v7596_v47 = vld [vmem:[#allocation5 + $0x5f4] sm:$0xf0] }
 0x1da   :  { %3872 = vmatpush.bf16.msrb.mxu0 %v6548_v44  ;;  %v6656_v44 = vor.u32 %v7603_v2, %v6655_v34  ;;  %v6489_v2 = vld [vmem:[#allocation5 + $0x298] sm:$0xf0] }
 0x1db   :  { %3204 = vmatpush.bf16.msrb.mxu2 %v6200_v37  ;;  %v6513_v37 = vld [vmem:[#allocation5 + $0x350] sm:$0xf0] }
 0x1dc   :  { %3216 = vmatpush.bf16.msrb.mxu3 %v6320_v41  ;;  %3832 = vmatpush.bf16.msra.mxu1 %v6512_v46  ;;  %v6516_v41 = vor.u32 %v7565_v58, %v6513_v37  ;;  %v2512_v43 = vpop.f32.mrf.mxu1  ;;  %v7628_v46 = vld [vmem:[#allocation5 + $0x8f4] sm:$0xf0]  ;;  %v7537_v58 = vld [vmem:[#allocation5 + $0x84] sm:$0xf]  ;;  %v6401_v37 = vld [vmem:[#allocation5 + $0xb0] sm:$0xf0] }
 0x1dd   :  { %v8060_v39 = vadd.f32 %v2512_v43, %v2498_v16  ;;  %v6760_v56 = vor.u32 %v7628_v46, %v6759_v0  ;;  %v6505_v0 = vld [vmem:[#allocation5 + $0x2f8] sm:$0xf0] }
 0x1de   :  { %3205 = vmatmul.bf16.vlgmr.msrb.gmra.mxu2 %v8026_v63  ;;  %v6481_v63 = vld [vmem:[#allocation5 + $0x290] sm:$0xf0]  ;;  %3873 = vmatpush.bf16.msrb.mxu0 %v6532_v24 }
 0x1df   :  { %3839 = vmatpush.bf16.msra.mxu2 %v6752_v35  ;;  %3833 = vmatmul.bf16.vlgmr.msra.gmra.mxu1 %v7892_v5  ;;  %v6484_v32 = vor.u32 %v7557_v55, %v6481_v63  ;;  %v6468_v35 = vor.u32 %v7553_v25, %v6465_v29  ;;  %v7541_v55 = vld [vmem:[#allocation5 + $0xe4] sm:$0xf]  ;;  %v6417_v63 = vld [vmem:[#allocation5 + $0x110] sm:$0xf0] }
 0x1e0   :  { %3881 = vmatpush.bf16.msrb.mxu1 %v6756_v49  ;;  %3217 = vmatpush.bf16.msrb.mxu3 %v6308_v61  ;;  %v7549_v49 = vld [vmem:[#allocation5 + $0x1a4] sm:$0xf]  ;;  %v6420_v29 = vor.u32 %v7541_v55, %v6417_v63  ;;  %v6473_v55 = vld [vmem:[#allocation5 + $0x238] sm:$0xf0] }
 0x1e1   :  { %v2414_v42 = vpop.f32.mrf.mxu2  ;;  %v6452_v12 = vor.u32 %v7549_v49, %v6449_v54  ;;  %v6404_v49 = vor.u32 %v7537_v58, %v6401_v37  ;;  %v7533_v54 = vld [vmem:[#allocation5 + $0x24] sm:$0xf]  ;;  %v6647_v37 = vld [vmem:[#allocation5 + $0x628] sm:$0xf] }
 0x1e2   :  { %v2415_v61 = vadd.f32 %v2414_v42, %v8044_v31  ;;  %3874 = vmatpush.bf16.msrb.mxu0 %v6516_v41  ;;  %v7601_v31 = vld [vmem:[#allocation5 + $0x684] sm:$0xf]  ;;  %v3066_v28 = vpop.f32.mrf.mxu0  ;;  %v6487_v41 = vld [vmem:[#allocation5 + $0x268] sm:$0xf] }
 0x1e3   :  { %3840 = vmatpush.bf16.msra.mxu2 %v6736_v1  ;;  %v6672_v1 = vor.u32 %v7607_v45, %v6671_v36  ;;  %v6660_v9 = vor.u32 %v7601_v31, %v6657_v14  ;;  %v7562_v36 = vld [vmem:[#allocation5 + $0x2cc] sm:$0xf]  ;;  %v6695_v42 = vld [vmem:[#allocation5 + $0x748] sm:$0xf]  ;;  %v7612_v45 = vld [vmem:[#allocation5 + $0x774] sm:$0xf0] }
 0x1e4   :  { %3882 = vmatpush.bf16.msrb.mxu1 %v6740_v7  ;;  %3218 = vmatpush.bf16.msrb.mxu3 %v6296_v3  ;;  %v6433_v7 = vld [vmem:[#allocation5 + $0x170] sm:$0xf0]  ;;  %v2514_v3 = vpop.f32.mrf.mxu1  ;;  %v6508_v46 = vor.u32 %v7562_v36, %v6505_v0  ;;  %v7608_v14 = vld [vmem:[#allocation5 + $0x714] sm:$0xf0]  ;;  %v6423_v0 = vld [vmem:[#allocation5 + $0xe8] sm:$0xf] }
 0x1e5   :  { %3875 = vmatmul.bf16.vlgmr.msrb.gmra.mxu0 %v7892_v5  ;;  %v6436_v16 = vor.u32 %v7545_v6, %v6433_v7  ;;  %v8064_v21 = vadd.f32 %v2514_v3, %v2500_v38  ;;  %v6492_v7 = vor.u32 %v7558_v53, %v6489_v2  ;;  %v7580_v53 = vld [vmem:[#allocation5 + $0x474] sm:$0xf0]  ;;  %v7542_v2 = vld [vmem:[#allocation5 + $0xec] sm:$0xf] }
 0x1e6   :  { %3923 = vmatpush.bf16.msra.mxu0 %v6760_v56  ;;  %v6696_v56 = vor.u32 %v7612_v45, %v6695_v42  ;;  %v7584_v45 = vld [vmem:[#allocation5 + $0x4d4] sm:$0xf0] }
 0x1e7   :  { %3841 = vmatpush.bf16.msra.mxu2 %v6720_v19  ;;  %3219 = vmatmul.bf16.vlgmr.msrb.gmra.mxu3 %v8032_v4  ;;  %v6692_v4 = vor.u32 %v7609_v13, %v6689_v48  ;;  %v7599_v19 = vld [vmem:[#allocation5 + $0x64c] sm:$0xf0]  ;;  %v7616_v13 = vld [vmem:[#allocation5 + $0x7d4] sm:$0xf0] }
 0x1e8   :  { %3853 = vmatpush.bf16.msra.mxu3 %v6500_v51  ;;  %3883 = vmatpush.bf16.msrb.mxu1 %v6724_v26  ;;  %v7620_v51 = vld [vmem:[#allocation5 + $0x834] sm:$0xf0]  ;;  %v6503_v26 = vld [vmem:[#allocation5 + $0x2c8] sm:$0xf]  ;;  %v6640_v25 = vor.u32 %v7599_v19, %v6639_v18 }
 0x1e9   :  { %v2416_v22 = vpop.f32.mrf.mxu2  ;;  %v6728_v27 = vor.u32 %v7620_v51, %v6727_v15  ;;  %v6472_v15 = vor.u32 %v7556_v62, %v6471_v60  ;;  %v7592_v51 = vld [vmem:[#allocation5 + $0x594] sm:$0xf0]  ;;  %v6407_v62 = vld [vmem:[#allocation5 + $0x88] sm:$0xf] }
 0x1ea   :  { %3924 = vmatpush.bf16.msra.mxu0 %v6744_v11  ;;  %v2417_v30 = vadd.f32 %v2416_v22, %v8050_v59  ;;  %v2428_v24 = vpop.f32.mrf.mxu3  ;;  %v3068_v11 = vpop.f32.mrf.mxu0  ;;  %v7554_v22 = vld [vmem:[#allocation5 + $0x20c] sm:$0xf] }
 0x1eb   :  { %3842 = vmatpush.bf16.msra.mxu2 %v6704_v17  ;;  %v7564_v17 = vld [vmem:[#allocation5 + $0x2f4] sm:$0xf0]  ;;  %v2429_v52 = vadd.f32 %v2428_v24, %v2415_v61  ;;  %v6476_v63 = vor.u32 %v7554_v22, %v6473_v55  ;;  %v6633_v22 = vld [vmem:[#allocation5 + $0x5f8] sm:$0xf0] }
 0x1ec   :  { %3854 = vmatpush.bf16.msra.mxu3 %v6484_v32  ;;  %3884 = vmatpush.bf16.msrb.mxu1 %v6708_v8  ;;  %v7597_v32 = vld [vmem:[#allocation5 + $0x624] sm:$0xf]  ;;  %v6711_v8 = vld [vmem:[#allocation5 + $0x7a8] sm:$0xf]  ;;  %v6504_v48 = vor.u32 %v7564_v17, %v6503_v26 }
 0x1ed   :  { %v8067_v43 = vadd.f32 %v3066_v28, %v2429_v52  ;;  %v6644_v59 = vor.u32 %v7597_v32, %v6641_v33  ;;  %v6663_v26 = vld [vmem:[#allocation5 + $0x688] sm:$0xf]  ;;  %v7548_v32 = vld [vmem:[#allocation5 + $0x174] sm:$0xf0] }
 0x1ee   :  { %3925 = vmatpush.bf16.msra.mxu0 %v6728_v27  ;;  %v6439_v17 = vld [vmem:[#allocation5 + $0x148] sm:$0xf] }
 0x1ef   :  { %3843 = vmatpush.bf16.msra.mxu2 %v6688_v23  ;;  %v6712_v23 = vor.u32 %v7616_v13, %v6711_v8  ;;  %v6599_v33 = vld [vmem:[#allocation5 + $0x508] sm:$0xf]  ;;  %v7550_v8 = vld [vmem:[#allocation5 + $0x1ac] sm:$0xf]  ;;  %v6457_v13 = vld [vmem:[#allocation5 + $0x1d8] sm:$0xf0] }
 0x1f0   :  { %3855 = vmatpush.bf16.msra.mxu3 %v6468_v35  ;;  %3885 = vmatpush.bf16.msrb.mxu1 %v6692_v4  ;;  %v7560_v35 = vld [vmem:[#allocation5 + $0x294] sm:$0xf0]  ;;  %v6385_v4 = vld [vmem:[#allocation5 + $0x50] sm:$0xf0]  ;;  %v6460_v58 = vor.u32 %v7550_v8, %v6457_v13  ;;  %v6617_v8 = vld [vmem:[#allocation5 + $0x598] sm:$0xf0] }
 0x1f1   :  { %v2470_v38 = vpop.f32.mrf.mxu2  ;;  %v6488_v61 = vor.u32 %v7560_v35, %v6487_v41  ;;  %v6388_v31 = vor.u32 %v7533_v54, %v6385_v4  ;;  %v7600_v41 = vld [vmem:[#allocation5 + $0x654] sm:$0xf0]  ;;  %v6440_v35 = vor.u32 %v7548_v32, %v6439_v17  ;;  %v6441_v54 = vld [vmem:[#allocation5 + $0x178] sm:$0xf0] }
 0x1f2   :  { %3926 = vmatpush.bf16.msra.mxu0 %v6712_v23  ;;  %v2471_v34 = vadd.f32 %v2470_v38, %v8053_v40  ;;  %v6455_v40 = vld [vmem:[#allocation5 + $0x1a8] sm:$0xf]  ;;  %v7572_v32 = vld [vmem:[#allocation5 + $0x3b4] sm:$0xf0] }
 0x1f3   :  { %3844 = vmatpush.bf16.msra.mxu2 %v6672_v1  ;;  %v6631_v1 = vld [vmem:[#allocation5 + $0x5c8] sm:$0xf] }
 0x1f4   :  { %3856 = vmatpush.bf16.msra.mxu3 %v6452_v12  ;;  %3886 = vmatpush.bf16.msrb.mxu1 %v6676_v10  ;;  %v2430_v12 = vpop.f32.mrf.mxu3  ;;  %v6679_v10 = vld [vmem:[#allocation5 + $0x6e8] sm:$0xf]  ;;  %v6632_v3 = vor.u32 %v7596_v47, %v6631_v1  ;;  %v7540_v1 = vld [vmem:[#allocation5 + $0xb4] sm:$0xf0] }
 0x1f5   :  { %v2431_v6 = vadd.f32 %v2430_v12, %v2417_v30  ;;  %v6680_v19 = vor.u32 %v7608_v14, %v6679_v10  ;;  %v6567_v12 = vld [vmem:[#allocation5 + $0x448] sm:$0xf] }
 0x1f6   :  { %3927 = vmatpush.bf16.msra.mxu0 %v6696_v56  ;;  %v6568_v14 = vor.u32 %v7580_v53, %v6567_v12  ;;  %v6729_v12 = vld [vmem:[#allocation5 + $0x838] sm:$0xf0]  ;;  %v7574_v53 = vld [vmem:[#allocation5 + $0x3ec] sm:$0xf] }
 0x1f7   :  { %3845 = vmatpush.bf16.msra.mxu2 %v6656_v44  ;;  %v7552_v44 = vld [vmem:[#allocation5 + $0x1d4] sm:$0xf0]  ;;  %v8072_v18 = vadd.f32 %v3068_v11, %v2431_v6  ;;  %v6425_v6 = vld [vmem:[#allocation5 + $0x118] sm:$0xf0] }
 0x1f8   :  { %3857 = vmatpush.bf16.msra.mxu3 %v6436_v16  ;;  %3887 = vmatpush.bf16.msrb.mxu1 %v6660_v9  ;;  %v6615_v16 = vld [vmem:[#allocation5 + $0x568] sm:$0xf]  ;;  %v7604_v9 = vld [vmem:[#allocation5 + $0x6b4] sm:$0xf0]  ;;  %v6456_v30 = vor.u32 %v7552_v44, %v6455_v40  ;;  %v6428_v10 = vor.u32 %v7542_v2, %v6425_v6  ;;  %v6553_v6 = vld [vmem:[#allocation5 + $0x418] sm:$0xf0] }
 0x1f9   :  { %v6664_v27 = vor.u32 %v7604_v9, %v6663_v26  ;;  %v2472_v28 = vpop.f32.mrf.mxu2  ;;  %v6616_v24 = vor.u32 %v7592_v51, %v6615_v16  ;;  %v6551_v40 = vld [vmem:[#allocation5 + $0x3e8] sm:$0xf]  ;;  %v7538_v16 = vld [vmem:[#allocation5 + $0x8c] sm:$0xf] }
 0x1fa   :  { %3928 = vmatpush.bf16.msra.mxu0 %v6680_v19  ;;  %v2473_v52 = vadd.f32 %v2472_v28, %v8057_v50  ;;  %v7544_v50 = vld [vmem:[#allocation5 + $0x114] sm:$0xf0]  ;;  %v6409_v19 = vld [vmem:[#allocation5 + $0xb8] sm:$0xf0]  ;;  %v7594_v51 = vld [vmem:[#allocation5 + $0x5cc] sm:$0xf] }
 0x1fb   :  { %3846 = vmatpush.bf16.msra.mxu2 %v6640_v25  ;;  %v6412_v55 = vor.u32 %v7538_v16, %v6409_v19  ;;  %v6535_v28 = vld [vmem:[#allocation5 + $0x388] sm:$0xf]  ;;  %v6636_v17 = vor.u32 %v7594_v51, %v6633_v22 }
 0x1fc   :  { %3858 = vmatpush.bf16.msra.mxu3 %v6420_v29  ;;  %3888 = vmatpush.bf16.msrb.mxu1 %v6644_v59  ;;  %v2484_v25 = vpop.f32.mrf.mxu3  ;;  %v7588_v29 = vld [vmem:[#allocation5 + $0x534] sm:$0xf0]  ;;  %v6648_v59 = vor.u32 %v7600_v41, %v6647_v37  ;;  %v3080_v23 = vpop.f32.mrf.mxu1  ;;  %v6519_v37 = vld [vmem:[#allocation5 + $0x328] sm:$0xf] }
 0x1fd   :  { %v6600_v36 = vor.u32 %v7588_v29, %v6599_v33  ;;  %v8077_v42 = vadd.f32 %v3080_v23, %v8067_v43  ;;  %v7534_v33 = vld [vmem:[#allocation5 + $0x2c] sm:$0xf]  ;;  %v7568_v41 = vld [vmem:[#allocation5 + $0x354] sm:$0xf0] }
 0x1fe   :  { %3847 = vmatmul.bf16.vlgmr.msra.gmra.mxu2 %v7896_v20  ;;  %3929 = vmatpush.bf16.msra.mxu0 %v6664_v27  ;;  %v7590_v29 = vld [vmem:[#allocation5 + $0x56c] sm:$0xf] }
 0x1ff   :  { %3895 = vmatpush.bf16.msrb.mxu2 %v6504_v48  ;;  %3889 = vmatmul.bf16.vlgmr.msrb.gmra.mxu1 %v7896_v20  ;;  %v2485_v48 = vadd.f32 %v2484_v25, %v2471_v34  ;;  %v7626_v23 = vld [vmem:[#allocation5 + $0x8cc] sm:$0xf] }
 0x200   :  { %3937 = vmatpush.bf16.msra.mxu1 %v6508_v46  ;;  %3859 = vmatpush.bf16.msra.mxu3 %v6404_v49  ;;  %v6583_v46 = vld [vmem:[#allocation5 + $0x4a8] sm:$0xf]  ;;  %v7546_v49 = vld [vmem:[#allocation5 + $0x14c] sm:$0xf] }
 0x201   :  { %v6444_v4 = vor.u32 %v7546_v49, %v6441_v54  ;;  %v2526_v38 = vpop.f32.mrf.mxu2  ;;  %v6584_v60 = vor.u32 %v7584_v45, %v6583_v46  ;;  %v7582_v45 = vld [vmem:[#allocation5 + $0x4ac] sm:$0xf]  ;;  %v6585_v54 = vld [vmem:[#allocation5 + $0x4d8] sm:$0xf0] }
 0x202   :  { %3930 = vmatpush.bf16.msra.mxu0 %v6648_v59  ;;  %v3122_v56 = vpop.f32.mrf.mxu0  ;;  %v2527_v43 = vadd.f32 %v2526_v38, %v8060_v39  ;;  %v7576_v39 = vld [vmem:[#allocation5 + $0x414] sm:$0xf0]  ;;  %v7586_v59 = vld [vmem:[#allocation5 + $0x50c] sm:$0xf]  ;;  %v6588_v38 = vor.u32 %v7582_v45, %v6585_v54 }
 0x203   :  { %3896 = vmatpush.bf16.msrb.mxu2 %v6488_v61  ;;  %v6424_v61 = vor.u32 %v7544_v50, %v6423_v0  ;;  %v8079_v34 = vadd.f32 %v3122_v56, %v2485_v48  ;;  %v6552_v27 = vor.u32 %v7576_v39, %v6551_v40  ;;  %v6536_v48 = vor.u32 %v7572_v32, %v6535_v28  ;;  %v6745_v56 = vld [vmem:[#allocation5 + $0x898] sm:$0xf0]  ;;  %v7610_v40 = vld [vmem:[#allocation5 + $0x74c] sm:$0xf] }
 0x204   :  { %3938 = vmatpush.bf16.msra.mxu1 %v6492_v7  ;;  %3860 = vmatpush.bf16.msra.mxu3 %v6388_v31  ;;  %v2486_v47 = vpop.f32.mrf.mxu3  ;;  %v3082_v11 = vpop.f32.mrf.mxu1  ;;  %v6408_v31 = vor.u32 %v7540_v1, %v6407_v62  ;;  %v6569_v62 = vld [vmem:[#allocation5 + $0x478] sm:$0xf0]  ;;  %v7618_v1 = vld [vmem:[#allocation5 + $0x80c] sm:$0xf] }
 0x205   :  { %3931 = vmatmul.bf16.vlgmr.msra.gmra.mxu0 %v7896_v20  ;;  %v2487_v7 = vadd.f32 %v2486_v47, %v2473_v52  ;;  %v8084_v44 = vadd.f32 %v3082_v11, %v8072_v18  ;;  %v6393_v52 = vld [vmem:[#allocation5 + $0x58] sm:$0xf0]  ;;  %v6556_v11 = vor.u32 %v7574_v53, %v6553_v6  ;;  %v7602_v32 = vld [vmem:[#allocation5 + $0x68c] sm:$0xf] }
 0x206   :  { %v6396_v13 = vor.u32 %v7534_v33, %v6393_v52  ;;  %v6697_v39 = vld [vmem:[#allocation5 + $0x778] sm:$0xf0] }
 0x207   :  { %3897 = vmatpush.bf16.msrb.mxu2 %v6472_v15  ;;  %3861 = vmatmul.bf16.vlgmr.msra.gmra.mxu3 %v7889_v57  ;;  %v6391_v15 = vld [vmem:[#allocation5 + $0x28] sm:$0xf]  ;;  %v6681_v28 = vld [vmem:[#allocation5 + $0x718] sm:$0xf0] }
 0x208   :  { %3909 = vmatpush.bf16.msrb.mxu3 %v6632_v3  ;;  %3939 = vmatpush.bf16.msra.mxu1 %v6476_v63  ;;  %v7536_v3 = vld [vmem:[#allocation5 + $0x54] sm:$0xf0]  ;;  %v6665_v33 = vld [vmem:[#allocation5 + $0x6b8] sm:$0xf0] }
 0x209   :  { %v2528_v26 = vpop.f32.mrf.mxu2  ;;  %v6392_v9 = vor.u32 %v7536_v3, %v6391_v15  ;;  %v6537_v3 = vld [vmem:[#allocation5 + $0x3b8] sm:$0xf0] }
 0x20a   :  { %v3124_v63 = vpop.f32.mrf.mxu0 }
 0x20b   :  { %3898 = vmatpush.bf16.msrb.mxu2 %v6456_v30  ;;  %v8086_v30 = vadd.f32 %v3124_v63, %v2487_v7  ;;  %v7614_v7 = vld [vmem:[#allocation5 + $0x7ac] sm:$0xf] }
 0x20c   :  { %3910 = vmatpush.bf16.msrb.mxu3 %v6616_v24  ;;  %3940 = vmatpush.bf16.msra.mxu1 %v6460_v58  ;;  %v2529_v24 = vadd.f32 %v2528_v26, %v8064_v21  ;;  %v2540_v18 = vpop.f32.mrf.mxu3  ;;  %v6620_v58 = vor.u32 %v7590_v29, %v6617_v8  ;;  %v6601_v21 = vld [vmem:[#allocation5 + $0x538] sm:$0xf0]  ;;  %v7566_v63 = vld [vmem:[#allocation5 + $0x32c] sm:$0xf] }
 0x20d   :  { %v2541_v25 = vadd.f32 %v2540_v18, %v2527_v43  ;;  %v6604_v50 = vor.u32 %v7586_v59, %v6601_v21  ;;  %v6732_v43 = vor.u32 %v7618_v1, %v6729_v12  ;;  %v6839_v59 = vld [vmem:[#allocation7 + $0x690] sm:$0xf]  ;;  %v7648_v21 = vld [vmem:[#allocation7 + $0x698] sm:$0xf0] }
 0x20e   :  { %v6935_v1 = vld [vmem:[#allocation7 + $0x750] sm:$0xf] }
 0x20f   :  { %3899 = vmatpush.bf16.msrb.mxu2 %v6440_v35  ;;  %v6761_v35 = vld [vmem:[#allocation5 + $0x8f8] sm:$0xf0] }
 0x210   :  { %3911 = vmatpush.bf16.msrb.mxu3 %v6600_v36  ;;  %3941 = vmatpush.bf16.msra.mxu1 %v6444_v4  ;;  %v6520_v36 = vor.u32 %v7568_v41, %v6519_v37  ;;  %v6764_v46 = vor.u32 %v7626_v23, %v6761_v35  ;;  %v7622_v4 = vld [vmem:[#allocation5 + $0x86c] sm:$0xf]  ;;  %v6649_v37 = vld [vmem:[#allocation5 + $0x658] sm:$0xf0]  ;;  %v6827_v35 = vld [vmem:[#allocation7 + $0x678] sm:$0xf] }
 0x213   :  { %3900 = vmatpush.bf16.msrb.mxu2 %v6424_v61  ;;  %v6748_v61 = vor.u32 %v7622_v4, %v6745_v56  ;;  %v6815_v4 = vld [vmem:[#allocation7 + $0x660] sm:$0xf]  ;;  %v7642_v56 = vld [vmem:[#allocation7 + $0x668] sm:$0xf0] }
 0x214   :  { %3912 = vmatpush.bf16.msrb.mxu3 %v6584_v60  ;;  %3942 = vmatpush.bf16.msra.mxu1 %v6428_v10  ;;  %v2542_v0 = vpop.f32.mrf.mxu3  ;;  %v7578_v60 = vld [vmem:[#allocation5 + $0x44c] sm:$0xf]  ;;  %v6713_v10 = vld [vmem:[#allocation5 + $0x7d8] sm:$0xf0] }
 0x215   :  { %v2543_v49 = vadd.f32 %v2542_v0, %v2529_v24  ;;  %v6572_v47 = vor.u32 %v7578_v60, %v6569_v62  ;;  %v6803_v60 = vld [vmem:[#allocation7 + $0x648] sm:$0xf]  ;;  %v7639_v62 = vld [vmem:[#allocation7 + $0x650] sm:$0xf0] }
 0x216   :  { %v6804_v12 = vor.u32 %v7639_v62, %v6803_v60  ;;  %v7031_v60 = vld [vmem:[#allocation7 + $0x810] sm:$0xf]  ;;  %v7696_v62 = vld [vmem:[#allocation7 + $0x818] sm:$0xf0] }
 0x217   :  { %3901 = vmatpush.bf16.msrb.mxu2 %v6408_v31  ;;  %v6716_v31 = vor.u32 %v7614_v7, %v6713_v10  ;;  %v6923_v7 = vld [vmem:[#allocation7 + $0x738] sm:$0xf]  ;;  %v7669_v10 = vld [vmem:[#allocation7 + $0x740] sm:$0xf0] }
 0x218   :  { %3913 = vmatpush.bf16.msrb.mxu3 %v6568_v14  ;;  %3943 = vmatpush.bf16.msra.mxu1 %v6412_v55  ;;  %v7570_v14 = vld [vmem:[#allocation5 + $0x38c] sm:$0xf]  ;;  %v6700_v55 = vor.u32 %v7610_v40, %v6697_v39  ;;  %v7633_v40 = vld [vmem:[#allocation7 + $0x620] sm:$0xf0]  ;;  %v6911_v39 = vld [vmem:[#allocation7 + $0x720] sm:$0xf] }
 0x219   :  { %v6540_v22 = vor.u32 %v7570_v14, %v6537_v3  ;;  %v6779_v3 = vld [vmem:[#allocation7 + $0x618] sm:$0xf] }
 0x21b   :  { %3902 = vmatpush.bf16.msrb.mxu2 %v6392_v9  ;;  %v6521_v9 = vld [vmem:[#allocation5 + $0x358] sm:$0xf0] }
 0x21c   :  { %3914 = vmatpush.bf16.msrb.mxu3 %v6552_v27  ;;  %3944 = vmatpush.bf16.msra.mxu1 %v6396_v13  ;;  %v7606_v27 = vld [vmem:[#allocation5 + $0x6ec] sm:$0xf]  ;;  %v6524_v24 = vor.u32 %v7566_v63, %v6521_v9  ;;  %v6851_v13 = vld [vmem:[#allocation7 + $0x6a8] sm:$0xf]  ;;  %v7663_v9 = vld [vmem:[#allocation7 + $0x710] sm:$0xf0] }
 0x21d   :  { %v6684_v18 = vor.u32 %v7606_v27, %v6681_v28 }
 0x21e   :  { %3903 = vmatmul.bf16.vlgmr.msrb.gmra.mxu2 %v7889_v57 }
 0x21f   :  { %3951 = vmatpush.bf16.msra.mxu2 %v6636_v17  ;;  %3945 = vmatmul.bf16.vlgmr.msra.gmra.mxu1 %v7889_v57  ;;  %v3136_v57 = vpop.f32.mrf.mxu1 }
 0x220   :  { %3915 = vmatpush.bf16.msrb.mxu3 %v6536_v48  ;;  %v8093_v2 = vadd.f32 %v3136_v57, %v8079_v34  ;;  %v7651_v48 = vld [vmem:[#allocation7 + $0x6b0] sm:$0xf0]  ;;  %v7672_v57 = vld [vmem:[#allocation7 + $0x758] sm:$0xf0] }
 0x221   :  { %v3094_v15 = vpop.f32.mrf.mxu2  ;;  %v6852_v41 = vor.u32 %v7651_v48, %v6851_v13  ;;  %v6936_v6 = vor.u32 %v7672_v57, %v6935_v1  ;;  %v6875_v13 = vld [vmem:[#allocation7 + $0x6d8] sm:$0xf]  ;;  %v7032_v1 = vor.u32 %v7696_v62, %v7031_v60  ;;  %v7723_v60 = vld [vmem:[#allocation7 + $0x8f0] sm:$0xf0] }
 0x222   :  { %v3095_v16 = vadd.f32 %v3094_v15, %v8077_v42  ;;  %v3178_v19 = vpop.f32.mrf.mxu0  ;;  %v6805_v57 = vld [vmem:[#allocation7 + $0x654] sm:$0xf0] }
 0x223   :  { %3952 = vmatpush.bf16.msra.mxu2 %v6620_v58  ;;  %v3179_v51 = vadd.f32 %v3178_v19, %v2541_v25  ;;  %v7598_v58 = vld [vmem:[#allocation5 + $0x62c] sm:$0xf]  ;;  %4631 = vmatpush.bf16.msrb.mxu0 %v6852_v41 }
 0x224   :  { %3916 = vmatpush.bf16.msrb.mxu3 %v6520_v36  ;;  %v6652_v23 = vor.u32 %v7598_v58, %v6649_v37  ;;  %v7645_v36 = vld [vmem:[#allocation7 + $0x680] sm:$0xf0]  ;;  %v7666_v19 = vld [vmem:[#allocation7 + $0x728] sm:$0xf0]  ;;  %v7644_v37 = vld [vmem:[#allocation7 + $0x67c] sm:$0xf] }
 0x225   :  { %v6828_v54 = vor.u32 %v7645_v36, %v6827_v35  ;;  %v6912_v63 = vor.u32 %v7666_v19, %v6911_v39  ;;  %v7657_v58 = vld [vmem:[#allocation7 + $0x6e0] sm:$0xf0]  ;;  %v6925_v39 = vld [vmem:[#allocation7 + $0x744] sm:$0xf0] }
 0x227   :  { %3953 = vmatpush.bf16.msra.mxu2 %v6604_v50  ;;  %3917 = vmatmul.bf16.vlgmr.msrb.gmra.mxu3 %v7892_v5  ;;  %v3138_v34 = vpop.f32.mrf.mxu1  ;;  %v6947_v50 = vld [vmem:[#allocation7 + $0x768] sm:$0xf] }
 0x228   :  { %3965 = vmatpush.bf16.msra.mxu3 %v6764_v46  ;;  %v8097_v26 = vadd.f32 %v3138_v34, %v8086_v30  ;;  %v6668_v30 = vor.u32 %v7602_v32, %v6665_v33  ;;  %v7675_v46 = vld [vmem:[#allocation7 + $0x770] sm:$0xf0]  ;;  %v7630_v34 = vld [vmem:[#allocation7 + $0x608] sm:$0xf0]  ;;  %v6887_v33 = vld [vmem:[#allocation7 + $0x6f0] sm:$0xf] }
 0x229   :  { %v3096_v17 = vpop.f32.mrf.mxu2 }
 0x22a   :  { %v3108_v42 = vpop.f32.mrf.mxu3  ;;  %v3097_v52 = vadd.f32 %v3096_v17, %v8084_v44  ;;  %v3180_v29 = vpop.f32.mrf.mxu0  ;;  %v6840_v44 = vor.u32 %v7648_v21, %v6839_v59  ;;  %v7650_v17 = vld [vmem:[#allocation7 + $0x6ac] sm:$0xf]  ;;  %v6829_v59 = vld [vmem:[#allocation7 + $0x684] sm:$0xf0] }
 0x22b   :  { %3954 = vmatpush.bf16.msra.mxu2 %v6588_v38  ;;  %v8100_v25 = vadd.f32 %v3108_v42, %v3095_v16  ;;  %v3181_v8 = vadd.f32 %v3180_v29, %v2543_v49  ;;  %v6948_v49 = vor.u32 %v7675_v46, %v6947_v50  ;;  %v6780_v16 = vor.u32 %v7633_v40, %v6779_v3  ;;  %v6853_v42 = vld [vmem:[#allocation7 + $0x6b4] sm:$0xf0]  ;;  %v7647_v29 = vld [vmem:[#allocation7 + $0x694] sm:$0xf]  ;;  %v7043_v21 = vld [vmem:[#allocation7 + $0x828] sm:$0xf] }
 0x22c   :  { %3966 = vmatpush.bf16.msra.mxu3 %v6748_v61  ;;  %4632 = vmatpush.bf16.msrb.mxu0 %v6840_v44  ;;  %v6856_v32 = vor.u32 %v7650_v17, %v6853_v42  ;;  %v6876_v44 = vor.u32 %v7657_v58, %v6875_v13  ;;  %v6832_v35 = vor.u32 %v7644_v37, %v6829_v59  ;;  %v7654_v50 = vld [vmem:[#allocation7 + $0x6c8] sm:$0xf0]  ;;  %v7641_v46 = vld [vmem:[#allocation7 + $0x664] sm:$0xf]  ;;  %v6793_v3 = vld [vmem:[#allocation7 + $0x63c] sm:$0xf0] }
 0x22d   :  { %4645 = vmatpush.bf16.msrb.mxu1 %v6948_v49  ;;  %v6817_v49 = vld [vmem:[#allocation7 + $0x66c] sm:$0xf0]  ;;  %v7668_v40 = vld [vmem:[#allocation7 + $0x73c] sm:$0xf]  ;;  %v6995_v17 = vld [vmem:[#allocation7 + $0x7c8] sm:$0xf] }
 0x22e   :  { %v6928_v19 = vor.u32 %v7668_v40, %v6925_v39  ;;  %v7687_v42 = vld [vmem:[#allocation7 + $0x7d0] sm:$0xf0]  ;;  %v7662_v13 = vld [vmem:[#allocation7 + $0x70c] sm:$0xf]  ;;  %v6983_v58 = vld [vmem:[#allocation7 + $0x7b0] sm:$0xf] }
 0x22f   :  { %3955 = vmatpush.bf16.msra.mxu2 %v6572_v47  ;;  %v6791_v47 = vld [vmem:[#allocation7 + $0x630] sm:$0xf]  ;;  %v7684_v37 = vld [vmem:[#allocation7 + $0x7b8] sm:$0xf0]  ;;  %v7695_v40 = vld [vmem:[#allocation7 + $0x814] sm:$0xf] }
 0x230   :  { %3967 = vmatpush.bf16.msra.mxu3 %v6732_v43  ;;  %4633 = vmatpush.bf16.msrb.mxu0 %v6828_v54  ;;  %v7636_v43 = vld [vmem:[#allocation7 + $0x638] sm:$0xf0]  ;;  %v7674_v54 = vld [vmem:[#allocation7 + $0x76c] sm:$0xf]  ;;  %v6984_v59 = vor.u32 %v7684_v37, %v6983_v58  ;;  %v7033_v39 = vld [vmem:[#allocation7 + $0x81c] sm:$0xf0] }
 0x231   :  { %4646 = vmatpush.bf16.msrb.mxu1 %v6936_v6  ;;  %v7711_v58 = vld [vmem:[#allocation7 + $0x890] sm:$0xf0] }
 0x232   :  { %v3110_v0 = vpop.f32.mrf.mxu3 }
 0x233   :  { %3956 = vmatpush.bf16.msra.mxu2 %v6556_v11  ;;  %v8103_v45 = vadd.f32 %v3110_v0, %v3097_v52  ;;  %v7660_v52 = vld [vmem:[#allocation7 + $0x6f8] sm:$0xf0]  ;;  %v6863_v0 = vld [vmem:[#allocation7 + $0x6c0] sm:$0xf] }
 0x234   :  { %3968 = vmatpush.bf16.msra.mxu3 %v6716_v31  ;;  %v6924_v31 = vor.u32 %v7669_v10, %v6923_v7  ;;  %v7019_v10 = vld [vmem:[#allocation7 + $0x7f8] sm:$0xf] }
 0x236   :  { %4647 = vmatpush.bf16.msrb.mxu1 %v6924_v31 }
 0x237   :  { %3957 = vmatpush.bf16.msra.mxu2 %v6540_v22 }
 0x238   :  { %3969 = vmatpush.bf16.msra.mxu3 %v6700_v55 }
 0x23a   :  { %4648 = vmatpush.bf16.msrb.mxu1 %v6912_v63  ;;  %v6781_v63 = vld [vmem:[#allocation7 + $0x624] sm:$0xf0] }
 0x23b   :  { %3958 = vmatpush.bf16.msra.mxu2 %v6524_v24 }
 0x23c   :  { %3970 = vmatpush.bf16.msra.mxu3 %v6684_v18  ;;  %v3192_v38 = vpop.f32.mrf.mxu1 }
 0x23d   :  { %v8106_v61 = vadd.f32 %v3192_v38, %v3179_v51  ;;  %v6767_v51 = vld [vmem:[#allocation7 + $0x600] sm:$0xf] }
 0x23e   :  { %3959 = vmatmul.bf16.vlgmr.msra.gmra.mxu2 %v7892_v5  ;;  %v6816_v5 = vor.u32 %v7642_v56, %v6815_v4  ;;  %v6768_v24 = vor.u32 %v7630_v34, %v6767_v51  ;;  %v6949_v4 = vld [vmem:[#allocation7 + $0x774] sm:$0xf0]  ;;  %v6864_v56 = vor.u32 %v7654_v50, %v6863_v0  ;;  %v7007_v51 = vld [vmem:[#allocation7 + $0x7e0] sm:$0xf]  ;;  %v7690_v34 = vld [vmem:[#allocation7 + $0x7e8] sm:$0xf0] }
 0x23f   :  { %v6952_v38 = vor.u32 %v7674_v54, %v6949_v4  ;;  %v6971_v0 = vld [vmem:[#allocation7 + $0x798] sm:$0xf]  ;;  %v7681_v50 = vld [vmem:[#allocation7 + $0x7a0] sm:$0xf0]  ;;  %v7656_v54 = vld [vmem:[#allocation7 + $0x6dc] sm:$0xf] }
 0x240   :  { %3971 = vmatpush.bf16.msra.mxu3 %v6668_v30  ;;  %4634 = vmatpush.bf16.msrb.mxu0 %v6816_v5  ;;  %v6841_v30 = vld [vmem:[#allocation7 + $0x69c] sm:$0xf0]  ;;  %v6820_v5 = vor.u32 %v7641_v46, %v6817_v49  ;;  %v6972_v49 = vor.u32 %v7681_v50, %v6971_v0  ;;  %v6877_v4 = vld [vmem:[#allocation7 + $0x6e4] sm:$0xf0]  ;;  %v6859_v50 = vld [vmem:[#allocation7 + $0x6b0] sm:$0xf] }
 0x241   :  { %v3150_v53 = vpop.f32.mrf.mxu2 }
 0x242   :  { %v3151_v11 = vadd.f32 %v3150_v53, %v8093_v2  ;;  %v6899_v2 = vld [vmem:[#allocation7 + $0x708] sm:$0xf]  ;;  %v6937_v53 = vld [vmem:[#allocation7 + $0x75c] sm:$0xf0] }
 0x243   :  { %v6900_v18 = vor.u32 %v7663_v9, %v6899_v2  ;;  %v7665_v2 = vld [vmem:[#allocation7 + $0x724] sm:$0xf] }
 0x244   :  { %3972 = vmatpush.bf16.msra.mxu3 %v6652_v23  ;;  %4635 = vmatpush.bf16.msrb.mxu0 %v6804_v12  ;;  %v3194_v14 = vpop.f32.mrf.mxu1  ;;  %v7699_v23 = vld [vmem:[#allocation7 + $0x830] sm:$0xf0]  ;;  %v7638_v12 = vld [vmem:[#allocation7 + $0x64c] sm:$0xf] }
 0x245   :  { %v8109_v15 = vadd.f32 %v3194_v14, %v3181_v8  ;;  %4649 = vmatpush.bf16.msrb.mxu1 %v6900_v18  ;;  %v6888_v8 = vor.u32 %v7660_v52, %v6887_v33  ;;  %v7044_v36 = vor.u32 %v7699_v23, %v7043_v21  ;;  %v6996_v52 = vor.u32 %v7687_v42, %v6995_v17  ;;  %v7659_v21 = vld [vmem:[#allocation7 + $0x6f4] sm:$0xf]  ;;  %v6889_v23 = vld [vmem:[#allocation7 + $0x6fc] sm:$0xf0]  ;;  %v7714_v17 = vld [vmem:[#allocation7 + $0x8a8] sm:$0xf0] }
 0x247   :  { %3973 = vmatmul.bf16.vlgmr.msra.gmra.mxu3 %v7896_v20  ;;  %v6792_v20 = vor.u32 %v7636_v43, %v6791_v47  ;;  %4659 = vmatpush.bf16.msrb.mxu2 %v7044_v36  ;;  %v7671_v47 = vld [vmem:[#allocation7 + $0x754] sm:$0xf]  ;;  %v6808_v43 = vor.u32 %v7638_v12, %v6805_v57  ;;  %v7678_v12 = vld [vmem:[#allocation7 + $0x788] sm:$0xf0] }
 0x248   :  { %v6940_v7 = vor.u32 %v7671_v47, %v6937_v53  ;;  %v7698_v47 = vld [vmem:[#allocation7 + $0x82c] sm:$0xf] }
 0x249   :  { %4636 = vmatpush.bf16.msrb.mxu0 %v6792_v20  ;;  %v3152_v22 = vpop.f32.mrf.mxu2  ;;  %4650 = vmatpush.bf16.msrb.mxu1 %v6888_v8  ;;  %v7635_v20 = vld [vmem:[#allocation7 + $0x634] sm:$0xf]  ;;  %v6769_v8 = vld [vmem:[#allocation7 + $0x60c] sm:$0xf0] }
 0x24a   :  { %v3164_v55 = vpop.f32.mrf.mxu3  ;;  %v3153_v27 = vadd.f32 %v3152_v22, %v8097_v26  ;;  %v6844_v26 = vor.u32 %v7647_v29, %v6841_v30  ;;  %v7008_v22 = vor.u32 %v7690_v34, %v7007_v51  ;;  %v7629_v29 = vld [vmem:[#allocation7 + $0x604] sm:$0xf]  ;;  %v7036_v51 = vor.u32 %v7695_v40, %v7033_v39  ;;  %v7115_v34 = vld [vmem:[#allocation7 + $0x8b8] sm:$0xf]  ;;  %v6973_v40 = vld [vmem:[#allocation7 + $0x7a4] sm:$0xf0] }
 0x24b   :  { %v8112_v28 = vadd.f32 %v3164_v55, %v3151_v11  ;;  %4660 = vmatpush.bf16.msrb.mxu2 %v7032_v1  ;;  %v7693_v11 = vld [vmem:[#allocation7 + $0x800] sm:$0xf0]  ;;  %v7632_v55 = vld [vmem:[#allocation7 + $0x61c] sm:$0xf]  ;;  %v6772_v30 = vor.u32 %v7629_v29, %v6769_v8  ;;  %v6959_v1 = vld [vmem:[#allocation7 + $0x780] sm:$0xf] }
 0x24c   :  { %v7020_v14 = vor.u32 %v7693_v11, %v7019_v10  ;;  %v6784_v9 = vor.u32 %v7632_v55, %v6781_v63  ;;  %v6960_v57 = vor.u32 %v7678_v12, %v6959_v1  ;;  %v6865_v10 = vld [vmem:[#allocation7 + $0x6cc] sm:$0xf0]  ;;  %v7683_v1 = vld [vmem:[#allocation7 + $0x7b4] sm:$0xf]  ;;  %v6985_v12 = vld [vmem:[#allocation7 + $0x7bc] sm:$0xf0] }
 0x24d   :  { %4637 = vmatpush.bf16.msrb.mxu0 %v6780_v16  ;;  %4651 = vmatpush.bf16.msrb.mxu1 %v6876_v44  ;;  %v6796_v16 = vor.u32 %v7635_v20, %v6793_v3  ;;  %v6892_v44 = vor.u32 %v7659_v21, %v6889_v23  ;;  %v7127_v20 = vld [vmem:[#allocation7 + $0x8d0] sm:$0xf] }
 0x24f   :  { %4661 = vmatpush.bf16.msrb.mxu2 %v7020_v14 }
 0x251   :  { %4638 = vmatpush.bf16.msrb.mxu0 %v6768_v24  ;;  %4652 = vmatpush.bf16.msrb.mxu1 %v6864_v56  ;;  %v8125_v56 = vld [vmem:[%s8158_s2 + $0x8] sm:$0xf] }
 0x252   :  { %v3166_v48 = vpop.f32.mrf.mxu3  ;;  %v3323_v53 = vperm.slane %v8125_v56, 0 }
 0x253   :  { %v8114_v41 = vadd.f32 %v3166_v48, %v3153_v27  ;;  %4662 = vmatpush.bf16.msrb.mxu2 %v7008_v22  ;;  %v6901_v48 = vld [vmem:[#allocation7 + $0x714] sm:$0xf0]  ;;  %v7717_v22 = vld [vmem:[#allocation7 + $0x8c0] sm:$0xf0] }
 0x254   :  { %v7116_v55 = vor.u32 %v7717_v22, %v7115_v34 }
 0x255   :  { %4687 = vmatpush.bf16.msra.mxu0 %v6856_v32  ;;  %4701 = vmatpush.bf16.msra.mxu1 %v6952_v38  ;;  %v7139_v38 = vld [vmem:[#allocation7 + $0x8e8] sm:$0xf] }
 0x256   :  { %v7140_v62 = vor.u32 %v7723_v60, %v7139_v38 }
 0x257   :  { %4663 = vmatpush.bf16.msrb.mxu2 %v6996_v52  ;;  %v7009_v52 = vld [vmem:[#allocation7 + $0x7ec] sm:$0xf0] }
 0x258   :  { %4673 = vmatpush.bf16.msrb.mxu3 %v7140_v62 }
 0x259   :  { %4688 = vmatpush.bf16.msra.mxu0 %v6844_v26  ;;  %4702 = vmatpush.bf16.msra.mxu1 %v6940_v7  ;;  %v6904_v26 = vor.u32 %v7662_v13, %v6901_v48  ;;  %v7653_v7 = vld [vmem:[#allocation7 + $0x6c4] sm:$0xf] }
 0x25a   :  { %v6868_v11 = vor.u32 %v7653_v7, %v6865_v10  ;;  %v7067_v7 = vld [vmem:[#allocation7 + $0x858] sm:$0xf]  ;;  %v7705_v10 = vld [vmem:[#allocation7 + $0x860] sm:$0xf0] }
 0x25b   :  { %4664 = vmatpush.bf16.msrb.mxu2 %v6984_v59 }
 0x25c   :  { %v3834_v36 = vpop.f32.mrf.mxu1 }
 0x25d   :  { %4689 = vmatpush.bf16.msra.mxu0 %v6832_v35  ;;  %4703 = vmatpush.bf16.msra.mxu1 %v6928_v19 }
 0x25f   :  { %4665 = vmatpush.bf16.msrb.mxu2 %v6972_v49  ;;  %v7652_v49 = vld [vmem:[#allocation7 + $0x6b8] sm:$0xf0] }
 0x260   :  { %v6860_v62 = vor.u32 %v7652_v49, %v6859_v50  ;;  %v7716_v50 = vld [vmem:[#allocation7 + $0x8bc] sm:$0xf]  ;;  %v7117_v49 = vld [vmem:[#allocation7 + $0x8c4] sm:$0xf0] }
 0x261   :  { %4690 = vmatpush.bf16.msra.mxu0 %v6820_v5  ;;  %v3206_v6 = vpop.f32.mrf.mxu2  ;;  %v6880_v5 = vor.u32 %v7656_v54, %v6877_v4  ;;  %v7079_v4 = vld [vmem:[#allocation7 + $0x870] sm:$0xf] }
 0x262   :  { %v3207_v31 = vadd.f32 %v3206_v6, %v8106_v61  ;;  %v6913_v61 = vld [vmem:[#allocation7 + $0x72c] sm:$0xf0] }
 0x263   :  { %v6916_v18 = vor.u32 %v7665_v2, %v6913_v61  ;;  %4666 = vmatpush.bf16.msrb.mxu2 %v6960_v57  ;;  %v7692_v2 = vld [vmem:[#allocation7 + $0x7fc] sm:$0xf] }
 0x264   :  { %v3836_v19 = vpop.f32.mrf.mxu1 }
 0x265   :  { %4691 = vmatpush.bf16.msra.mxu0 %v6808_v43  ;;  %4704 = vmatpush.bf16.msra.mxu1 %v6916_v18  ;;  %v7045_v43 = vld [vmem:[#allocation7 + $0x834] sm:$0xf0]  ;;  %v7103_v18 = vld [vmem:[#allocation7 + $0x8a0] sm:$0xf] }
 0x266   :  { %v7048_v6 = vor.u32 %v7698_v47, %v7045_v43  ;;  %v7104_v42 = vor.u32 %v7714_v17, %v7103_v18  ;;  %v6847_v43 = vld [vmem:[#allocation7 + $0x698] sm:$0xf]  ;;  %v7643_v17 = vld [vmem:[#allocation7 + $0x670] sm:$0xf0] }
 0x268   :  { %4715 = vmatpush.bf16.msra.mxu2 %v7048_v6  ;;  %v6988_v6 = vor.u32 %v7683_v1, %v6985_v12  ;;  %v6931_v1 = vld [vmem:[#allocation7 + $0x740] sm:$0xf]  ;;  %v7670_v12 = vld [vmem:[#allocation7 + $0x748] sm:$0xf0] }
 0x269   :  { %4692 = vmatpush.bf16.msra.mxu0 %v6796_v16  ;;  %v3208_v27 = vpop.f32.mrf.mxu2  ;;  %4705 = vmatpush.bf16.msra.mxu1 %v6904_v26  ;;  %v7091_v26 = vld [vmem:[#allocation7 + $0x888] sm:$0xf] }
 0x26a   :  { %v3220_v24 = vpop.f32.mrf.mxu3  ;;  %v3209_v32 = vadd.f32 %v3208_v27, %v8109_v15  ;;  %v3820_v15 = vpop.f32.mrf.mxu0  ;;  %v7092_v59 = vor.u32 %v7711_v58, %v7091_v26  ;;  %v7719_v58 = vld [vmem:[#allocation7 + $0x8d4] sm:$0xf] }
 0x26b   :  { %v8118_v33 = vadd.f32 %v3220_v24, %v3207_v31  ;;  %v7720_v31 = vld [vmem:[#allocation7 + $0x8d8] sm:$0xf0]  ;;  %v3821_v16 = vadd.f32 %v3820_v15, %v3323_v53  ;;  %v7686_v15 = vld [vmem:[#allocation7 + $0x7cc] sm:$0xf] }
 0x26c   :  { %v7128_v14 = vor.u32 %v7720_v31, %v7127_v20  ;;  %4716 = vmatpush.bf16.msra.mxu2 %v7036_v51  ;;  %v7646_v51 = vld [vmem:[#allocation7 + $0x688] sm:$0xf0] }
 0x26d   :  { %4693 = vmatpush.bf16.msra.mxu0 %v6784_v9  ;;  %4706 = vmatpush.bf16.msra.mxu1 %v6892_v44  ;;  %v7021_v9 = vld [vmem:[#allocation7 + $0x804] sm:$0xf0]  ;;  %v3835_v61 = vadd.f32 %v3834_v36, %v3821_v16  ;;  %v6997_v44 = vld [vmem:[#allocation7 + $0x7d4] sm:$0xf0] }
 0x26e   :  { %4674 = vmatpush.bf16.msrb.mxu3 %v7128_v14  ;;  %v7024_v24 = vor.u32 %v7692_v2, %v7021_v9  ;;  %v7000_v54 = vor.u32 %v7686_v15, %v6997_v44  ;;  %v6823_v9 = vld [vmem:[#allocation7 + $0x668] sm:$0xf] }
 0x270   :  { %4717 = vmatpush.bf16.msra.mxu2 %v7024_v24  ;;  %v7141_v24 = vld [vmem:[#allocation7 + $0x8f4] sm:$0xf0] }
 0x271   :  { %4694 = vmatpush.bf16.msra.mxu0 %v6772_v30  ;;  %4707 = vmatpush.bf16.msra.mxu1 %v6880_v5  ;;  %v3324_v30 = vperm.slane %v8125_v56, 1  ;;  %v7708_v5 = vld [vmem:[#allocation7 + $0x878] sm:$0xf0] }
 0x272   :  { %v3222_v35 = vpop.f32.mrf.mxu3  ;;  %v3822_v3 = vpop.f32.mrf.mxu0  ;;  %4675 = vmatpush.bf16.msrb.mxu3 %v7116_v55  ;;  %v7080_v60 = vor.u32 %v7708_v5, %v7079_v4  ;;  %v7055_v55 = vld [vmem:[#allocation7 + $0x840] sm:$0xf]  ;;  %v6799_v5 = vld [vmem:[#allocation7 + $0x638] sm:$0xf] }
 0x273   :  { %v8120_v46 = vadd.f32 %v3222_v35, %v3209_v32  ;;  %v3823_v27 = vadd.f32 %v3822_v3, %v3323_v53  ;;  %v7689_v32 = vld [vmem:[#allocation7 + $0x7e4] sm:$0xf]  ;;  %v7680_v3 = vld [vmem:[#allocation7 + $0x79c] sm:$0xf] }
 0x274   :  { %v7012_v13 = vor.u32 %v7689_v32, %v7009_v52  ;;  %v7649_v53 = vld [vmem:[#allocation7 + $0x6a0] sm:$0xf0]  ;;  %v6976_v34 = vor.u32 %v7680_v3, %v6973_v40  ;;  %v6961_v52 = vld [vmem:[#allocation7 + $0x78c] sm:$0xf0] }
 0x275   :  { %4708 = vmatpush.bf16.msra.mxu1 %v6868_v11  ;;  %v3837_v8 = vadd.f32 %v3836_v19, %v3823_v27  ;;  %v7068_v11 = vor.u32 %v7705_v10, %v7067_v7  ;;  %v6848_v14 = vor.u32 %v7649_v53, %v6847_v43  ;;  %v6835_v19 = vld [vmem:[#allocation7 + $0x680] sm:$0xf]  ;;  %v7722_v27 = vld [vmem:[#allocation7 + $0x8ec] sm:$0xf]  ;;  %v7677_v32 = vld [vmem:[#allocation7 + $0x784] sm:$0xf]  ;;  %v6932_v7 = vor.u32 %v7670_v12, %v6931_v1 }
 0x276   :  { %4676 = vmatpush.bf16.msrb.mxu3 %v7104_v42  ;;  %4718 = vmatpush.bf16.msra.mxu2 %v7012_v13  ;;  %v6836_v18 = vor.u32 %v7646_v51, %v6835_v19  ;;  %v7144_v42 = vor.u32 %v7722_v27, %v7141_v24  ;;  %v7676_v13 = vld [vmem:[#allocation7 + $0x778] sm:$0xf0]  ;;  %v7105_v43 = vld [vmem:[#allocation7 + $0x8ac] sm:$0xf0]  ;;  %v3325_v53 = vperm.slane %v8125_v56, 2 }
 0x277   :  { %v6787_v10 = vld [vmem:[#allocation7 + $0x620] sm:$0xf]  ;;  %v7707_v24 = vld [vmem:[#allocation7 + $0x874] sm:$0xf] }
 0x27a   :  { %v3876_v48 = vpop.f32.mrf.mxu0  ;;  %4677 = vmatpush.bf16.msrb.mxu3 %v7092_v59  ;;  %4719 = vmatpush.bf16.msra.mxu2 %v7000_v54  ;;  %v6824_v59 = vor.u32 %v7643_v17, %v6823_v9  ;;  %v7664_v9 = vld [vmem:[#allocation7 + $0x718] sm:$0xf0] }
 0x27c   :  { %v3890_v37 = vpop.f32.mrf.mxu1 }
 0x27e   :  { %4678 = vmatpush.bf16.msrb.mxu3 %v7080_v60  ;;  %4720 = vmatpush.bf16.msra.mxu2 %v6988_v6 }
 0x281   :  { %v3848_v63 = vpop.f32.mrf.mxu2 }
 0x282   :  { %v3849_v29 = vadd.f32 %v3848_v63, %v3835_v61  ;;  %v3878_v31 = vpop.f32.mrf.mxu0  ;;  %4679 = vmatpush.bf16.msrb.mxu3 %v7068_v11  ;;  %v7702_v63 = vld [vmem:[#allocation7 + $0x848] sm:$0xf0]  ;;  %4721 = vmatpush.bf16.msra.mxu2 %v6976_v34  ;;  %v6775_v34 = vld [vmem:[#allocation7 + $0x608] sm:$0xf] }
 0x283   :  { %v7056_v61 = vor.u32 %v7702_v63, %v7055_v55  ;;  %v7634_v11 = vld [vmem:[#allocation7 + $0x628] sm:$0xf0] }
 0x284   :  { %v3979_v35 = vmax.f32 %v3849_v29, 0.0  ;;  %v3892_v22 = vpop.f32.mrf.mxu1  ;;  %v6788_v40 = vor.u32 %v7634_v11, %v6787_v10 }
 0x286   :  { %4680 = vmatpush.bf16.msrb.mxu3 %v7056_v61 }
 0x289   :  { %v3850_v21 = vpop.f32.mrf.mxu2 }
 0x28a   :  { %v3862_v23 = vpop.f32.mrf.mxu3  ;;  %v3851_v36 = vadd.f32 %v3850_v21, %v3837_v8  ;;  %4729 = vmatpush.bf16.msra.mxu3 %v7144_v42  ;;  %v3932_v3 = vpop.f32.mrf.mxu0 }
 0x28b   :  { %v3863_v0 = vadd.f32 %v3862_v23, %v3324_v30  ;;  %v6811_v23 = vld [vmem:[#allocation7 + $0x650] sm:$0xf] }
 0x28c   :  { %v3983_v38 = vmax.f32 %v3851_v36, 0.0  ;;  %v6943_v36 = vld [vmem:[#allocation7 + $0x758] sm:$0xf] }
 0x28d   :  { %v3877_v47 = vadd.f32 %v3876_v48, %v3863_v0  ;;  %v6964_v48 = vor.u32 %v7677_v32, %v6961_v52  ;;  %v7673_v0 = vld [vmem:[#allocation7 + $0x760] sm:$0xf0]  ;;  %v6895_v52 = vld [vmem:[#allocation7 + $0x6f8] sm:$0xf] }
 0x28e   :  { %v8129_v57 = vpack.c.bf16 %v3983_v38, %v3979_v35  ;;  %v7640_v35 = vld [vmem:[#allocation7 + $0x658] sm:$0xf0]  ;;  %v6944_v4 = vor.u32 %v7673_v0, %v6943_v36  ;;  %v7120_v38 = vor.u32 %v7716_v50, %v7117_v49  ;;  %v7057_v36 = vld [vmem:[#allocation7 + $0x84c] sm:$0xf0] }
 0x28f   :  { %v3891_v39 = vadd.f32 %v3890_v37, %v3877_v47  ;;  %4722 = vmatpush.bf16.msra.mxu2 %v6964_v48  ;;  %v7129_v37 = vld [vmem:[#allocation7 + $0x8dc] sm:$0xf0]  ;;  %v6812_v54 = vor.u32 %v7640_v35, %v6811_v23  ;;  %v7713_v47 = vld [vmem:[#allocation7 + $0x8a4] sm:$0xf]  ;;  %v7658_v23 = vld [vmem:[#allocation7 + $0x6e8] sm:$0xf0] }
 0x290   :  { %4639 = vmatmul.bf16.vlgmr.msrb.gmra.mxu0 %v8129_v57  ;;  %v7132_v15 = vor.u32 %v7719_v58, %v7129_v37  ;;  %v7701_v35 = vld [vmem:[#allocation7 + $0x844] sm:$0xf] }
 0x291   :  { %4743 = vmatpush.bf16.msrb.mxu0 %v6860_v62  ;;  %v3980_v29 = vmax.f32 %v3891_v39, 0.0  ;;  %v7637_v62 = vld [vmem:[#allocation7 + $0x640] sm:$0xf0]  ;;  %v7710_v39 = vld [vmem:[#allocation7 + $0x88c] sm:$0xf] }
 0x292   :  { %v3864_v20 = vpop.f32.mrf.mxu3  ;;  %4730 = vmatpush.bf16.msra.mxu3 %v7132_v15  ;;  %v6800_v6 = vor.u32 %v7637_v62, %v6799_v5  ;;  %v7060_v5 = vor.u32 %v7701_v35, %v7057_v36  ;;  %v7718_v35 = vld [vmem:[#allocation7 + $0x8c8] sm:$0xf0] }
 0x293   :  { %v3865_v16 = vadd.f32 %v3864_v20, %v3324_v30  ;;  %v6955_v30 = vld [vmem:[#allocation7 + $0x770] sm:$0xf]  ;;  %v7108_v20 = vor.u32 %v7713_v47, %v7105_v43  ;;  %v7039_v43 = vld [vmem:[#allocation7 + $0x818] sm:$0xf] }
 0x294   :  { %v6956_v21 = vor.u32 %v7676_v13, %v6955_v30  ;;  %v7704_v30 = vld [vmem:[#allocation7 + $0x85c] sm:$0xf]  ;;  %v7069_v13 = vld [vmem:[#allocation7 + $0x864] sm:$0xf0] }
 0x295   :  { %v3879_v2 = vadd.f32 %v3878_v31, %v3865_v16  ;;  %4744 = vmatpush.bf16.msrb.mxu0 %v6848_v14  ;;  %v6919_v31 = vld [vmem:[#allocation7 + $0x728] sm:$0xf]  ;;  %v7667_v14 = vld [vmem:[#allocation7 + $0x730] sm:$0xf0]  ;;  %v7093_v16 = vld [vmem:[#allocation7 + $0x894] sm:$0xf0]  ;;  %v7072_v58 = vor.u32 %v7704_v30, %v7069_v13 }
 0x296   :  { %4731 = vmatpush.bf16.msra.mxu3 %v7120_v38  ;;  %v6920_v51 = vor.u32 %v7667_v14, %v6919_v31  ;;  %v7096_v55 = vor.u32 %v7710_v39, %v7093_v16  ;;  %v6871_v38 = vld [vmem:[#allocation7 + $0x6c8] sm:$0xf]  ;;  %v7691_v14 = vld [vmem:[#allocation7 + $0x7f0] sm:$0xf0]  ;;  %v7003_v39 = vld [vmem:[#allocation7 + $0x7d0] sm:$0xf] }
 0x297   :  { %v3893_v8 = vadd.f32 %v3892_v22, %v3879_v2  ;;  %v7631_v22 = vld [vmem:[#allocation7 + $0x610] sm:$0xf0]  ;;  %v6907_v2 = vld [vmem:[#allocation7 + $0x710] sm:$0xf]  ;;  %v7015_v31 = vld [vmem:[#allocation7 + $0x7e8] sm:$0xf] }
 0x298   :  { %v6776_v27 = vor.u32 %v7631_v22, %v6775_v34  ;;  %v6908_v42 = vor.u32 %v7664_v9, %v6907_v2  ;;  %v7688_v16 = vld [vmem:[#allocation7 + $0x7d8] sm:$0xf0]  ;;  %v7679_v30 = vld [vmem:[#allocation7 + $0x790] sm:$0xf0] }
 0x299   :  { %v3984_v26 = vmax.f32 %v3893_v8, 0.0  ;;  %4745 = vmatpush.bf16.msrb.mxu0 %v6836_v18  ;;  %v7081_v18 = vld [vmem:[#allocation7 + $0x87c] sm:$0xf0]  ;;  %v7004_v34 = vor.u32 %v7688_v16, %v7003_v39 }
 0x29a   :  { %4732 = vmatpush.bf16.msra.mxu3 %v7108_v20  ;;  %v7084_v32 = vor.u32 %v7707_v24, %v7081_v18  ;;  %v7682_v24 = vld [vmem:[#allocation7 + $0x7a8] sm:$0xf0] }
 0x29b   :  { %v8132_v44 = vpack.c.bf16 %v3984_v26, %v3980_v29  ;;  %v7661_v29 = vld [vmem:[#allocation7 + $0x700] sm:$0xf0] }
 0x29c   :  { %v6896_v26 = vor.u32 %v7661_v29, %v6895_v52  ;;  %v3946_v10 = vpop.f32.mrf.mxu1  ;;  %v7147_v52 = vld [vmem:[#allocation7 + $0x8f0] sm:$0xf]  ;;  %v7724_v29 = vld [vmem:[#allocation7 + $0x8f8] sm:$0xf0] }
 0x29d   :  { %4653 = vmatmul.bf16.vlgmr.msrb.gmra.mxu1 %v8132_v44  ;;  %4746 = vmatpush.bf16.msrb.mxu0 %v6824_v59  ;;  %v3934_v59 = vpop.f32.mrf.mxu0 }
 0x29e   :  { %4757 = vmatpush.bf16.msrb.mxu1 %v6956_v21  ;;  %4733 = vmatpush.bf16.msra.mxu3 %v7096_v55  ;;  %v6883_v21 = vld [vmem:[#allocation7 + $0x6e0] sm:$0xf]  ;;  %v6991_v55 = vld [vmem:[#allocation7 + $0x7b8] sm:$0xf] }
 0x29f   :  { %v6884_v49 = vor.u32 %v7658_v23, %v6883_v21  ;;  %v7721_v21 = vld [vmem:[#allocation7 + $0x8e0] sm:$0xf0] }
 0x2a0   :  { %4695 = vmatmul.bf16.vlgmr.msra.gmra.mxu0 %v8129_v57 }
 0x2a1   :  { %v3904_v60 = vpop.f32.mrf.mxu2  ;;  %4747 = vmatpush.bf16.msrb.mxu0 %v6812_v54  ;;  %v7051_v54 = vld [vmem:[#allocation7 + $0x830] sm:$0xf] }
 0x2a2   :  { %4758 = vmatpush.bf16.msrb.mxu1 %v6944_v4  ;;  %v3905_v19 = vadd.f32 %v3904_v60, %v3325_v53  ;;  %4734 = vmatpush.bf16.msra.mxu3 %v7084_v32  ;;  %v7700_v4 = vld [vmem:[#allocation7 + $0x838] sm:$0xf0]  ;;  %v7655_v60 = vld [vmem:[#allocation7 + $0x6d0] sm:$0xf0] }
 0x2a3   :  { %v7052_v1 = vor.u32 %v7700_v4, %v7051_v54  ;;  %v6872_v47 = vor.u32 %v7655_v60, %v6871_v38  ;;  %v7099_v54 = vld [vmem:[#allocation7 + $0x890] sm:$0xf]  ;;  %v7712_v4 = vld [vmem:[#allocation7 + $0x898] sm:$0xf0]  ;;  %v7087_v38 = vld [vmem:[#allocation7 + $0x878] sm:$0xf] }
 0x2a4   :  { %v3948_v22 = vpop.f32.mrf.mxu1  ;;  %v7709_v60 = vld [vmem:[#allocation7 + $0x880] sm:$0xf0] }
 0x2a5   :  { %4748 = vmatpush.bf16.msrb.mxu0 %v6800_v6  ;;  %v7027_v6 = vld [vmem:[#allocation7 + $0x800] sm:$0xf] }
 0x2a6   :  { %4759 = vmatpush.bf16.msrb.mxu1 %v6932_v7  ;;  %4735 = vmatpush.bf16.msra.mxu3 %v7072_v58  ;;  %v7694_v7 = vld [vmem:[#allocation7 + $0x808] sm:$0xf0] }
 0x2a7   :  { %v7028_v11 = vor.u32 %v7694_v7, %v7027_v6 }
 0x2a9   :  { %v3906_v61 = vpop.f32.mrf.mxu2  ;;  %4749 = vmatpush.bf16.msrb.mxu0 %v6788_v40  ;;  %v7016_v40 = vor.u32 %v7691_v14, %v7015_v31 }
 0x2aa   :  { %v3918_v63 = vpop.f32.mrf.mxu3  ;;  %4760 = vmatpush.bf16.msrb.mxu1 %v6920_v51  ;;  %v3907_v8 = vadd.f32 %v3906_v61, %v3325_v53  ;;  %4736 = vmatpush.bf16.msra.mxu3 %v7060_v5  ;;  %v7697_v53 = vld [vmem:[#allocation7 + $0x820] sm:$0xf0]  ;;  %v7100_v5 = vor.u32 %v7712_v4, %v7099_v54 }
 0x2ab   :  { %v3919_v17 = vadd.f32 %v3918_v63, %v3905_v19  ;;  %v7685_v63 = vld [vmem:[#allocation7 + $0x7c0] sm:$0xf0] }
 0x2ac   :  { %v6992_v61 = vor.u32 %v7685_v63, %v6991_v55 }
 0x2ad   :  { %4709 = vmatmul.bf16.vlgmr.msra.gmra.mxu1 %v8132_v44  ;;  %v3933_v48 = vadd.f32 %v3932_v3, %v3919_v17  ;;  %4750 = vmatpush.bf16.msrb.mxu0 %v6776_v27  ;;  %v3326_v3 = vperm.slane %v8125_v56, 3  ;;  %v6979_v27 = vld [vmem:[#allocation7 + $0x7a0] sm:$0xf] }
 0x2ae   :  { %4761 = vmatpush.bf16.msrb.mxu1 %v6908_v42  ;;  %v6980_v32 = vor.u32 %v7682_v24, %v6979_v27 }
 0x2af   :  { %v3981_v0 = vmax.f32 %v3933_v48, 0.0  ;;  %v3947_v19 = vadd.f32 %v3946_v10, %v3326_v3  ;;  %v3949_v9 = vadd.f32 %v3948_v22, %v3326_v3  ;;  %v4805_v3 = vld [vmem:[%s8160_s4] sm:$0x7]  ;;  %s7846_s4 = smov [#allocation8]  }
 0x2b0   :  { %4751 = vmatmul.bf16.vlgmr.msrb.gmra.mxu0 %v8129_v57  ;;  %v7040_v57 = vor.u32 %v7697_v53, %v7039_v43  ;;  %v7703_v53 = vld [vmem:[#allocation7 + $0x850] sm:$0xf0]  ;;  %s4829_s18 = sshll.u32 %s7846_s4, 4  ;;  %s4830_s18 = int_to_ptr.vmem [resolvable:$true] %s4829_s18 }
 0x2b2   :  { %v3920_v37 = vpop.f32.mrf.mxu3  ;;  %4762 = vmatpush.bf16.msrb.mxu1 %v6896_v26  ;;  %v7148_v26 = vor.u32 %v7724_v29, %v7147_v52  ;;  %v4808_v29 = vperm.slane %v4805_v3, 1 }
 0x2b3   :  { %v3921_v15 = vadd.f32 %v3920_v37, %v3907_v8  ;;  %v6967_v8 = vld [vmem:[#allocation7 + $0x788] sm:$0xf] }
 0x2b4   :  { %v6968_v37 = vor.u32 %v7679_v30, %v6967_v8 }
 0x2b5   :  { %v3935_v50 = vadd.f32 %v3934_v59, %v3921_v15  ;;  %v7135_v59 = vld [vmem:[#allocation7 + $0x8d8] sm:$0xf]  ;;  %v7123_v15 = vld [vmem:[#allocation7 + $0x8c0] sm:$0xf] }
 0x2b6   :  { %4763 = vmatpush.bf16.msrb.mxu1 %v6884_v49  ;;  %v7136_v23 = vor.u32 %v7721_v21, %v7135_v59  ;;  %v7124_v36 = vor.u32 %v7718_v35, %v7123_v15 }
 0x2b7   :  { %v3985_v62 = vmax.f32 %v3935_v50, 0.0  ;;  %v7715_v50 = vld [vmem:[#allocation7 + $0x8b0] sm:$0xf0] }
 0x2b9   :  { %v3989_v12 = vpack.c.bf16 %v3985_v62, %v3981_v0  ;;  %v7111_v0 = vld [vmem:[#allocation7 + $0x8a8] sm:$0xf]  ;;  %v7088_v62 = vor.u32 %v7709_v60, %v7087_v38 }
 0x2ba   :  { %4764 = vmatpush.bf16.msrb.mxu1 %v6872_v47  ;;  %v7112_v49 = vor.u32 %v7715_v50, %v7111_v0  ;;  %v7706_v47 = vld [vmem:[#allocation7 + $0x868] sm:$0xf0]  ;;  %v4809_v50 = vperm.slane %v4805_v3, 2 }
 0x2bb   :  { %4667 = vmatmul.bf16.vlgmr.msrb.gmra.mxu2 %v3989_v12 }
 0x2bc   :  { %4771 = vmatpush.bf16.msrb.mxu2 %v7052_v1  ;;  %v7075_v1 = vld [vmem:[#allocation7 + $0x860] sm:$0xf] }
 0x2bd   :  { %4765 = vmatmul.bf16.vlgmr.msrb.gmra.mxu1 %v8132_v44  ;;  %v7076_v43 = vor.u32 %v7706_v47, %v7075_v1 }
 0x2c0   :  { %4772 = vmatpush.bf16.msrb.mxu2 %v7040_v57 }
 0x2c1   :  { %v3960_v20 = vpop.f32.mrf.mxu2 }
 0x2c2   :  { %v3961_v2 = vadd.f32 %v3960_v20, %v3947_v19  ;;  %v4807_v19 = vperm.slane %v4805_v3, 0 }
 0x2c4   :  { %4773 = vmatpush.bf16.msrb.mxu2 %v7028_v11 }
 0x2c8   :  { %4774 = vmatpush.bf16.msrb.mxu2 %v7016_v40 }
 0x2c9   :  { %v3962_v44 = vpop.f32.mrf.mxu2 }
 0x2ca   :  { %v3974_v51 = vpop.f32.mrf.mxu3  ;;  %v3963_v56 = vadd.f32 %v3962_v44, %v3949_v9 }
 0x2cb   :  { %4723 = vmatmul.bf16.vlgmr.msra.gmra.mxu2 %v3989_v12  ;;  %v3975_v18 = vadd.f32 %v3974_v51, %v3961_v2 }
 0x2cc   :  { %4775 = vmatpush.bf16.msrb.mxu2 %v7004_v34 }
 0x2cd   :  { %v3982_v13 = vmax.f32 %v3975_v18, 0.0 }
 0x2d0   :  { %4776 = vmatpush.bf16.msrb.mxu2 %v6992_v61 }
 0x2d2   :  { %v3976_v17 = vpop.f32.mrf.mxu3 }
 0x2d3   :  { %v3977_v42 = vadd.f32 %v3976_v17, %v3963_v56 }
 0x2d4   :  { %4777 = vmatpush.bf16.msrb.mxu2 %v6980_v32 }
 0x2d5   :  { %v3986_v48 = vmax.f32 %v3977_v42, 0.0 }
 0x2d7   :  { %v3990_v58 = vpack.c.bf16 %v3986_v48, %v3982_v13 }
 0x2d8   :  { %4778 = vmatpush.bf16.msrb.mxu2 %v6968_v37 }
 0x2d9   :  { %4681 = vmatmul.bf16.vlgmr.msrb.gmra.mxu3 %v3990_v58 }
 0x2da   :  { %4785 = vmatpush.bf16.msrb.mxu3 %v7148_v26 }
 0x2db   :  { %4779 = vmatmul.bf16.vlgmr.msrb.gmra.mxu2 %v3989_v12  ;;  %v7063_v12 = vld [vmem:[#allocation7 + $0x848] sm:$0xf] }
 0x2dc   :  { %v7064_v57 = vor.u32 %v7703_v53, %v7063_v12 }
 0x2de   :  { %4786 = vmatpush.bf16.msrb.mxu3 %v7136_v23 }
 0x2e2   :  { %4787 = vmatpush.bf16.msrb.mxu3 %v7124_v36 }
 0x2e6   :  { %4788 = vmatpush.bf16.msrb.mxu3 %v7112_v49 }
 0x2e9   :  { %4737 = vmatmul.bf16.vlgmr.msra.gmra.mxu3 %v3990_v58 }
 0x2ea   :  { %4789 = vmatpush.bf16.msrb.mxu3 %v7100_v5 }
 0x2ee   :  { %4790 = vmatpush.bf16.msrb.mxu3 %v7088_v62 }
 0x2f2   :  { %4791 = vmatpush.bf16.msrb.mxu3 %v7076_v43 }
 0x2f6   :  { %4792 = vmatpush.bf16.msrb.mxu3 %v7064_v57 }
 0x2f9   :  { %4793 = vmatmul.bf16.vlgmr.msrb.gmra.mxu3 %v3990_v58 }
 0x30d   :  { %v4640_v7 = vpop.f32.mrf.mxu0 }
 0x315   :  { %v4642_v20 = vpop.f32.mrf.mxu0 }
 0x31a   :  { %v4654_v6 = vpop.f32.mrf.mxu1 }
 0x31b   :  { %v4655_v14 = vadd.f32 %v4654_v6, %v4640_v7 }
 0x31d   :  { %v4696_v22 = vpop.f32.mrf.mxu0 }
 0x322   :  { %v4656_v11 = vpop.f32.mrf.mxu1 }
 0x323   :  { %v4657_v55 = vadd.f32 %v4656_v11, %v4642_v20 }
 0x325   :  { %v4698_v17 = vpop.f32.mrf.mxu0 }
 0x32a   :  { %v4710_v34 = vpop.f32.mrf.mxu1 }
 0x32b   :  { %v4711_v24 = vadd.f32 %v4710_v34, %v4696_v22 }
 0x332   :  { %v4712_v18 = vpop.f32.mrf.mxu1 }
 0x333   :  { %v4713_v30 = vadd.f32 %v4712_v18, %v4698_v17 }
 0x33a   :  { %v4766_v26 = vpop.f32.mrf.mxu1 }
 0x33e   :  { %v4668_v10 = vpop.f32.mrf.mxu2 }
 0x33f   :  { %v4669_v40 = vadd.f32 %v4668_v10, %v4655_v14 }
 0x342   :  { %v4768_v49 = vpop.f32.mrf.mxu1 }
 0x346   :  { %v4670_v31 = vpop.f32.mrf.mxu2 }
 0x347   :  { %v4671_v44 = vadd.f32 %v4670_v31, %v4657_v55 }
 0x34e   :  { %v4724_v2 = vpop.f32.mrf.mxu2 }
 0x34f   :  { %v4725_v42 = vadd.f32 %v4724_v2, %v4711_v24 }
 0x356   :  { %v4726_v32 = vpop.f32.mrf.mxu2 }
 0x357   :  { %v4727_v48 = vadd.f32 %v4726_v32, %v4713_v30 }
 0x35c   :  { %v4682_v39 = vpop.f32.mrf.mxu3 }
 0x35d   :  { %v4683_v16 = vadd.f32 %v4682_v39, %v4669_v40 }
 0x35e   :  { %v4780_v59 = vpop.f32.mrf.mxu2 }
 0x35f   :  { %v4799_v51 = vadd.f32 %v4683_v16, %v8100_v25 }
 0x361   :  { %v4813_v63 = vadd.f32 %v4807_v19, %v4799_v51 }
 0x363   :  { %4819 = vst [vmem:[#allocation8] sm:$0xff] %v4813_v63 }
 0x364   :  { %v4684_v9 = vpop.f32.mrf.mxu3 }
 0x365   :  { %v4685_v61 = vadd.f32 %v4684_v9, %v4671_v44 }
 0x366   :  { %v4782_v4 = vpop.f32.mrf.mxu2 }
 0x367   :  { %v4802_v27 = vadd.f32 %v4685_v61, %v8103_v45  ;;  %v4752_v45 = vpop.f32.mrf.mxu0 }
 0x368   :  { %v4767_v23 = vadd.f32 %v4766_v26, %v4752_v45 }
 0x369   :  { %v4816_v56 = vadd.f32 %v4807_v19, %v4802_v27 }
 0x36a   :  { %v4781_v35 = vadd.f32 %v4780_v59, %v4767_v23 }
 0x36b   :  { %4822 = vst [vmem:[#allocation8 + $0x18] sm:$0xff] %v4816_v56 }
 0x36c   :  { %v4738_v52 = vpop.f32.mrf.mxu3 }
 0x36d   :  { %v4739_v25 = vadd.f32 %v4738_v52, %v4725_v42 }
 0x36f   :  { %v4800_v8 = vadd.f32 %v4739_v25, %v8112_v28  ;;  %v4754_v54 = vpop.f32.mrf.mxu0 }
 0x370   :  { %v4769_v5 = vadd.f32 %v4768_v49, %v4754_v54 }
 0x371   :  { %v4814_v13 = vadd.f32 %v4808_v29, %v4800_v8 }
 0x372   :  { %v4783_v60 = vadd.f32 %v4782_v4, %v4769_v5 }
 0x373   :  { %4820 = vst [vmem:[#allocation8 + $0x8] sm:$0xff] %v4814_v13 }
 0x374   :  { %v4740_v58 = vpop.f32.mrf.mxu3 }
 0x375   :  { %v4741_v37 = vadd.f32 %v4740_v58, %v4727_v48 }
 0x377   :  { %v4803_v21 = vadd.f32 %v4741_v37, %v8114_v41 }
 0x379   :  { %v4817_v15 = vadd.f32 %v4808_v29, %v4803_v21 }
 0x37b   :  { %4823 = vst [vmem:[#allocation8 + $0x20] sm:$0xff] %v4817_v15 }
 0x37c   :  { %v4794_v36 = vpop.f32.mrf.mxu3 }
 0x37d   :  { %v4795_v0 = vadd.f32 %v4794_v36, %v4781_v35 }
 0x37f   :  { %v4801_v28 = vadd.f32 %v4795_v0, %v8118_v33 }
 0x381   :  { %v4815_v38 = vadd.f32 %v4809_v50, %v4801_v28 }
 0x383   :  { %4821 = vst [vmem:[#allocation8 + $0x10] sm:$0xff] %v4815_v38 }
 0x384   :  { %v4796_v62 = vpop.f32.mrf.mxu3 }
 0x385   :  { %v4797_v1 = vadd.f32 %v4796_v62, %v4783_v60 }
 0x387   :  { %v4804_v41 = vadd.f32 %v4797_v1, %v8120_v46 }
 0x389   :  { %v4818_v47 = vadd.f32 %v4809_v50, %v4804_v41 }
 0x38b   :  { %4824 = vst [vmem:[#allocation8 + $0x28] sm:$0xff] %v4818_v47 }
 0x38c   :  { %4837 = dma.vmem_to_hbm [thread:$0]  %s4830_s18, 768, %s4832_s21, [#allocation4], %s7841_s30, %s7841_s30, %s7842_s6  }
 0x38d   :  { %7835 = dma.done.wait [#allocation4], 768  }
 0x38e   :  { %7836 = vsyncadd [#allocation4], 4294966528 }
 0x38f   :  { %4842 = vsyncpa [#allocation3], 1 }
 0x390   :  { %4843 = vsyncpa [#allocation6], 1 }
 0x391   :  { %4844 = vsyncpa [#allocation4], 1 }

</bundles_post_ra>
